<compile_context>
chip_gen: v7x
topology: tpu7x:2x2x1
jax: 0.10.0
libtpu: 0.0.40
codegen_flags: <defaults>
</compile_context>

<pallas_src>
import functools

import numpy as np
import jax
import jax.numpy as jnp
from jax.experimental import pallas as pl
from jax.experimental.pallas import tpu as pltpu

# ---- model hyper-parameters (small, consistent with the module) ------------
N_EMBD = 32
N_HEAD = 4
BLOCK_SIZE = 8          # max episode length T; transformer context = 3*T
N_LAYER = 2
DROPOUT = 0.0           # eval semantics; FeedForward never applies dropout
N_STEPS = 16
N_STATES = 10
N_ACTIONS = 6

HEAD_DIM = N_EMBD // N_HEAD
EPS = 1e-5
NEG_INF = -1e30

# 128-lane-aligned packed-weight layout (per layer: wqkv@+0, wo@+128, w1@+256)
LAYER_LANES = 384
WMAT_LANES = N_LAYER * LAYER_LANES + 128          # + 128-lane head block
W2_LANES = N_LAYER * 128
VEC_ROWS = ((N_LAYER * 8 + 1 + 7) // 8) * 8


def _layernorm(x, gamma, beta):
    mu = jnp.mean(x, axis=-1, keepdims=True)
    var = jnp.mean((x - mu) ** 2, axis=-1, keepdims=True)
    return (x - mu) * jax.lax.rsqrt(var + EPS) * gamma + beta


# ---------------------------------------------------------------------------
# Fused Pallas kernel: all transformer blocks + action head
# ---------------------------------------------------------------------------
def fused_dt_kernel(x_ref, vmask_ref, amask_ref, wmat_ref, w2_ref, vec_ref,
                    out_ref, *, n_layer, n_head):
    """x_ref: (R=B*S, C) interleaved tokens.  out_ref: (R, 128) padded logits.

    vmask_ref: (n_head*R, C) 0/1 head mask (row block h keeps lanes of head h)
    amask_ref: (n_head*R, R) additive 0/-1e30 block-diag causal mask (tiled)
    wmat_ref:  (C, WMAT_LANES) bf16  per layer: wqkv@+0 | wo@+128 | w1@+256 ;
               head weights (zero-padded to 128 lanes) at n_layer*384
    w2_ref:    (4C, W2_LANES) bf16   layer l's w2 at lanes l*128 : l*128+C
    vec_ref:   (VEC_ROWS, 128) f32   per layer 8 rows of LN/bias vectors,
               head bias (padded to 128) at row n_layer*8
    """
    R, C = x_ref.shape
    dh = C // n_head
    scale = 1.0 / (dh ** 0.5)
    bf16 = jnp.bfloat16

    x = x_ref[...]                                   # (R, C) f32, resident

    for l in range(n_layer):                         # static unroll over layers
        c0 = l * LAYER_LANES
        r0 = l * 8
        g1 = vec_ref[r0 + 0:r0 + 1, :C]
        be1 = vec_ref[r0 + 1:r0 + 2, :C]
        bqkv = vec_ref[r0 + 2:r0 + 3, :3 * C]
        bo = vec_ref[r0 + 3:r0 + 4, :C]
        g2 = vec_ref[r0 + 4:r0 + 5, :C]
        be2 = vec_ref[r0 + 5:r0 + 6, :C]
        b1 = vec_ref[r0 + 6:r0 + 7, :4 * C]
        b2 = vec_ref[r0 + 7:r0 + 8, :C]

        # --- LN1 + causal multi-head self-attention (all heads at once) ---
        xn = _layernorm(x, g1, be1)
        qkv = jnp.dot(xn.astype(bf16), wmat_ref[:, c0:c0 + 3 * C],
                      preferred_element_type=jnp.float32) + bqkv
        q, k, v = qkv[:, :C], qkv[:, C:2 * C], qkv[:, 2 * C:]

        vmask = vmask_ref[...]                       # (n_head*R, C) 0/1
        # heads stacked along sublanes; head mask zeroes cross-head lanes
        q_blk = jnp.concatenate([q] * n_head, axis=0) * vmask
        kt_b = k.T.astype(bf16)                      # (C, R)
        s = jnp.dot(q_blk.astype(bf16), kt_b,
                    preferred_element_type=jnp.float32)       # (n_head*R, R)
        s = s * scale + amask_ref[...]               # additive block-diag causal
        s = s - jnp.max(s, axis=-1, keepdims=True)
        p = jnp.exp(s)
        p = p * pl.reciprocal(jnp.sum(p, axis=-1, keepdims=True), approx=True)
        o_blk = jnp.dot(p.astype(bf16), v.astype(bf16),
                        preferred_element_type=jnp.float32) * vmask
        o = o_blk[0:R, :]                            # fold heads (already at
        for h in range(1, n_head):                   # their own lanes)
            o = o + o_blk[h * R:(h + 1) * R, :]
        attn = jnp.dot(o.astype(bf16), wmat_ref[:, c0 + 128:c0 + 128 + C],
                       preferred_element_type=jnp.float32) + bo
        x = x + attn

        # --- LN2 + FeedForward + residual ---
        xn2 = _layernorm(x, g2, be2)
        h1 = jnp.maximum(
            jnp.dot(xn2.astype(bf16), wmat_ref[:, c0 + 256:c0 + 256 + 4 * C],
                    preferred_element_type=jnp.float32) + b1, 0.0)
        x = x + jnp.dot(h1.astype(bf16), w2_ref[:, l * 128:l * 128 + C],
                        preferred_element_type=jnp.float32) + b2
        # TODO(synk): dropout omitted (eval semantics; DROPOUT=0.0 and
        # FeedForward.forward never applies its Dropout module anyway).

    # --- action head: lane-dense 128-wide store; real 6 lanes sliced outside ---
    head_b = vec_ref[n_layer * 8:n_layer * 8 + 1, :]
    out_ref[...] = jnp.dot(x.astype(bf16), wmat_ref[:, n_layer * LAYER_LANES:],
                           preferred_element_type=jnp.float32) + head_b


def run_fused_model(x2d, vmask, amask, wmat, w2s, vec):
    """Single gridless pallas_call: whole arrays resident in VMEM."""
    R, _ = x2d.shape
    # TODO(synk): on v7x add grid=(B,), dimension_semantics=("parallel",) with
    # (S, C)/(S, 128) BlockSpecs so each batch element maps to one of the two
    # TensorCores; on v5e/v6e (1 TC) the gridless form avoids per-step overhead.
    return pl.pallas_call(
        functools.partial(fused_dt_kernel, n_layer=N_LAYER, n_head=N_HEAD),
        out_shape=jax.ShapeDtypeStruct((R, 128), jnp.float32),
        in_specs=[pl.BlockSpec(memory_space=pltpu.VMEM)] * 6,
        out_specs=pl.BlockSpec(memory_space=pltpu.VMEM),
    )(x2d, vmask, amask, wmat, w2s, vec)


# ---------------------------------------------------------------------------
# masks (trace-time numpy constants) + parameter packing + init + forward
# ---------------------------------------------------------------------------
def build_masks(B, S):
    """Precompute head mask + additive block-diag causal mask (host side)."""
    R = B * S
    r = np.arange(R)
    allowed = (r[:, None] // S == r[None, :] // S) & \
              (r[None, :] % S <= r[:, None] % S)
    amask = np.where(allowed, 0.0, NEG_INF).astype(np.float32)   # (R, R)
    amask = np.tile(amask, (N_HEAD, 1))                          # (n_head*R, R)
    head_of_lane = np.arange(N_EMBD) // HEAD_DIM                 # (C,)
    head_of_row = np.repeat(np.arange(N_HEAD), R)                # (n_head*R,)
    vmask = (head_of_row[:, None] == head_of_lane[None, :]).astype(np.float32)
    return jnp.asarray(vmask), jnp.asarray(amask)


def pack_params(params):
    """Pack all per-layer parameters + head into 3 lane-aligned slabs."""
    C, A, nl = N_EMBD, N_ACTIONS, N_LAYER
    wmat = jnp.zeros((C, WMAT_LANES), jnp.float32)
    w2s = jnp.zeros((4 * C, W2_LANES), jnp.float32)
    vec = jnp.zeros((VEC_ROWS, 128), jnp.float32)
    for l, bp in enumerate(params["blocks"]):
        c0 = l * LAYER_LANES
        wmat = wmat.at[:, c0:c0 + 3 * C].set(bp["wqkv"])
        wmat = wmat.at[:, c0 + 128:c0 + 128 + C].set(bp["wo"])
        wmat = wmat.at[:, c0 + 256:c0 + 256 + 4 * C].set(bp["w1"])
        w2s = w2s.at[:, l * 128:l * 128 + C].set(bp["w2"])
        r0 = l * 8
        vec = vec.at[r0 + 0, :C].set(bp["g1"][0])
        vec = vec.at[r0 + 1, :C].set(bp["be1"][0])
        vec = vec.at[r0 + 2, :3 * C].set(bp["bqkv"][0])
        vec = vec.at[r0 + 3, :C].set(bp["bo"][0])
        vec = vec.at[r0 + 4, :C].set(bp["g2"][0])
        vec = vec.at[r0 + 5, :C].set(bp["be2"][0])
        vec = vec.at[r0 + 6, :4 * C].set(bp["b1"][0])
        vec = vec.at[r0 + 7, :C].set(bp["b2"][0])
    wmat = wmat.at[:, nl * LAYER_LANES:nl * LAYER_LANES + A].set(params["head_w"])
    vec = vec.at[nl * 8, :A].set(params["head_b"][0])
    # weights bf16 (MXU operands); LN/bias vectors stay f32
    return wmat.astype(jnp.bfloat16), w2s.astype(jnp.bfloat16), vec


def init_params(key):
    keys = iter(jax.random.split(key, 128))

    def nrm(shape, s):
        return (s * jax.random.normal(next(keys), shape)).astype(jnp.float32)

    C = N_EMBD
    params = {
        # position_embedding_table is defined in __init__ but unused in forward.
        "timestep_emb": nrm((N_STEPS, C), 0.5),
        "state_emb": nrm((N_STATES, C), 0.5),
        "action_emb": nrm((N_ACTIONS, C), 0.5),
        "return_emb": nrm((2, C), 0.5),
        "head_w": nrm((C, N_ACTIONS), 0.1),          # Linear weight, pre-transposed
        "head_b": nrm((1, N_ACTIONS), 0.1),
        "blocks": [],
    }
    for _ in range(N_LAYER):
        params["blocks"].append({
            "g1": 1.0 + nrm((1, C), 0.1), "be1": nrm((1, C), 0.1),
            "wqkv": nrm((C, 3 * C), 0.1), "bqkv": nrm((1, 3 * C), 0.1),
            "wo": nrm((C, C), 0.1), "bo": nrm((1, C), 0.1),
            "g2": 1.0 + nrm((1, C), 0.1), "be2": nrm((1, C), 0.1),
            "w1": nrm((C, 4 * C), 0.1), "b1": nrm((1, 4 * C), 0.1),
            "w2": nrm((4 * C, C), 0.1), "b2": nrm((1, C), 0.1),
        })
    params["packed"] = pack_params(params)           # pack slabs once
    return params


def decision_transformer_forward(params, states, actions, rewards, timesteps,
                                 targets=None):
    B, T = states.shape
    C = N_EMBD
    time_e = params["timestep_emb"][timesteps]                  # (B, T, C)
    act_e = params["action_emb"][actions] + time_e
    state_e = params["state_emb"][states] + time_e
    ret_e = params["return_emb"][rewards] + time_e
    seq = jnp.stack([state_e, act_e, ret_e], axis=1)            # (B, 3, T, C)
    seq = jnp.transpose(seq, (0, 2, 1, 3)).reshape(B, 3 * T, C)

    S = 3 * T
    x2d = seq.reshape(B * S, C)                                 # batch folded
    vmask, amask = build_masks(B, S)                            # constants
    wmat, w2s, vec = params["packed"]
    logits_all = run_fused_model(x2d, vmask, amask, wmat, w2s, vec)  # (B*S,128)
    logits = logits_all[:, :N_ACTIONS].reshape(B, S, N_ACTIONS)[:, 0::3]

    loss = None
    if targets is not None:
        logp = jax.nn.log_softmax(logits.reshape(B * T, N_ACTIONS), axis=-1)
        loss = -jnp.mean(logp[jnp.arange(B * T), targets.reshape(-1)])
    return logits, loss


# ---------------------------------------------------------------------------
# pure-JAX f32 reference (mirrors the PyTorch math) for validation
# ---------------------------------------------------------------------------
def _ref_block(x, p):
    B, S, C = x.shape
    dh = C // N_HEAD
    scale = 1.0 / (dh ** 0.5)
    xn = _layernorm(x, p["g1"], p["be1"])
    qkv = xn @ p["wqkv"] + p["bqkv"]
    q, k, v = qkv[..., :C], qkv[..., C:2 * C], qkv[..., 2 * C:]
    q = q.reshape(B, S, N_HEAD, dh).transpose(0, 2, 1, 3)
    k = k.reshape(B, S, N_HEAD, dh).transpose(0, 2, 1, 3)
    v = v.reshape(B, S, N_HEAD, dh).transpose(0, 2, 1, 3)
    s = jnp.einsum("bhqd,bhkd->bhqk", q, k) * scale
    mask = jnp.tril(jnp.ones((S, S), bool))
    s = jnp.where(mask, s, NEG_INF)
    pa = jax.nn.softmax(s, axis=-1)
    attn = jnp.einsum("bhqk,bhkd->bhqd", pa, v).transpose(0, 2, 1, 3).reshape(B, S, C)
    x = x + attn @ p["wo"] + p["bo"]
    xn2 = _layernorm(x, p["g2"], p["be2"])
    h1 = jnp.maximum(xn2 @ p["w1"] + p["b1"], 0.0)
    return x + h1 @ p["w2"] + p["b2"]


def ref_forward(params, states, actions, rewards, timesteps, targets=None):
    B, T = states.shape
    time_e = params["timestep_emb"][timesteps]
    act_e = params["action_emb"][actions] + time_e
    state_e = params["state_emb"][states] + time_e
    ret_e = params["return_emb"][rewards] + time_e
    seq = jnp.stack([state_e, act_e, ret_e], axis=1)
    seq = jnp.transpose(seq, (0, 2, 1, 3)).reshape(B, 3 * T, N_EMBD)
    x = seq
    for bp in params["blocks"]:
        x = _ref_block(x, bp)
    logits = x[:, 0::3] @ params["head_w"] + params["head_b"]
    loss = None
    if targets is not None:
        logp = jax.nn.log_softmax(logits.reshape(B * T, N_ACTIONS), axis=-1)
        loss = -jnp.mean(logp[jnp.arange(B * T), targets.reshape(-1)])
    return logits, loss


# ---------------------------------------------------------------------------
if __name__ == "__main__":
    key = jax.random.PRNGKey(0)
    pkey, dkey = jax.random.split(key)
    params = init_params(pkey)

    B, T = 2, BLOCK_SIZE
    ks = jax.random.split(dkey, 5)
    states = jax.random.randint(ks[0], (B, T), 0, N_STATES, dtype=jnp.int32)
    actions = jax.random.randint(ks[1], (B, T), 0, N_ACTIONS, dtype=jnp.int32)
    rewards = jax.random.randint(ks[2], (B, T), 0, 2, dtype=jnp.int32)
    timesteps = jax.random.randint(ks[3], (B, T), 0, N_STEPS, dtype=jnp.int32)
    targets = jax.random.randint(ks[4], (B, T), 0, N_ACTIONS, dtype=jnp.int32)

    fwd = jax.jit(decision_transformer_forward)
    logits, loss = fwd(params, states, actions, rewards, timesteps, targets)
    logits = jax.block_until_ready(logits)
    loss = jax.block_until_ready(loss)

    ref_logits, ref_loss = ref_forward(
        params, states, actions, rewards, timesteps, targets)

    assert logits.shape == (B, T, N_ACTIONS), logits.shape
    # bf16 matmul operands + approx reciprocal -> ~1e-2 level error vs f32 ref
    assert jnp.allclose(logits, ref_logits, atol=3e-2, rtol=3e-2), \
        float(jnp.max(jnp.abs(logits - ref_logits)))
    assert jnp.allclose(loss, ref_loss, atol=3e-2, rtol=3e-2), (loss, ref_loss)

    print("KERNEL_OK")
</pallas_src>

<mosaic_0001>
module attributes {stable_mosaic.version = 11 : i64} {
  func.func @fused_dt_kernel(%arg0: memref<48x32xf32, #tpu.memory_space<vmem>>, %arg1: memref<192x32xf32, #tpu.memory_space<vmem>>, %arg2: memref<192x48xf32, #tpu.memory_space<vmem>>, %arg3: memref<32x896xbf16, #tpu.memory_space<vmem>>, %arg4: memref<128x256xbf16, #tpu.memory_space<vmem>>, %arg5: memref<24x128xf32, #tpu.memory_space<vmem>>, %arg6: memref<48x128xf32, #tpu.memory_space<vmem>>) attributes {dimension_semantics = [], scalar_prefetch = 0 : i64, scratch_operands = 0 : i64, tpu.core_type = #tpu.core_type<tc>} {
    %c0 = arith.constant 0 : index
    %c0_0 = arith.constant 0 : index
    %0 = vector.load %arg0[%c0, %c0_0] : memref<48x32xf32, #tpu.memory_space<vmem>>, vector<48x32xf32>
    %c0_1 = arith.constant 0 : index
    %c0_2 = arith.constant 0 : index
    %1 = vector.load %arg5[%c0_1, %c0_2] : memref<24x128xf32, #tpu.memory_space<vmem>>, vector<1x32xf32>
    %c1 = arith.constant 1 : index
    %c0_3 = arith.constant 0 : index
    %2 = vector.load %arg5[%c1, %c0_3] : memref<24x128xf32, #tpu.memory_space<vmem>>, vector<1x32xf32>
    %c2 = arith.constant 2 : index
    %c0_4 = arith.constant 0 : index
    %3 = vector.load %arg5[%c2, %c0_4] : memref<24x128xf32, #tpu.memory_space<vmem>>, vector<1x96xf32>
    %c3 = arith.constant 3 : index
    %c0_5 = arith.constant 0 : index
    %4 = vector.load %arg5[%c3, %c0_5] : memref<24x128xf32, #tpu.memory_space<vmem>>, vector<1x32xf32>
    %c4 = arith.constant 4 : index
    %c0_6 = arith.constant 0 : index
    %5 = vector.load %arg5[%c4, %c0_6] : memref<24x128xf32, #tpu.memory_space<vmem>>, vector<1x32xf32>
    %c5 = arith.constant 5 : index
    %c0_7 = arith.constant 0 : index
    %6 = vector.load %arg5[%c5, %c0_7] : memref<24x128xf32, #tpu.memory_space<vmem>>, vector<1x32xf32>
    %c6 = arith.constant 6 : index
    %c0_8 = arith.constant 0 : index
    %7 = vector.load %arg5[%c6, %c0_8] : memref<24x128xf32, #tpu.memory_space<vmem>>, vector<1x128xf32>
    %c7 = arith.constant 7 : index
    %c0_9 = arith.constant 0 : index
    %8 = vector.load %arg5[%c7, %c0_9] : memref<24x128xf32, #tpu.memory_space<vmem>>, vector<1x32xf32>
    %cst = arith.constant dense<0.000000e+00> : vector<48xf32>
    %9 = vector.multi_reduction <add>, %0, %cst [1] : vector<48x32xf32> to vector<48xf32>
    %10 = vector.shape_cast %9 : vector<48xf32> to vector<48x1xf32>
    %cst_10 = arith.constant 3.200000e+01 : f32
    %11 = vector.broadcast %cst_10 : f32 to vector<48x1xf32>
    %12 = arith.divf %10, %11 : vector<48x1xf32>
    %13 = vector.broadcast %12 : vector<48x1xf32> to vector<48x32xf32>
    %14 = arith.subf %0, %13 : vector<48x32xf32>
    %15 = arith.mulf %14, %14 : vector<48x32xf32>
    %cst_11 = arith.constant dense<0.000000e+00> : vector<48xf32>
    %16 = vector.multi_reduction <add>, %15, %cst_11 [1] : vector<48x32xf32> to vector<48xf32>
    %17 = vector.shape_cast %16 : vector<48xf32> to vector<48x1xf32>
    %cst_12 = arith.constant 3.200000e+01 : f32
    %18 = vector.broadcast %cst_12 : f32 to vector<48x1xf32>
    %19 = arith.divf %17, %18 : vector<48x1xf32>
    %20 = vector.broadcast %12 : vector<48x1xf32> to vector<48x32xf32>
    %21 = arith.subf %0, %20 : vector<48x32xf32>
    %cst_13 = arith.constant 9.99999974E-6 : f32
    %22 = vector.broadcast %cst_13 : f32 to vector<48x1xf32>
    %23 = arith.addf %19, %22 : vector<48x1xf32>
    %24 = math.rsqrt %23 : vector<48x1xf32>
    %25 = vector.broadcast %24 : vector<48x1xf32> to vector<48x32xf32>
    %26 = arith.mulf %21, %25 : vector<48x32xf32>
    %27 = vector.broadcast %1 : vector<1x32xf32> to vector<48x32xf32>
    %28 = arith.mulf %26, %27 : vector<48x32xf32>
    %29 = vector.broadcast %2 : vector<1x32xf32> to vector<48x32xf32>
    %30 = arith.addf %28, %29 : vector<48x32xf32>
    %31 = arith.truncf %30 : vector<48x32xf32> to vector<48x32xbf16>
    %c0_14 = arith.constant 0 : index
    %c0_15 = arith.constant 0 : index
    %32 = vector.load %arg3[%c0_14, %c0_15] : memref<32x896xbf16, #tpu.memory_space<vmem>>, vector<32x96xbf16>
    %cst_16 = arith.constant dense<0.000000e+00> : vector<48x96xf32>
    %33 = tpu.matmul %31, %32, %cst_16 {dimension_numbers = #tpu.dot_dimension_numbers<[1], [0], [0], [1], [0, 0, 1, 1], [], []>} : vector<48x32xbf16>, vector<32x96xbf16>, vector<48x96xf32> -> vector<48x96xf32>
    %34 = vector.broadcast %3 : vector<1x96xf32> to vector<48x96xf32>
    %35 = arith.addf %33, %34 : vector<48x96xf32>
    %36 = vector.extract_strided_slice %35 {offsets = [0, 0], sizes = [48, 32], strides = [1, 1]} : vector<48x96xf32> to vector<48x32xf32>
    %37 = vector.extract_strided_slice %35 {offsets = [0, 32], sizes = [48, 32], strides = [1, 1]} : vector<48x96xf32> to vector<48x32xf32>
    %38 = vector.extract_strided_slice %35 {offsets = [0, 64], sizes = [48, 32], strides = [1, 1]} : vector<48x96xf32> to vector<48x32xf32>
    %c0_17 = arith.constant 0 : index
    %c0_18 = arith.constant 0 : index
    %39 = vector.load %arg1[%c0_17, %c0_18] : memref<192x32xf32, #tpu.memory_space<vmem>>, vector<192x32xf32>
    %40 = tpu.concatenate %36, %36, %36, %36 in 0 : vector<48x32xf32>, vector<48x32xf32>, vector<48x32xf32>, vector<48x32xf32> -> vector<192x32xf32>
    %41 = arith.mulf %40, %39 : vector<192x32xf32>
    %42 = tpu.transpose %37, [1, 0] : vector<48x32xf32> -> vector<32x48xf32>
    %43 = arith.truncf %42 : vector<32x48xf32> to vector<32x48xbf16>
    %44 = arith.truncf %41 : vector<192x32xf32> to vector<192x32xbf16>
    %cst_19 = arith.constant dense<0.000000e+00> : vector<192x48xf32>
    %45 = tpu.matmul %44, %43, %cst_19 {dimension_numbers = #tpu.dot_dimension_numbers<[1], [0], [0], [1], [0, 0, 1, 1], [], []>} : vector<192x32xbf16>, vector<32x48xbf16>, vector<192x48xf32> -> vector<192x48xf32>
    %cst_20 = arith.constant 0.353553385 : f32
    %46 = vector.broadcast %cst_20 : f32 to vector<192x48xf32>
    %47 = arith.mulf %45, %46 : vector<192x48xf32>
    %c0_21 = arith.constant 0 : index
    %c0_22 = arith.constant 0 : index
    %48 = vector.load %arg2[%c0_21, %c0_22] : memref<192x48xf32, #tpu.memory_space<vmem>>, vector<192x48xf32>
    %49 = arith.addf %47, %48 : vector<192x48xf32>
    %cst_23 = arith.constant dense<0xFF800000> : vector<192xf32>
    %50 = vector.multi_reduction <maximumf>, %49, %cst_23 [1] : vector<192x48xf32> to vector<192xf32>
    %51 = vector.shape_cast %50 : vector<192xf32> to vector<192x1xf32>
    %52 = vector.broadcast %51 : vector<192x1xf32> to vector<192x48xf32>
    %53 = arith.subf %49, %52 : vector<192x48xf32>
    %54 = math.exp %53 : vector<192x48xf32>
    %cst_24 = arith.constant dense<0.000000e+00> : vector<192xf32>
    %55 = vector.multi_reduction <add>, %54, %cst_24 [1] : vector<192x48xf32> to vector<192xf32>
    %56 = vector.shape_cast %55 : vector<192xf32> to vector<192x1xf32>
    %57 = tpu.reciprocal %56 {approx = true} : vector<192x1xf32> -> vector<192x1xf32>
    %58 = vector.broadcast %57 : vector<192x1xf32> to vector<192x48xf32>
    %59 = arith.mulf %54, %58 : vector<192x48xf32>
    %60 = arith.truncf %59 : vector<192x48xf32> to vector<192x48xbf16>
    %61 = arith.truncf %38 : vector<48x32xf32> to vector<48x32xbf16>
    %cst_25 = arith.constant dense<0.000000e+00> : vector<192x32xf32>
    %62 = tpu.matmul %60, %61, %cst_25 {dimension_numbers = #tpu.dot_dimension_numbers<[1], [0], [0], [1], [0, 0, 1, 1], [], []>} : vector<192x48xbf16>, vector<48x32xbf16>, vector<192x32xf32> -> vector<192x32xf32>
    %63 = arith.mulf %62, %39 : vector<192x32xf32>
    %64 = vector.extract_strided_slice %63 {offsets = [0, 0], sizes = [48, 32], strides = [1, 1]} : vector<192x32xf32> to vector<48x32xf32>
    %65 = vector.extract_strided_slice %63 {offsets = [48, 0], sizes = [48, 32], strides = [1, 1]} : vector<192x32xf32> to vector<48x32xf32>
    %66 = arith.addf %64, %65 : vector<48x32xf32>
    %67 = vector.extract_strided_slice %63 {offsets = [96, 0], sizes = [48, 32], strides = [1, 1]} : vector<192x32xf32> to vector<48x32xf32>
    %68 = arith.addf %66, %67 : vector<48x32xf32>
    %69 = vector.extract_strided_slice %63 {offsets = [144, 0], sizes = [48, 32], strides = [1, 1]} : vector<192x32xf32> to vector<48x32xf32>
    %70 = arith.addf %68, %69 : vector<48x32xf32>
    %71 = arith.truncf %70 : vector<48x32xf32> to vector<48x32xbf16>
    %c0_26 = arith.constant 0 : index
    %c128 = arith.constant 128 : index
    %72 = vector.load %arg3[%c0_26, %c128] : memref<32x896xbf16, #tpu.memory_space<vmem>>, vector<32x32xbf16>
    %cst_27 = arith.constant dense<0.000000e+00> : vector<48x32xf32>
    %73 = tpu.matmul %71, %72, %cst_27 {dimension_numbers = #tpu.dot_dimension_numbers<[1], [0], [0], [1], [0, 0, 1, 1], [], []>} : vector<48x32xbf16>, vector<32x32xbf16>, vector<48x32xf32> -> vector<48x32xf32>
    %74 = vector.broadcast %4 : vector<1x32xf32> to vector<48x32xf32>
    %75 = arith.addf %73, %74 : vector<48x32xf32>
    %76 = arith.addf %0, %75 : vector<48x32xf32>
    %cst_28 = arith.constant dense<0.000000e+00> : vector<48xf32>
    %77 = vector.multi_reduction <add>, %76, %cst_28 [1] : vector<48x32xf32> to vector<48xf32>
    %78 = vector.shape_cast %77 : vector<48xf32> to vector<48x1xf32>
    %cst_29 = arith.constant 3.200000e+01 : f32
    %79 = vector.broadcast %cst_29 : f32 to vector<48x1xf32>
    %80 = arith.divf %78, %79 : vector<48x1xf32>
    %81 = vector.broadcast %80 : vector<48x1xf32> to vector<48x32xf32>
    %82 = arith.subf %76, %81 : vector<48x32xf32>
    %83 = arith.mulf %82, %82 : vector<48x32xf32>
    %cst_30 = arith.constant dense<0.000000e+00> : vector<48xf32>
    %84 = vector.multi_reduction <add>, %83, %cst_30 [1] : vector<48x32xf32> to vector<48xf32>
    %85 = vector.shape_cast %84 : vector<48xf32> to vector<48x1xf32>
    %cst_31 = arith.constant 3.200000e+01 : f32
    %86 = vector.broadcast %cst_31 : f32 to vector<48x1xf32>
    %87 = arith.divf %85, %86 : vector<48x1xf32>
    %88 = vector.broadcast %80 : vector<48x1xf32> to vector<48x32xf32>
    %89 = arith.subf %76, %88 : vector<48x32xf32>
    %cst_32 = arith.constant 9.99999974E-6 : f32
    %90 = vector.broadcast %cst_32 : f32 to vector<48x1xf32>
    %91 = arith.addf %87, %90 : vector<48x1xf32>
    %92 = math.rsqrt %91 : vector<48x1xf32>
    %93 = vector.broadcast %92 : vector<48x1xf32> to vector<48x32xf32>
    %94 = arith.mulf %89, %93 : vector<48x32xf32>
    %95 = vector.broadcast %5 : vector<1x32xf32> to vector<48x32xf32>
    %96 = arith.mulf %94, %95 : vector<48x32xf32>
    %97 = vector.broadcast %6 : vector<1x32xf32> to vector<48x32xf32>
    %98 = arith.addf %96, %97 : vector<48x32xf32>
    %99 = arith.truncf %98 : vector<48x32xf32> to vector<48x32xbf16>
    %c0_33 = arith.constant 0 : index
    %c256 = arith.constant 256 : index
    %100 = vector.load %arg3[%c0_33, %c256] : memref<32x896xbf16, #tpu.memory_space<vmem>>, vector<32x128xbf16>
    %cst_34 = arith.constant dense<0.000000e+00> : vector<48x128xf32>
    %101 = tpu.matmul %99, %100, %cst_34 {dimension_numbers = #tpu.dot_dimension_numbers<[1], [0], [0], [1], [0, 0, 1, 1], [], []>} : vector<48x32xbf16>, vector<32x128xbf16>, vector<48x128xf32> -> vector<48x128xf32>
    %102 = vector.broadcast %7 : vector<1x128xf32> to vector<48x128xf32>
    %103 = arith.addf %101, %102 : vector<48x128xf32>
    %cst_35 = arith.constant 0.000000e+00 : f32
    %104 = vector.broadcast %cst_35 : f32 to vector<48x128xf32>
    %105 = arith.maximumf %103, %104 : vector<48x128xf32>
    %106 = arith.truncf %105 : vector<48x128xf32> to vector<48x128xbf16>
    %c0_36 = arith.constant 0 : index
    %c0_37 = arith.constant 0 : index
    %107 = vector.load %arg4[%c0_36, %c0_37] : memref<128x256xbf16, #tpu.memory_space<vmem>>, vector<128x32xbf16>
    %cst_38 = arith.constant dense<0.000000e+00> : vector<48x32xf32>
    %108 = tpu.matmul %106, %107, %cst_38 {dimension_numbers = #tpu.dot_dimension_numbers<[1], [0], [0], [1], [0, 0, 1, 1], [], []>} : vector<48x128xbf16>, vector<128x32xbf16>, vector<48x32xf32> -> vector<48x32xf32>
    %109 = arith.addf %76, %108 : vector<48x32xf32>
    %110 = vector.broadcast %8 : vector<1x32xf32> to vector<48x32xf32>
    %111 = arith.addf %109, %110 : vector<48x32xf32>
    %c8 = arith.constant 8 : index
    %c0_39 = arith.constant 0 : index
    %112 = vector.load %arg5[%c8, %c0_39] : memref<24x128xf32, #tpu.memory_space<vmem>>, vector<1x32xf32>
    %c9 = arith.constant 9 : index
    %c0_40 = arith.constant 0 : index
    %113 = vector.load %arg5[%c9, %c0_40] : memref<24x128xf32, #tpu.memory_space<vmem>>, vector<1x32xf32>
    %c10 = arith.constant 10 : index
    %c0_41 = arith.constant 0 : index
    %114 = vector.load %arg5[%c10, %c0_41] : memref<24x128xf32, #tpu.memory_space<vmem>>, vector<1x96xf32>
    %c11 = arith.constant 11 : index
    %c0_42 = arith.constant 0 : index
    %115 = vector.load %arg5[%c11, %c0_42] : memref<24x128xf32, #tpu.memory_space<vmem>>, vector<1x32xf32>
    %c12 = arith.constant 12 : index
    %c0_43 = arith.constant 0 : index
    %116 = vector.load %arg5[%c12, %c0_43] : memref<24x128xf32, #tpu.memory_space<vmem>>, vector<1x32xf32>
    %c13 = arith.constant 13 : index
    %c0_44 = arith.constant 0 : index
    %117 = vector.load %arg5[%c13, %c0_44] : memref<24x128xf32, #tpu.memory_space<vmem>>, vector<1x32xf32>
    %c14 = arith.constant 14 : index
    %c0_45 = arith.constant 0 : index
    %118 = vector.load %arg5[%c14, %c0_45] : memref<24x128xf32, #tpu.memory_space<vmem>>, vector<1x128xf32>
    %c15 = arith.constant 15 : index
    %c0_46 = arith.constant 0 : index
    %119 = vector.load %arg5[%c15, %c0_46] : memref<24x128xf32, #tpu.memory_space<vmem>>, vector<1x32xf32>
    %cst_47 = arith.constant dense<0.000000e+00> : vector<48xf32>
    %120 = vector.multi_reduction <add>, %111, %cst_47 [1] : vector<48x32xf32> to vector<48xf32>
    %121 = vector.shape_cast %120 : vector<48xf32> to vector<48x1xf32>
    %cst_48 = arith.constant 3.200000e+01 : f32
    %122 = vector.broadcast %cst_48 : f32 to vector<48x1xf32>
    %123 = arith.divf %121, %122 : vector<48x1xf32>
    %124 = vector.broadcast %123 : vector<48x1xf32> to vector<48x32xf32>
    %125 = arith.subf %111, %124 : vector<48x32xf32>
    %126 = arith.mulf %125, %125 : vector<48x32xf32>
    %cst_49 = arith.constant dense<0.000000e+00> : vector<48xf32>
    %127 = vector.multi_reduction <add>, %126, %cst_49 [1] : vector<48x32xf32> to vector<48xf32>
    %128 = vector.shape_cast %127 : vector<48xf32> to vector<48x1xf32>
    %cst_50 = arith.constant 3.200000e+01 : f32
    %129 = vector.broadcast %cst_50 : f32 to vector<48x1xf32>
    %130 = arith.divf %128, %129 : vector<48x1xf32>
    %131 = vector.broadcast %123 : vector<48x1xf32> to vector<48x32xf32>
    %132 = arith.subf %111, %131 : vector<48x32xf32>
    %cst_51 = arith.constant 9.99999974E-6 : f32
    %133 = vector.broadcast %cst_51 : f32 to vector<48x1xf32>
    %134 = arith.addf %130, %133 : vector<48x1xf32>
    %135 = math.rsqrt %134 : vector<48x1xf32>
    %136 = vector.broadcast %135 : vector<48x1xf32> to vector<48x32xf32>
    %137 = arith.mulf %132, %136 : vector<48x32xf32>
    %138 = vector.broadcast %112 : vector<1x32xf32> to vector<48x32xf32>
    %139 = arith.mulf %137, %138 : vector<48x32xf32>
    %140 = vector.broadcast %113 : vector<1x32xf32> to vector<48x32xf32>
    %141 = arith.addf %139, %140 : vector<48x32xf32>
    %142 = arith.truncf %141 : vector<48x32xf32> to vector<48x32xbf16>
    %c0_52 = arith.constant 0 : index
    %c384 = arith.constant 384 : index
    %143 = vector.load %arg3[%c0_52, %c384] : memref<32x896xbf16, #tpu.memory_space<vmem>>, vector<32x96xbf16>
    %cst_53 = arith.constant dense<0.000000e+00> : vector<48x96xf32>
    %144 = tpu.matmul %142, %143, %cst_53 {dimension_numbers = #tpu.dot_dimension_numbers<[1], [0], [0], [1], [0, 0, 1, 1], [], []>} : vector<48x32xbf16>, vector<32x96xbf16>, vector<48x96xf32> -> vector<48x96xf32>
    %145 = vector.broadcast %114 : vector<1x96xf32> to vector<48x96xf32>
    %146 = arith.addf %144, %145 : vector<48x96xf32>
    %147 = vector.extract_strided_slice %146 {offsets = [0, 0], sizes = [48, 32], strides = [1, 1]} : vector<48x96xf32> to vector<48x32xf32>
    %148 = vector.extract_strided_slice %146 {offsets = [0, 32], sizes = [48, 32], strides = [1, 1]} : vector<48x96xf32> to vector<48x32xf32>
    %149 = vector.extract_strided_slice %146 {offsets = [0, 64], sizes = [48, 32], strides = [1, 1]} : vector<48x96xf32> to vector<48x32xf32>
    %c0_54 = arith.constant 0 : index
    %c0_55 = arith.constant 0 : index
    %150 = vector.load %arg1[%c0_54, %c0_55] : memref<192x32xf32, #tpu.memory_space<vmem>>, vector<192x32xf32>
    %151 = tpu.concatenate %147, %147, %147, %147 in 0 : vector<48x32xf32>, vector<48x32xf32>, vector<48x32xf32>, vector<48x32xf32> -> vector<192x32xf32>
    %152 = arith.mulf %151, %150 : vector<192x32xf32>
    %153 = tpu.transpose %148, [1, 0] : vector<48x32xf32> -> vector<32x48xf32>
    %154 = arith.truncf %153 : vector<32x48xf32> to vector<32x48xbf16>
    %155 = arith.truncf %152 : vector<192x32xf32> to vector<192x32xbf16>
    %cst_56 = arith.constant dense<0.000000e+00> : vector<192x48xf32>
    %156 = tpu.matmul %155, %154, %cst_56 {dimension_numbers = #tpu.dot_dimension_numbers<[1], [0], [0], [1], [0, 0, 1, 1], [], []>} : vector<192x32xbf16>, vector<32x48xbf16>, vector<192x48xf32> -> vector<192x48xf32>
    %cst_57 = arith.constant 0.353553385 : f32
    %157 = vector.broadcast %cst_57 : f32 to vector<192x48xf32>
    %158 = arith.mulf %156, %157 : vector<192x48xf32>
    %c0_58 = arith.constant 0 : index
    %c0_59 = arith.constant 0 : index
    %159 = vector.load %arg2[%c0_58, %c0_59] : memref<192x48xf32, #tpu.memory_space<vmem>>, vector<192x48xf32>
    %160 = arith.addf %158, %159 : vector<192x48xf32>
    %cst_60 = arith.constant dense<0xFF800000> : vector<192xf32>
    %161 = vector.multi_reduction <maximumf>, %160, %cst_60 [1] : vector<192x48xf32> to vector<192xf32>
    %162 = vector.shape_cast %161 : vector<192xf32> to vector<192x1xf32>
    %163 = vector.broadcast %162 : vector<192x1xf32> to vector<192x48xf32>
    %164 = arith.subf %160, %163 : vector<192x48xf32>
    %165 = math.exp %164 : vector<192x48xf32>
    %cst_61 = arith.constant dense<0.000000e+00> : vector<192xf32>
    %166 = vector.multi_reduction <add>, %165, %cst_61 [1] : vector<192x48xf32> to vector<192xf32>
    %167 = vector.shape_cast %166 : vector<192xf32> to vector<192x1xf32>
    %168 = tpu.reciprocal %167 {approx = true} : vector<192x1xf32> -> vector<192x1xf32>
    %169 = vector.broadcast %168 : vector<192x1xf32> to vector<192x48xf32>
    %170 = arith.mulf %165, %169 : vector<192x48xf32>
    %171 = arith.truncf %170 : vector<192x48xf32> to vector<192x48xbf16>
    %172 = arith.truncf %149 : vector<48x32xf32> to vector<48x32xbf16>
    %cst_62 = arith.constant dense<0.000000e+00> : vector<192x32xf32>
    %173 = tpu.matmul %171, %172, %cst_62 {dimension_numbers = #tpu.dot_dimension_numbers<[1], [0], [0], [1], [0, 0, 1, 1], [], []>} : vector<192x48xbf16>, vector<48x32xbf16>, vector<192x32xf32> -> vector<192x32xf32>
    %174 = arith.mulf %173, %150 : vector<192x32xf32>
    %175 = vector.extract_strided_slice %174 {offsets = [0, 0], sizes = [48, 32], strides = [1, 1]} : vector<192x32xf32> to vector<48x32xf32>
    %176 = vector.extract_strided_slice %174 {offsets = [48, 0], sizes = [48, 32], strides = [1, 1]} : vector<192x32xf32> to vector<48x32xf32>
    %177 = arith.addf %175, %176 : vector<48x32xf32>
    %178 = vector.extract_strided_slice %174 {offsets = [96, 0], sizes = [48, 32], strides = [1, 1]} : vector<192x32xf32> to vector<48x32xf32>
    %179 = arith.addf %177, %178 : vector<48x32xf32>
    %180 = vector.extract_strided_slice %174 {offsets = [144, 0], sizes = [48, 32], strides = [1, 1]} : vector<192x32xf32> to vector<48x32xf32>
    %181 = arith.addf %179, %180 : vector<48x32xf32>
    %182 = arith.truncf %181 : vector<48x32xf32> to vector<48x32xbf16>
    %c0_63 = arith.constant 0 : index
    %c512 = arith.constant 512 : index
    %183 = vector.load %arg3[%c0_63, %c512] : memref<32x896xbf16, #tpu.memory_space<vmem>>, vector<32x32xbf16>
    %cst_64 = arith.constant dense<0.000000e+00> : vector<48x32xf32>
    %184 = tpu.matmul %182, %183, %cst_64 {dimension_numbers = #tpu.dot_dimension_numbers<[1], [0], [0], [1], [0, 0, 1, 1], [], []>} : vector<48x32xbf16>, vector<32x32xbf16>, vector<48x32xf32> -> vector<48x32xf32>
    %185 = vector.broadcast %115 : vector<1x32xf32> to vector<48x32xf32>
    %186 = arith.addf %184, %185 : vector<48x32xf32>
    %187 = arith.addf %111, %186 : vector<48x32xf32>
    %cst_65 = arith.constant dense<0.000000e+00> : vector<48xf32>
    %188 = vector.multi_reduction <add>, %187, %cst_65 [1] : vector<48x32xf32> to vector<48xf32>
    %189 = vector.shape_cast %188 : vector<48xf32> to vector<48x1xf32>
    %cst_66 = arith.constant 3.200000e+01 : f32
    %190 = vector.broadcast %cst_66 : f32 to vector<48x1xf32>
    %191 = arith.divf %189, %190 : vector<48x1xf32>
    %192 = vector.broadcast %191 : vector<48x1xf32> to vector<48x32xf32>
    %193 = arith.subf %187, %192 : vector<48x32xf32>
    %194 = arith.mulf %193, %193 : vector<48x32xf32>
    %cst_67 = arith.constant dense<0.000000e+00> : vector<48xf32>
    %195 = vector.multi_reduction <add>, %194, %cst_67 [1] : vector<48x32xf32> to vector<48xf32>
    %196 = vector.shape_cast %195 : vector<48xf32> to vector<48x1xf32>
    %cst_68 = arith.constant 3.200000e+01 : f32
    %197 = vector.broadcast %cst_68 : f32 to vector<48x1xf32>
    %198 = arith.divf %196, %197 : vector<48x1xf32>
    %199 = vector.broadcast %191 : vector<48x1xf32> to vector<48x32xf32>
    %200 = arith.subf %187, %199 : vector<48x32xf32>
    %cst_69 = arith.constant 9.99999974E-6 : f32
    %201 = vector.broadcast %cst_69 : f32 to vector<48x1xf32>
    %202 = arith.addf %198, %201 : vector<48x1xf32>
    %203 = math.rsqrt %202 : vector<48x1xf32>
    %204 = vector.broadcast %203 : vector<48x1xf32> to vector<48x32xf32>
    %205 = arith.mulf %200, %204 : vector<48x32xf32>
    %206 = vector.broadcast %116 : vector<1x32xf32> to vector<48x32xf32>
    %207 = arith.mulf %205, %206 : vector<48x32xf32>
    %208 = vector.broadcast %117 : vector<1x32xf32> to vector<48x32xf32>
    %209 = arith.addf %207, %208 : vector<48x32xf32>
    %210 = arith.truncf %209 : vector<48x32xf32> to vector<48x32xbf16>
    %c0_70 = arith.constant 0 : index
    %c640 = arith.constant 640 : index
    %211 = vector.load %arg3[%c0_70, %c640] : memref<32x896xbf16, #tpu.memory_space<vmem>>, vector<32x128xbf16>
    %cst_71 = arith.constant dense<0.000000e+00> : vector<48x128xf32>
    %212 = tpu.matmul %210, %211, %cst_71 {dimension_numbers = #tpu.dot_dimension_numbers<[1], [0], [0], [1], [0, 0, 1, 1], [], []>} : vector<48x32xbf16>, vector<32x128xbf16>, vector<48x128xf32> -> vector<48x128xf32>
    %213 = vector.broadcast %118 : vector<1x128xf32> to vector<48x128xf32>
    %214 = arith.addf %212, %213 : vector<48x128xf32>
    %cst_72 = arith.constant 0.000000e+00 : f32
    %215 = vector.broadcast %cst_72 : f32 to vector<48x128xf32>
    %216 = arith.maximumf %214, %215 : vector<48x128xf32>
    %217 = arith.truncf %216 : vector<48x128xf32> to vector<48x128xbf16>
    %c0_73 = arith.constant 0 : index
    %c128_74 = arith.constant 128 : index
    %218 = vector.load %arg4[%c0_73, %c128_74] : memref<128x256xbf16, #tpu.memory_space<vmem>>, vector<128x32xbf16>
    %cst_75 = arith.constant dense<0.000000e+00> : vector<48x32xf32>
    %219 = tpu.matmul %217, %218, %cst_75 {dimension_numbers = #tpu.dot_dimension_numbers<[1], [0], [0], [1], [0, 0, 1, 1], [], []>} : vector<48x128xbf16>, vector<128x32xbf16>, vector<48x32xf32> -> vector<48x32xf32>
    %220 = arith.addf %187, %219 : vector<48x32xf32>
    %221 = vector.broadcast %119 : vector<1x32xf32> to vector<48x32xf32>
    %222 = arith.addf %220, %221 : vector<48x32xf32>
    %c16 = arith.constant 16 : index
    %c0_76 = arith.constant 0 : index
    %223 = vector.load %arg5[%c16, %c0_76] : memref<24x128xf32, #tpu.memory_space<vmem>>, vector<1x128xf32>
    %224 = arith.truncf %222 : vector<48x32xf32> to vector<48x32xbf16>
    %c0_77 = arith.constant 0 : index
    %c768 = arith.constant 768 : index
    %225 = vector.load %arg3[%c0_77, %c768] : memref<32x896xbf16, #tpu.memory_space<vmem>>, vector<32x128xbf16>
    %cst_78 = arith.constant dense<0.000000e+00> : vector<48x128xf32>
    %226 = tpu.matmul %224, %225, %cst_78 {dimension_numbers = #tpu.dot_dimension_numbers<[1], [0], [0], [1], [0, 0, 1, 1], [], []>} : vector<48x32xbf16>, vector<32x128xbf16>, vector<48x128xf32> -> vector<48x128xf32>
    %227 = vector.broadcast %223 : vector<1x128xf32> to vector<48x128xf32>
    %228 = arith.addf %226, %227 : vector<48x128xf32>
    %c0_79 = arith.constant 0 : index
    %c0_80 = arith.constant 0 : index
    %229 = vector.load %arg6[%c0_79, %c0_80] : memref<48x128xf32, #tpu.memory_space<vmem>>, vector<48x128xf32>
    tpu.vector_store %arg6[%c0_79, %c0_80], %228 {strides = array<i32>} : memref<48x128xf32, #tpu.memory_space<vmem>>, vector<48x128xf32>,
    return
  }
}

</mosaic_0001>

<bundles_post_ra>
// kernel: decision_transformer_forward.1
= control target key start
LH: loop header
LB: loop body
LE: loop exit
PB: predicated region body
PF: predicated region fallthrough
CT: control target
= control target key end

     0   :  { %vm38_vm0 = vcmask 261120   ;;  %v3904_v42 = vmov 0.0   ;;  %vm3905_vm1 = vmmov 0   ;;  %s3906_s11 = smov 96   ;;  %vm582_vm2 = vcmask 392192   ;;  %s3907_s23 = smov 64   ;;  %s5692_s0 = inlined_call_operand.vmem [shape: f32[48,32], index: 0, kind: input, shape index: {}]   ;;  %s5693_s3 = inlined_call_operand.vmem [shape: bf16[32,896], index: 3, kind: input, shape index: {}]   ;;  %s5694_s5 = inlined_call_operand.vmem [shape: f32[24,128], index: 5, kind: input, shape index: {}]   ;;  %s5695_s1 = inlined_call_operand.vmem [shape: f32[192,32], index: 1, kind: input, shape index: {}]   ;;  %s5696_s2 = inlined_call_operand.vmem [shape: f32[192,48], index: 2, kind: input, shape index: {}]   ;;  %s5697_s4 = inlined_call_operand.vmem [shape: bf16[128,256], index: 4, kind: input, shape index: {}]   ;;  %s5698_s6 = inlined_call_operand.vmem [shape: f32[48,128], index: 6, kind: output, shape index: {}]  }
   0x1   :  { %v24_v0 = vld [vmem:[%s5692_s0] sm:$0xff]  ;;  %v26_v1 = vld [vmem:[%s5692_s0 + $0x10] sm:$0xff]  ;;  %v25_v2 = vld [vmem:[%s5692_s0 + $0x8] sm:$0xff]  ;;  %3268 = vmatprep.subr.bf16.mxu0 %v3904_v42  ;;  %3272 = vmatprep.mubr.msk.bf16.mxu0 %vm3905_vm1, %v3904_v42 }
   0x2   :  { %v39_v3 = vsel %vm38_vm0, %v24_v0, 0.0  ;;  %v45_v4 = vsel %vm38_vm0, %v26_v1, 0.0  ;;  %v27_v5 = vld [vmem:[%s5692_s0 + $0x18] sm:$0xff]  ;;  %v42_v6 = vsel %vm38_vm0, %v25_v2, 0.0  ;;  %v28_v8 = vld [vmem:[%s5692_s0 + $0x20] sm:$0xff]  ;;  %v29_v9 = vld [vmem:[%s5692_s0 + $0x28] sm:$0xff] }
   0x3   :  { %40 = vadd.xlane.f32.xlu0 %v39_v3  ;;  %46 = vadd.xlane.f32.xlu1 %v45_v4  ;;  %v48_v7 = vsel %vm38_vm0, %v27_v5, 0.0  ;;  %v51_v10 = vsel %vm38_vm0, %v28_v8, 0.0  ;;  %v54_v11 = vsel %vm38_vm0, %v29_v9, 0.0  ;;  %v3556_v43 = vld [vmem:[%s5693_s3] ss:$28 sps:$4 sm:$0xff]  }
   0x4   :  { %3269 = vmatpush3.bf16.msra.mxu0 %v3556_v43  ;;  %v3557_v44 = vld [vmem:[%s5693_s3 + $0x38] ss:$28 sps:$4 sm:$0xff]  }
   0x5   :  { %3270 = vmatprep.subr.bf16.mxu0 %v3904_v42 }
   0x7   :  { %43 = vadd.xlane.f32.xlu0 %v42_v6  ;;  %49 = vadd.xlane.f32.xlu1 %v48_v7  ;;  %v3038_v6 = vld [vmem:[%s5694_s5 + $0x1] ss:$0 sm:$0xff] }
   0x8   :  { %3271 = vmatpush3.bf16.msra.mxu0 %v3557_v44 }
   0xb   :  { %52 = vadd.xlane.f32.xlu0 %v51_v10  ;;  %55 = vadd.xlane.f32.xlu1 %v54_v11 }
  0x90   :  { %v41_v12 = vpop.xlane.xlu0 %40  ;;  %v47_v13 = vpop.xlane.xlu1 %46 }
  0x91   :  { %v58_v14 = vmul.f32 0.03125, %v41_v12  ;;  %v60_v15 = vmul.f32 0.03125, %v47_v13 }
  0x93   :  { %v3967_v16 = vsub.f32 %v24_v0, %v58_v14  ;;  %v3969_v17 = vsub.f32 %v26_v1, %v60_v15  ;;  %v3037_v1 = vld [vmem:[%s5694_s5] ss:$0 sm:$0xff] }
  0x94   :  { %v44_v18 = vpop.xlane.xlu0 %43  ;;  %v50_v19 = vpop.xlane.xlu1 %49 }
  0x95   :  { %v59_v20 = vmul.f32 0.03125, %v44_v18  ;;  %v61_v21 = vmul.f32 0.03125, %v50_v19  ;;  %v70_v22 = vmul.f32 %v3967_v16, %v3967_v16  ;;  %v72_v23 = vmul.f32 %v3969_v17, %v3969_v17 }
  0x97   :  { %v3975_v24 = vsub.f32 %v25_v2, %v59_v20  ;;  %v3977_v25 = vsub.f32 %v27_v5, %v61_v21  ;;  %v76_v26 = vsel %vm38_vm0, %v70_v22, 0.0  ;;  %v82_v29 = vsel %vm38_vm0, %v72_v23, 0.0 }
  0x98   :  { %77 = vadd.xlane.f32.xlu0 %v76_v26  ;;  %v53_v27 = vpop.xlane.xlu0 %52  ;;  %v56_v28 = vpop.xlane.xlu1 %55 }
  0x99   :  { %v62_v30 = vmul.f32 0.03125, %v53_v27  ;;  %v63_v31 = vmul.f32 0.03125, %v56_v28  ;;  %v71_v32 = vmul.f32 %v3975_v24, %v3975_v24  ;;  %v73_v33 = vmul.f32 %v3977_v25, %v3977_v25  ;;  %v4029_v28 = vld [vmem:[%s5694_s5 + $0x2] ss:$0 sm:$0xff] }
  0x9b   :  { %v3985_v34 = vsub.f32 %v28_v8, %v62_v30  ;;  %v3987_v35 = vsub.f32 %v29_v9, %v63_v31  ;;  %v79_v36 = vsel %vm38_vm0, %v71_v32, 0.0  ;;  %v85_v37 = vsel %vm38_vm0, %v73_v33, 0.0  ;;  %v227_v30 = vld [vmem:[%s5695_s1] sm:$0xff]  ;;  %v233_v31 = vld [vmem:[%s5695_s1 + $0x30] sm:$0xff] }
  0x9c   :  { %83 = vadd.xlane.f32.xlu0 %v82_v29  ;;  %80 = vadd.xlane.f32.xlu1 %v79_v36  ;;  %v245_v36 = vld [vmem:[%s5695_s1 + $0x90] sm:$0xff] }
  0x9d   :  { %v74_v38 = vmul.f32 %v3985_v34, %v3985_v34  ;;  %v75_v39 = vmul.f32 %v3987_v35, %v3987_v35 }
  0x9f   :  { %v88_v40 = vsel %vm38_vm0, %v74_v38, 0.0  ;;  %v91_v41 = vsel %vm38_vm0, %v75_v39, 0.0  ;;  %v234_v38 = vld [vmem:[%s5695_s1 + $0x38] sm:$0xff]  ;;  %v240_v39 = vld [vmem:[%s5695_s1 + $0x68] sm:$0xff] }
  0xa0   :  { %86 = vadd.xlane.f32.xlu1 %v85_v37  ;;  %89 = vadd.xlane.f32.xlu0 %v88_v40  ;;  %v246_v40 = vld [vmem:[%s5695_s1 + $0x98] sm:$0xff] }
  0xa4   :  { %92 = vadd.xlane.f32.xlu1 %v91_v41 }
 0x125   :  { %v78_v45 = vpop.xlane.xlu0 %77 }
 0x126   :  { %v94_v46 = vmul.f32 0.03125, %v78_v45 }
 0x128   :  { %v100_v47 = vadd.f32 1e-05, %v94_v46 }
 0x129   :  { %v81_v48 = vpop.xlane.xlu1 %80  ;;  %v84_v49 = vpop.xlane.xlu0 %83 }
 0x12a   :  { %3586 = vrsqrt.f32 %v100_v47  ;;  %v95_v50 = vmul.f32 0.03125, %v81_v48  ;;  %v96_v51 = vmul.f32 0.03125, %v84_v49 }
 0x12c   :  { %v101_v52 = vadd.f32 1e-05, %v95_v50  ;;  %v102_v53 = vadd.f32 1e-05, %v96_v51 }
 0x12d   :  { %v87_v54 = vpop.xlane.xlu1 %86  ;;  %v90_v55 = vpop.xlane.xlu0 %89 }
 0x12e   :  { %3588 = vrsqrt.f32 %v101_v52  ;;  %v97_v56 = vmul.f32 0.03125, %v87_v54  ;;  %v98_v58 = vmul.f32 0.03125, %v90_v55 }
 0x12f   :  { %3590 = vrsqrt.f32 %v102_v53 }
 0x130   :  { %v103_v57 = vadd.f32 1e-05, %v97_v56  ;;  %v104_v62 = vadd.f32 1e-05, %v98_v58  ;;  %v229_v58 = vld [vmem:[%s5695_s1 + $0x10] sm:$0xff] }
 0x131   :  { %v93_v59 = vpop.xlane.xlu1 %92 }
 0x132   :  { %3592 = vrsqrt.f32 %v103_v57  ;;  %v99_v60 = vmul.f32 0.03125, %v93_v59  ;;  %v235_v59 = vld [vmem:[%s5695_s1 + $0x40] sm:$0xff] }
 0x134   :  { %v3587_v61 = vpop.eup %3586  ;;  %v105_v63 = vadd.f32 1e-05, %v99_v60 }
 0x135   :  { %v112_v0 = vmul.f32 %v3587_v61, %v3967_v16 }
 0x136   :  { %3594 = vrsqrt.f32 %v105_v63  ;;  %v241_v63 = vld [vmem:[%s5695_s1 + $0x70] sm:$0xff] }
 0x137   :  { %3596 = vrsqrt.f32 %v104_v62  ;;  %v122_v4 = vmul.f32 %v3037_v1, %v112_v0  ;;  %v230_v62 = vld [vmem:[%s5695_s1 + $0x18] sm:$0xff]  ;;  %v247_v0 = vld [vmem:[%s5695_s1 + $0xa0] sm:$0xff] }
 0x138   :  { %v3589_v2 = vpop.eup %3588 }
 0x139   :  { %v113_v3 = vmul.f32 %v3589_v2, %v3975_v24  ;;  %v3591_v5 = vpop.eup %3590  ;;  %v132_v9 = vadd.f32 %v3038_v6, %v122_v4  ;;  %v236_v2 = vld [vmem:[%s5695_s1 + $0x48] sm:$0xff] }
 0x13a   :  { %v114_v11 = vmul.f32 %v3591_v5, %v3969_v17  ;;  %v248_v4 = vld [vmem:[%s5695_s1 + $0xa8] sm:$0xff] }
 0x13b   :  { %v123_v7 = vmul.f32 %v3037_v1, %v113_v3  ;;  %v242_v3 = vld [vmem:[%s5695_s1 + $0x78] sm:$0xff] }
 0x13c   :  { %v3593_v8 = vpop.eup %3592  ;;  %v124_v16 = vmul.f32 %v3037_v1, %v114_v11 }
 0x13d   :  { %v133_v10 = vadd.f32 %v3038_v6, %v123_v7  ;;  %v115_v12 = vmul.f32 %v3593_v8, %v3977_v25 }
 0x13e   :  { %v134_v21 = vadd.f32 %v3038_v6, %v124_v16 }
 0x13f   :  { %v138_v13 = vpack.c.bf16 %v133_v10, %v132_v9  ;;  %v125_v14 = vmul.f32 %v3037_v1, %v115_v12 }
 0x140   :  { %v3595_v15 = vpop.eup %3594 }
 0x141   :  { %3273 = vmatmul.mubr.msk.bf16.vlgmr.msra.gmra.mrb[0].mxu0 %vm38_vm0, %v138_v13  ;;  %v3597_v18 = vpop.eup %3596  ;;  %v135_v19 = vadd.f32 %v3038_v6, %v125_v14  ;;  %v117_v20 = vmul.f32 %v3595_v15, %v3987_v35  ;;  %v239_v35 = vld [vmem:[%s5695_s1 + $0x60] sm:$0xff] }
 0x142   :  { %3276 = vmatprep.mubr.msk.bf16.mxu0 %vm3905_vm1, %v3904_v42  ;;  %v116_v22 = vmul.f32 %v3597_v18, %v3985_v34  ;;  %v228_v34 = vld [vmem:[%s5695_s1 + $0x8] sm:$0xff] }
 0x143   :  { %v139_v23 = vpack.c.bf16 %v135_v19, %v134_v21  ;;  %v127_v17 = vmul.f32 %v3037_v1, %v117_v20 }
 0x144   :  { %v126_v24 = vmul.f32 %v3037_v1, %v116_v22  ;;  %v231_v22 = vld [vmem:[%s5695_s1 + $0x20] sm:$0xff] }
 0x145   :  { %v137_v25 = vadd.f32 %v3038_v6, %v127_v17 }
 0x146   :  { %v136_v26 = vadd.f32 %v3038_v6, %v126_v24 }
 0x148   :  { %v140_v27 = vpack.c.bf16 %v137_v25, %v136_v26  ;;  %v232_v25 = vld [vmem:[%s5695_s1 + $0x28] sm:$0xff]  ;;  %v243_v26 = vld [vmem:[%s5695_s1 + $0x80] sm:$0xff] }
 0x149   :  { %3277 = vmatmul.mubr.msk.bf16.gmra.mrb[4].mxu0 %vm38_vm0, %v139_v23  ;;  %v237_v23 = vld [vmem:[%s5695_s1 + $0x50] sm:$0xff] }
 0x14a   :  { %3280 = vmatprep.mubr.msk.bf16.mxu0 %vm3905_vm1, %v3904_v42 }
 0x151   :  { %3281 = vmatmul.mubr.msk.bf16.gmra.mrb[8].mxu0 %vm38_vm0, %v140_v27  ;;  %v249_v27 = vld [vmem:[%s5695_s1 + $0xb0] sm:$0xff] }
 0x214   :  { %v204_v29 = vpop.f32.mrb[0].mxu0 }
 0x215   :  { %v4038_v32 = vadd.f32 %v4029_v28, %v204_v29  ;;  %v3274_v33 = vpop.f32.mrb[1].mxu0 }
 0x216   :  { %v207_v37 = vpop.f32.mrb[2].mxu0  ;;  %v250_v33 = vld [vmem:[%s5695_s1 + $0xb8] sm:$0xff] }
 0x217   :  { %v4059_v41 = vadd.f32 %v4029_v28, %v207_v37  ;;  %281 = vrot.lane.b32.xlu0 %v4038_v32, %s3906_s11  ;;  %v3275_v43 = vpop.f32.mrb[3].mxu0  ;;  %v251_v44 = vmul.f32 %v227_v30, %v4038_v32  ;;  %v4065_v45 = vmul.f32 %v233_v31, %v4038_v32  ;;  %v4068_v46 = vmul.f32 %v239_v35, %v4038_v32  ;;  %v238_v30 = vld [vmem:[%s5695_s1 + $0x58] sm:$0xff]  ;;  %v244_v31 = vld [vmem:[%s5695_s1 + $0x88] sm:$0xff] }
 0x218   :  { %v4071_v47 = vmul.f32 %v245_v36, %v4038_v32 }
 0x219   :  { %283 = vrot.lane.b32.xlu1 %v4059_v41, %s3906_s11  ;;  %v252_v48 = vmul.f32 %v228_v34, %v4059_v41  ;;  %v4077_v49 = vmul.f32 %v234_v38, %v4059_v41  ;;  %v4080_v50 = vmul.f32 %v240_v39, %v4059_v41  ;;  %v4083_v51 = vmul.f32 %v246_v40, %v4059_v41 }
 0x21a   :  { %v859_v52 = vpack.c.bf16 %v4059_v41, %v4038_v32 }
 0x21b   :  { %v333_v53 = vpack.c.bf16 %v252_v48, %v251_v44  ;;  %v336_v54 = vpack.c.bf16 %v4077_v49, %v4065_v45  ;;  %v339_v55 = vpack.c.bf16 %v4080_v50, %v4068_v46  ;;  %v342_v56 = vpack.c.bf16 %v4083_v51, %v4071_v47  ;;  %v536_v46 = vld [vmem:[%s5696_s2 + $0x10] sm:$0xff]  ;;  %v534_v47 = vld [vmem:[%s5696_s2] sm:$0xff] }
 0x21c   :  { %v212_v57 = vpop.f32.mrb[4].mxu0 }
 0x21d   :  { %v4100_v60 = vadd.f32 %v4029_v28, %v212_v57  ;;  %v3278_v61 = vpop.f32.mrb[5].mxu0  ;;  %3288 = vmatprep.mubr.msk.bf16.mxu1 %vm38_vm0, %v333_v53 }
 0x21e   :  { %v215_v1 = vpop.f32.mrb[6].mxu0 }
 0x21f   :  { %v4122_v5 = vadd.f32 %v4029_v28, %v215_v1  ;;  %285 = vrot.lane.b32.xlu1 %v4100_v60, %s3906_s11  ;;  %v3279_v6 = vpop.f32.mrb[7].mxu0  ;;  %v4127_v7 = vmul.f32 %v229_v58, %v4100_v60  ;;  %v4130_v8 = vmul.f32 %v235_v59, %v4100_v60  ;;  %v4133_v9 = vmul.f32 %v241_v63, %v4100_v60 }
 0x220   :  { %v4136_v10 = vmul.f32 %v247_v0, %v4100_v60 }
 0x221   :  { %v4139_v11 = vmul.f32 %v230_v62, %v4122_v5  ;;  %v4142_v12 = vmul.f32 %v236_v2, %v4122_v5  ;;  %v4145_v13 = vmul.f32 %v242_v3, %v4122_v5  ;;  %v4148_v14 = vmul.f32 %v248_v4, %v4122_v5 }
 0x222   :  { %v860_v15 = vpack.c.bf16 %v4122_v5, %v4100_v60 }
 0x223   :  { %287 = vrot.lane.b32.xlu1 %v4122_v5, %s3906_s11  ;;  %v334_v16 = vpack.c.bf16 %v4139_v11, %v4127_v7  ;;  %v337_v18 = vpack.c.bf16 %v4142_v12, %v4130_v8  ;;  %v340_v19 = vpack.c.bf16 %v4145_v13, %v4133_v9  ;;  %v343_v20 = vpack.c.bf16 %v4148_v14, %v4136_v10  ;;  %v537_v13 = vld [vmem:[%s5696_s2 + $0x18] sm:$0xff] }
 0x224   :  { %v220_v21 = vpop.f32.mrb[8].mxu0 }
 0x225   :  { %v4169_v17 = vadd.f32 %v4029_v28, %v220_v21  ;;  %v3282_v24 = vpop.f32.mrb[9].mxu0  ;;  %v538_v21 = vld [vmem:[%s5696_s2 + $0x20] sm:$0xff] }
 0x226   :  { %v223_v29 = vpop.f32.mrb[10].mxu0  ;;  %v535_v24 = vld [vmem:[%s5696_s2 + $0x8] sm:$0xff] }
 0x227   :  { %v4190_v34 = vadd.f32 %v4029_v28, %v223_v29  ;;  %289 = vrot.lane.b32.xlu0 %v4169_v17, %s3906_s11  ;;  %v3283_v35 = vpop.f32.mrb[11].mxu0  ;;  %v255_v36 = vmul.f32 %v231_v22, %v4169_v17  ;;  %v261_v37 = vmul.f32 %v237_v23, %v4169_v17  ;;  %v267_v38 = vmul.f32 %v243_v26, %v4169_v17 }
 0x228   :  { %v273_v39 = vmul.f32 %v249_v27, %v4169_v17 }
 0x229   :  { %291 = vrot.lane.b32.xlu1 %v4190_v34, %s3906_s11  ;;  %v256_v40 = vmul.f32 %v232_v25, %v4190_v34  ;;  %v262_v28 = vmul.f32 %v238_v30, %v4190_v34  ;;  %v268_v43 = vmul.f32 %v244_v31, %v4190_v34  ;;  %v274_v44 = vmul.f32 %v250_v33, %v4190_v34  ;;  %v540_v33 = vld [vmem:[%s5696_s2 + $0x30] sm:$0xff] }
 0x22a   :  { %v861_v48 = vpack.c.bf16 %v4190_v34, %v4169_v17 }
 0x22b   :  { %v335_v53 = vpack.c.bf16 %v256_v40, %v255_v36  ;;  %v338_v57 = vpack.c.bf16 %v262_v28, %v261_v37  ;;  %v341_v58 = vpack.c.bf16 %v268_v43, %v267_v38  ;;  %v344_v59 = vpack.c.bf16 %v274_v44, %v273_v39  ;;  %v541_v28 = vld [vmem:[%s5696_s2 + $0x38] sm:$0xff] }
 0x289   :  { %v282_v61 = vpop.permute.xlu0 %281 }
 0x28a   :  { %299 = vxpose.xlu0.b32.start [1/6] (short) (narrow) %v282_v61, 32 }
 0x28b   :  { %v284_v62 = vpop.permute.xlu1 %283 }
 0x28e   :  { %300 = vxpose.xlu0.b32.cont [2/6] (short) (narrow) %v284_v62, 32 }
 0x291   :  { %v286_v63 = vpop.permute.xlu1 %285 }
 0x292   :  { %301 = vxpose.xlu0.b32.cont [3/6] (short) (narrow) %v286_v63, 32 }
 0x295   :  { %v288_v0 = vpop.permute.xlu1 %287 }
 0x296   :  { %302 = vxpose.xlu0.b32.cont [4/6] (short) (narrow) %v288_v0, 32 }
 0x299   :  { %v290_v1 = vpop.permute.xlu0 %289 }
 0x29a   :  { %303 = vxpose.xlu0.b32.cont [5/6] (short) (narrow) %v290_v1, 32 }
 0x29b   :  { %v292_v2 = vpop.permute.xlu1 %291 }
 0x29e   :  { %304 = vxpose.xlu0.b32.end [6/6] (short) (narrow) %v292_v2, 32  ;;  %v544_v2 = vld [vmem:[%s5696_s2 + $0x50] sm:$0xff] }
 0x30a   :  { %v315_v3 = vpop.trf.xlu0 }
 0x30e   :  { %v316_v4 = vpop.trf.xlu0 }
 0x30f   :  { %v331_v6 = vpack.c.bf16 %v316_v4, %v315_v3 }
 0x311   :  { %3284 = vmatprep.subr.bf16.mxu1 %v331_v6 }
 0x312   :  { %3285 = vmatpush3.bf16.msra.mxu1 %v331_v6  ;;  %v317_v7 = vpop.trf.xlu0 }
 0x316   :  { %v318_v8 = vpop.trf.xlu0 }
 0x317   :  { %v332_v9 = vpack.c.bf16 %v318_v8, %v317_v7  ;;  %v542_v8 = vld [vmem:[%s5696_s2 + $0x40] sm:$0xff] }
 0x319   :  { %3286 = vmatprep.subr.bf16.mxu1 %v332_v9 }
 0x31a   :  { %3287 = vmatpush3.bf16.msra.mxu1 %v332_v9 }
 0x31b   :  { %3342 = vmatprep.subr.bf16.mxu1 %v3904_v42 }
 0x31d   :  { %3289 = vmatmul.mubr.msk.bf16.vlgmr.msra.gmra.mrb[0].mxu1 %vm38_vm0, %v334_v16 }
 0x31e   :  { %3292 = vmatprep.mubr.msk.bf16.mxu1 %vm38_vm0, %v335_v53 }
 0x325   :  { %3293 = vmatmul.mubr.msk.bf16.gmra.mrb[4].mxu1 %vm38_vm0, %v336_v54 }
 0x326   :  { %3296 = vmatprep.mubr.msk.bf16.mxu1 %vm38_vm0, %v337_v18 }
 0x32d   :  { %3297 = vmatmul.mubr.msk.bf16.gmra.mrb[8].mxu1 %vm38_vm0, %v338_v57 }
 0x32e   :  { %3300 = vmatprep.mubr.msk.bf16.mxu1 %vm38_vm0, %v339_v55 }
 0x335   :  { %3301 = vmatmul.mubr.msk.bf16.gmra.mrb[12].mxu1 %vm38_vm0, %v340_v19 }
 0x336   :  { %3304 = vmatprep.mubr.msk.bf16.mxu1 %vm38_vm0, %v341_v58  ;;  %v539_v58 = vld [vmem:[%s5696_s2 + $0x28] sm:$0xff] }
 0x33d   :  { %3305 = vmatmul.mubr.msk.bf16.gmra.mrb[16].mxu1 %vm38_vm0, %v342_v56 }
 0x33e   :  { %3308 = vmatprep.mubr.msk.bf16.mxu1 %vm38_vm0, %v343_v20 }
 0x345   :  { %3309 = vmatmul.mubr.msk.bf16.gmra.mrb[20].mxu1 %vm38_vm0, %v344_v59 }
 0x346   :  { %3346 = vmatprep.mubr.msk.bf16.mxu1 %vm3905_vm1, %v3904_v42 }
 0x3f0   :  { %v3290_v45 = vpop.f32.mrb[0].mxu1 }
 0x3f1   :  { %v512_v49 = vmul.f32 0.35355338, %v3290_v45  ;;  %v415_v50 = vpop.f32.mrb[1].mxu1 }
 0x3f2   :  { %v510_v54 = vmul.f32 0.35355338, %v415_v50  ;;  %v3291_v55 = vpop.f32.mrb[2].mxu1 }
 0x3f3   :  { %v418_v51 = vpop.f32.mrb[3].mxu1  ;;  %v4235_v56 = vadd.f32 %v536_v46, %v512_v49  ;;  %v513_v10 = vmul.f32 0.35355338, %v3291_v55  ;;  %v552_v46 = vld [vmem:[%s5696_s2 + $0x90] sm:$0xff] }
 0x3f4   :  { %v4239_v12 = vadd.f32 %v534_v47, %v510_v54  ;;  %v511_v16 = vmul.f32 0.35355338, %v418_v51  ;;  %v545_v47 = vld [vmem:[%s5696_s2 + $0x58] sm:$0xff] }
 0x3f5   :  { %v589_v11 = vsel %vm582_vm2, %v4235_v56, -inf  ;;  %v4246_v20 = vadd.f32 %v537_v13, %v513_v10 }
 0x3f6   :  { %590 = vmax.xlane.f32.xlu1 %v589_v11  ;;  %v583_v19 = vsel %vm582_vm2, %v4239_v12, -inf  ;;  %v4258_v30 = vadd.f32 %v535_v24, %v511_v16  ;;  %v550_v11 = vld [vmem:[%s5696_s2 + $0x80] sm:$0xff] }
 0x3f7   :  { %v592_v29 = vsel %vm582_vm2, %v4246_v20, -inf }
 0x3f8   :  { %v3294_v14 = vpop.f32.mrb[4].mxu1  ;;  %v586_v38 = vsel %vm582_vm2, %v4258_v30, -inf }
 0x3f9   :  { %v431_v18 = vpop.f32.mrb[5].mxu1  ;;  %v516_v27 = vmul.f32 0.35355338, %v3294_v14 }
 0x3fa   :  { %v514_v22 = vmul.f32 0.35355338, %v431_v18  ;;  %584 = vmax.xlane.f32.xlu1 %v583_v19  ;;  %v3295_v23 = vpop.f32.mrb[6].mxu1 }
 0x3fb   :  { %v434_v25 = vpop.f32.mrb[7].mxu1  ;;  %v517_v36 = vmul.f32 0.35355338, %v3295_v23  ;;  %v4267_v39 = vadd.f32 %v540_v33, %v516_v27  ;;  %v543_v23 = vld [vmem:[%s5696_s2 + $0x48] sm:$0xff] }
 0x3fc   :  { %v4254_v26 = vadd.f32 %v538_v21, %v514_v22  ;;  %v515_v44 = vmul.f32 0.35355338, %v434_v25 }
 0x3fd   :  { %v601_v53 = vsel %vm582_vm2, %v4267_v39, -inf  ;;  %v4274_v57 = vadd.f32 %v541_v28, %v517_v36  ;;  %v554_v28 = vld [vmem:[%s5696_s2 + $0xa0] sm:$0xff] }
 0x3fe   :  { %593 = vmax.xlane.f32.xlu1 %v592_v29  ;;  %v595_v31 = vsel %vm582_vm2, %v4254_v26, -inf  ;;  %v4281_v0 = vadd.f32 %v539_v58, %v515_v44  ;;  %v556_v29 = vld [vmem:[%s5696_s2 + $0xb0] sm:$0xff] }
 0x3ff   :  { %596 = vmax.xlane.f32.xlu0 %v595_v31  ;;  %v604_v63 = vsel %vm582_vm2, %v4274_v57, -inf }
 0x400   :  { %v3298_v35 = vpop.f32.mrb[8].mxu1  ;;  %v598_v6 = vsel %vm582_vm2, %v4281_v0, -inf }
 0x401   :  { %v447_v37 = vpop.f32.mrb[9].mxu1  ;;  %v520_v61 = vmul.f32 0.35355338, %v3298_v35 }
 0x402   :  { %587 = vmax.xlane.f32.xlu1 %v586_v38  ;;  %v3299_v40 = vpop.f32.mrb[10].mxu1  ;;  %v518_v4 = vmul.f32 0.35355338, %v447_v37 }
 0x403   :  { %v450_v43 = vpop.f32.mrb[11].mxu1  ;;  %v4288_v7 = vadd.f32 %v544_v2, %v520_v61  ;;  %v521_v9 = vmul.f32 0.35355338, %v3299_v40  ;;  %v548_v40 = vld [vmem:[%s5696_s2 + $0x70] sm:$0xff]  ;;  %v546_v2 = vld [vmem:[%s5696_s2 + $0x60] sm:$0xff] }
 0x404   :  { %v4298_v55 = vadd.f32 %v542_v8, %v518_v4  ;;  %v519_v16 = vmul.f32 0.35355338, %v450_v43 }
 0x405   :  { %v613_v54 = vsel %vm582_vm2, %v4288_v7, -inf  ;;  %v4308_v18 = vadd.f32 %v545_v47, %v521_v9  ;;  %v549_v9 = vld [vmem:[%s5696_s2 + $0x78] sm:$0xff] }
 0x406   :  { %602 = vmax.xlane.f32.xlu1 %v601_v53  ;;  %v607_v19 = vsel %vm582_vm2, %v4298_v55, -inf  ;;  %v4321_v27 = vadd.f32 %v543_v23, %v519_v16 }
 0x407   :  { %v616_v25 = vsel %vm582_vm2, %v4308_v18, -inf }
 0x408   :  { %v3302_v59 = vpop.f32.mrb[12].mxu1  ;;  %v610_v53 = vsel %vm582_vm2, %v4321_v27, -inf }
 0x409   :  { %v463_v62 = vpop.f32.mrb[13].mxu1  ;;  %v524_v31 = vmul.f32 0.35355338, %v3302_v59 }
 0x40a   :  { %605 = vmax.xlane.f32.xlu1 %v604_v63  ;;  %v3303_v1 = vpop.f32.mrb[14].mxu1  ;;  %v522_v58 = vmul.f32 0.35355338, %v463_v62 }
 0x40b   :  { %v466_v3 = vpop.f32.mrb[15].mxu1  ;;  %v4340_v61 = vadd.f32 %v548_v40, %v524_v31  ;;  %v525_v4 = vmul.f32 0.35355338, %v3303_v1  ;;  %v547_v1 = vld [vmem:[%s5696_s2 + $0x68] sm:$0xff] }
 0x40c   :  { %v4351_v8 = vadd.f32 %v546_v2, %v522_v58  ;;  %v555_v31 = vld [vmem:[%s5696_s2 + $0xa8] sm:$0xff] }
 0x40e   :  { %599 = vmax.xlane.f32.xlu1 %v598_v6  ;;  %v625_v6 = vsel %vm582_vm2, %v4340_v61, -inf }
 0x410   :  { %v3306_v45 = vpop.f32.mrb[16].mxu1 }
 0x411   :  { %v528_v49 = vmul.f32 0.35355338, %v3306_v45  ;;  %v479_v50 = vpop.f32.mrb[17].mxu1  ;;  %v523_v45 = vmul.f32 0.35355338, %v466_v3  ;;  %v553_v3 = vld [vmem:[%s5696_s2 + $0x98] sm:$0xff] }
 0x412   :  { %v526_v51 = vmul.f32 0.35355338, %v479_v50  ;;  %614 = vmax.xlane.f32.xlu1 %v613_v54  ;;  %v3307_v10 = vpop.f32.mrb[18].mxu1 }
 0x413   :  { %v482_v13 = vpop.f32.mrb[19].mxu1  ;;  %v4306_v14 = vadd.f32 %v552_v46, %v528_v49  ;;  %v619_v46 = vsel %vm582_vm2, %v4351_v8, -inf  ;;  %v4358_v49 = vadd.f32 %v549_v9, %v525_v4  ;;  %v529_v50 = vmul.f32 0.35355338, %v3307_v10  ;;  %v551_v10 = vld [vmem:[%s5696_s2 + $0x88] sm:$0xff] }
 0x414   :  { %v4314_v22 = vadd.f32 %v550_v11, %v526_v51  ;;  %v4365_v47 = vadd.f32 %v547_v1, %v523_v45  ;;  %v527_v51 = vmul.f32 0.35355338, %v482_v13  ;;  %v557_v13 = vld [vmem:[%s5696_s2 + $0xb8] sm:$0xff] }
 0x415   :  { %v637_v21 = vsel %vm582_vm2, %v4306_v14, -inf  ;;  %v628_v54 = vsel %vm582_vm2, %v4358_v49, -inf  ;;  %v4372_v16 = vadd.f32 %v553_v3, %v529_v50 }
 0x416   :  { %608 = vmax.xlane.f32.xlu1 %v607_v19  ;;  %638 = vmax.xlane.f32.xlu0 %v637_v21  ;;  %v631_v36 = vsel %vm582_vm2, %v4314_v22, -inf  ;;  %v622_v11 = vsel %vm582_vm2, %v4365_v47, -inf  ;;  %v4379_v23 = vadd.f32 %v551_v10, %v527_v51 }
 0x417   :  { %v640_v21 = vsel %vm582_vm2, %v4372_v16, -inf }
 0x418   :  { %v3310_v24 = vpop.f32.mrb[20].mxu1 }
 0x419   :  { %v532_v33 = vmul.f32 0.35355338, %v3310_v24  ;;  %v495_v35 = vpop.f32.mrb[21].mxu1 }
 0x41a   :  { %v530_v37 = vmul.f32 0.35355338, %v495_v35  ;;  %617 = vmax.xlane.f32.xlu1 %v616_v25  ;;  %632 = vmax.xlane.f32.xlu0 %v631_v36  ;;  %v3311_v38 = vpop.f32.mrb[22].mxu1  ;;  %v634_v25 = vsel %vm582_vm2, %v4379_v23, -inf }
 0x41b   :  { %v498_v43 = vpop.f32.mrb[23].mxu1  ;;  %v4334_v44 = vadd.f32 %v556_v29, %v532_v33  ;;  %v533_v19 = vmul.f32 0.35355338, %v3311_v38 }
 0x41c   :  { %v4342_v63 = vadd.f32 %v554_v28, %v530_v37  ;;  %v531_v24 = vmul.f32 0.35355338, %v498_v43 }
 0x41d   :  { %v649_v59 = vsel %vm582_vm2, %v4334_v44, -inf  ;;  %v4386_v29 = vadd.f32 %v557_v13, %v533_v19 }
 0x41e   :  { %611 = vmax.xlane.f32.xlu1 %v610_v53  ;;  %650 = vmax.xlane.f32.xlu0 %v649_v59  ;;  %v643_v62 = vsel %vm582_vm2, %v4342_v63, -inf  ;;  %v4397_v35 = vadd.f32 %v555_v31, %v531_v24 }
 0x41f   :  { %v652_v33 = vsel %vm582_vm2, %v4386_v29, -inf }
 0x420   :  { %v646_v36 = vsel %vm582_vm2, %v4397_v35, -inf }
 0x422   :  { %626 = vmax.xlane.f32.xlu1 %v625_v6  ;;  %644 = vmax.xlane.f32.xlu0 %v643_v62 }
 0x426   :  { %620 = vmax.xlane.f32.xlu1 %v619_v46 }
 0x42a   :  { %629 = vmax.xlane.f32.xlu1 %v628_v54 }
 0x42e   :  { %623 = vmax.xlane.f32.xlu1 %v622_v11 }
 0x432   :  { %641 = vmax.xlane.f32.xlu1 %v640_v21 }
 0x436   :  { %635 = vmax.xlane.f32.xlu1 %v634_v25 }
 0x438   :  { %865 = vrot.lane.b32.xlu0 %v859_v52, %s3907_s23 }
 0x43a   :  { %653 = vmax.xlane.f32.xlu1 %v652_v33 }
 0x43e   :  { %647 = vmax.xlane.f32.xlu1 %v646_v36 }
 0x44f   :  { %867 = vrot.lane.b32.xlu1 %v860_v15, %s3907_s23 }
 0x483   :  { %v591_v37 = vpop.xlane.xlu1 %590 }
 0x484   :  { %v657_v38 = vsub.f32 %v4235_v56, %v591_v37 }
 0x486   :  { %v683_v32 = vmul.f32 1.442695, %v657_v38 }
 0x487   :  { %v585_v41 = vpop.xlane.xlu1 %584 }
 0x488   :  { %3598 = vpow2.f32 %v683_v32  ;;  %v655_v52 = vsub.f32 %v4239_v12, %v585_v41 }
 0x48a   :  { %v679_v40 = vmul.f32 1.442695, %v655_v52 }
 0x48b   :  { %v594_v28 = vpop.xlane.xlu1 %593 }
 0x48c   :  { %3600 = vpow2.f32 %v679_v40  ;;  %v658_v43 = vsub.f32 %v4246_v20, %v594_v28  ;;  %v597_v58 = vpop.xlane.xlu0 %596 }
 0x48d   :  { %v659_v15 = vsub.f32 %v4254_v26, %v597_v58 }
 0x48e   :  { %v685_v53 = vmul.f32 1.442695, %v658_v43 }
 0x48f   :  { %v588_v59 = vpop.xlane.xlu1 %587  ;;  %v687_v6 = vmul.f32 1.442695, %v659_v15 }
 0x490   :  { %3602 = vpow2.f32 %v685_v53  ;;  %v656_v60 = vsub.f32 %v4258_v30, %v588_v59 }
 0x492   :  { %v4409_v5 = vpop.eup %3598  ;;  %v681_v56 = vmul.f32 1.442695, %v656_v60 }
 0x493   :  { %v603_v2 = vpop.xlane.xlu1 %602  ;;  %v733_v12 = vsel %vm582_vm2, %v4409_v5, 0.0 }
 0x494   :  { %3604 = vpow2.f32 %v681_v56  ;;  %v661_v4 = vsub.f32 %v4267_v39, %v603_v2  ;;  %734 = vadd.xlane.f32.xlu0 %v733_v12 }
 0x496   :  { %v4415_v20 = vpop.eup %3600  ;;  %v691_v62 = vmul.f32 1.442695, %v661_v4 }
 0x497   :  { %v606_v9 = vpop.xlane.xlu1 %605  ;;  %v727_v30 = vsel %vm582_vm2, %v4415_v20, 0.0 }
 0x498   :  { %3606 = vpow2.f32 %v691_v62  ;;  %v662_v26 = vsub.f32 %v4274_v57, %v606_v9  ;;  %728 = vadd.xlane.f32.xlu0 %v727_v30 }
 0x499   :  { %3608 = vpow2.f32 %v687_v6 }
 0x49a   :  { %v4420_v45 = vpop.eup %3602  ;;  %v693_v46 = vmul.f32 1.442695, %v662_v26 }
 0x49b   :  { %v600_v1 = vpop.xlane.xlu1 %599  ;;  %v736_v39 = vsel %vm582_vm2, %v4420_v45, 0.0 }
 0x49c   :  { %3610 = vpow2.f32 %v693_v46  ;;  %v660_v50 = vsub.f32 %v4281_v0, %v600_v1  ;;  %737 = vadd.xlane.f32.xlu1 %v736_v39 }
 0x49e   :  { %v4425_v54 = vpop.eup %3604  ;;  %v689_v3 = vmul.f32 1.442695, %v660_v50 }
 0x49f   :  { %v615_v51 = vpop.xlane.xlu1 %614  ;;  %v730_v57 = vsel %vm582_vm2, %v4425_v54, 0.0 }
 0x4a0   :  { %3612 = vpow2.f32 %v689_v3  ;;  %v665_v11 = vsub.f32 %v4288_v7, %v615_v51  ;;  %731 = vadd.xlane.f32.xlu1 %v730_v57 }
 0x4a2   :  { %v4430_v10 = vpop.eup %3606  ;;  %v699_v19 = vmul.f32 1.442695, %v665_v11 }
 0x4a3   :  { %v609_v21 = vpop.xlane.xlu1 %608  ;;  %v639_v13 = vpop.xlane.xlu0 %638  ;;  %v745_v0 = vsel %vm582_vm2, %v4430_v10, 0.0 }
 0x4a4   :  { %v4434_v24 = vpop.eup %3608  ;;  %3614 = vpow2.f32 %v699_v19  ;;  %v663_v25 = vsub.f32 %v4298_v55, %v609_v21  ;;  %746 = vadd.xlane.f32.xlu0 %v745_v0  ;;  %v673_v9 = vsub.f32 %v4306_v14, %v639_v13 }
 0x4a5   :  { %v739_v37 = vsel %vm582_vm2, %v4434_v24, 0.0 }
 0x4a6   :  { %v4437_v31 = vpop.eup %3610  ;;  %v695_v33 = vmul.f32 1.442695, %v663_v25  ;;  %v715_v39 = vmul.f32 1.442695, %v673_v9 }
 0x4a7   :  { %v618_v36 = vpop.xlane.xlu1 %617  ;;  %v633_v7 = vpop.xlane.xlu0 %632  ;;  %v748_v38 = vsel %vm582_vm2, %v4437_v31, 0.0 }
 0x4a8   :  { %3616 = vpow2.f32 %v695_v33  ;;  %v666_v32 = vsub.f32 %v4308_v18, %v618_v36  ;;  %740 = vadd.xlane.f32.xlu0 %v739_v37  ;;  %749 = vadd.xlane.f32.xlu1 %v748_v38 }
 0x4aa   :  { %v4444_v41 = vpop.eup %3612  ;;  %v701_v55 = vmul.f32 1.442695, %v666_v32 }
 0x4ab   :  { %v612_v52 = vpop.xlane.xlu1 %611  ;;  %v4446_v40 = vpop.xlane.xlu0 %650  ;;  %v742_v28 = vsel %vm582_vm2, %v4444_v41, 0.0 }
 0x4ac   :  { %3618 = vpow2.f32 %v701_v55  ;;  %v664_v43 = vsub.f32 %v4321_v27, %v612_v52  ;;  %743 = vadd.xlane.f32.xlu1 %v742_v28 }
 0x4ae   :  { %v4451_v53 = vpop.eup %3614  ;;  %v697_v58 = vmul.f32 1.442695, %v664_v43 }
 0x4af   :  { %v627_v59 = vpop.xlane.xlu1 %626  ;;  %v645_v18 = vpop.xlane.xlu0 %644  ;;  %v757_v60 = vsel %vm582_vm2, %v4451_v53, 0.0 }
 0x4b0   :  { %3620 = vpow2.f32 %v697_v58  ;;  %v669_v15 = vsub.f32 %v4340_v61, %v627_v59  ;;  %758 = vadd.xlane.f32.xlu0 %v757_v60 }
 0x4b2   :  { %v4456_v56 = vpop.eup %3616  ;;  %v707_v2 = vmul.f32 1.442695, %v669_v15 }
 0x4b3   :  { %v621_v12 = vpop.xlane.xlu1 %620  ;;  %v866_v4 = vpop.permute.xlu0 %865  ;;  %v751_v27 = vsel %vm582_vm2, %v4456_v56, 0.0 }
 0x4b4   :  { %3622 = vpow2.f32 %v707_v2  ;;  %v667_v6 = vsub.f32 %v4351_v8, %v621_v12  ;;  %752 = vadd.xlane.f32.xlu0 %v751_v27  ;;  %3312 = vmatprep.subr.bf16.mxu0 %v866_v4  ;;  %v671_v8 = vsub.f32 %v4314_v22, %v633_v7  ;;  %v675_v7 = vsub.f32 %v4342_v63, %v645_v18 }
 0x4b5   :  { %3313 = vmatpush3.bf16.msra.mxu0 %v866_v4 }
 0x4b6   :  { %v4461_v62 = vpop.eup %3618  ;;  %v703_v61 = vmul.f32 1.442695, %v667_v6  ;;  %v711_v11 = vmul.f32 1.442695, %v671_v8  ;;  %v719_v52 = vmul.f32 1.442695, %v675_v7 }
 0x4b7   :  { %v630_v30 = vpop.xlane.xlu1 %629  ;;  %v760_v26 = vsel %vm582_vm2, %v4461_v62, 0.0 }
 0x4b8   :  { %3624 = vpow2.f32 %v703_v61  ;;  %v670_v46 = vsub.f32 %v4358_v49, %v630_v30  ;;  %761 = vadd.xlane.f32.xlu1 %v760_v26 }
 0x4ba   :  { %v4467_v1 = vpop.eup %3620  ;;  %v709_v50 = vmul.f32 1.442695, %v670_v46  ;;  %v677_v46 = vsub.f32 %v4334_v44, %v4446_v40 }
 0x4bb   :  { %v624_v3 = vpop.xlane.xlu1 %623  ;;  %v754_v51 = vsel %vm582_vm2, %v4467_v1, 0.0 }
 0x4bc   :  { %3626 = vpow2.f32 %v709_v50  ;;  %v668_v14 = vsub.f32 %v4365_v47, %v624_v3  ;;  %755 = vadd.xlane.f32.xlu1 %v754_v51 }
 0x4bd   :  { %3628 = vpow2.f32 %v715_v39  ;;  %v723_v39 = vmul.f32 1.442695, %v677_v46 }
 0x4be   :  { %v4473_v57 = vpop.eup %3622  ;;  %v705_v49 = vmul.f32 1.442695, %v668_v14 }
 0x4bf   :  { %v642_v19 = vpop.xlane.xlu1 %641  ;;  %v769_v21 = vsel %vm582_vm2, %v4473_v57, 0.0 }
 0x4c0   :  { %3630 = vpow2.f32 %v705_v49  ;;  %v674_v22 = vsub.f32 %v4372_v16, %v642_v19  ;;  %770 = vadd.xlane.f32.xlu0 %v769_v21 }
 0x4c1   :  { %3632 = vpow2.f32 %v711_v11 }
 0x4c2   :  { %v4478_v13 = vpop.eup %3624  ;;  %v717_v0 = vmul.f32 1.442695, %v674_v22 }
 0x4c3   :  { %v636_v25 = vpop.xlane.xlu1 %635  ;;  %v763_v47 = vsel %vm582_vm2, %v4478_v13, 0.0 }
 0x4c4   :  { %v672_v33 = vsub.f32 %v4379_v23, %v636_v25  ;;  %764 = vadd.xlane.f32.xlu1 %v763_v47  ;;  %3634 = vpow2.f32 %v717_v0 }
 0x4c6   :  { %v4483_v36 = vpop.eup %3626  ;;  %v713_v37 = vmul.f32 1.442695, %v672_v33 }
 0x4c7   :  { %v654_v38 = vpop.xlane.xlu1 %653  ;;  %v772_v16 = vsel %vm582_vm2, %v4483_v36, 0.0  ;;  %v4488_v32 = vpop.eup %3628 }
 0x4c8   :  { %773 = vadd.xlane.f32.xlu1 %v772_v16  ;;  %3636 = vpow2.f32 %v713_v37  ;;  %v781_v63 = vsel %vm582_vm2, %v4488_v32, 0.0  ;;  %v678_v59 = vsub.f32 %v4386_v29, %v654_v38 }
 0x4c9   :  { %3638 = vpow2.f32 %v719_v52 }
 0x4ca   :  { %v4490_v55 = vpop.eup %3630  ;;  %v725_v12 = vmul.f32 1.442695, %v678_v59 }
 0x4cb   :  { %v648_v28 = vpop.xlane.xlu1 %647  ;;  %v766_v23 = vsel %vm582_vm2, %v4490_v55, 0.0  ;;  %v4496_v43 = vpop.eup %3632 }
 0x4cc   :  { %v676_v58 = vsub.f32 %v4397_v35, %v648_v28  ;;  %767 = vadd.xlane.f32.xlu0 %v766_v23  ;;  %782 = vadd.xlane.f32.xlu1 %v781_v63  ;;  %v775_v15 = vsel %vm582_vm2, %v4496_v43, 0.0 }
 0x4ce   :  { %v721_v18 = vmul.f32 1.442695, %v676_v58  ;;  %v4502_v2 = vpop.eup %3634 }
 0x4cf   :  { %v868_v60 = vpop.permute.xlu1 %867  ;;  %v784_v35 = vsel %vm582_vm2, %v4502_v2, 0.0 }
 0x4d0   :  { %776 = vadd.xlane.f32.xlu1 %v775_v15  ;;  %3314 = vmatprep.subr.bf16.mxu0 %v868_v60  ;;  %3640 = vpow2.f32 %v721_v18 }
 0x4d1   :  { %3315 = vmatpush3.bf16.msra.mxu0 %v868_v60  ;;  %3642 = vpow2.f32 %v725_v12 }
 0x4d2   :  { %v4506_v4 = vpop.eup %3636  ;;  %3644 = vpow2.f32 %v723_v39 }
 0x4d3   :  { %v778_v29 = vsel %vm582_vm2, %v4506_v4, 0.0  ;;  %v4510_v27 = vpop.eup %3638 }
 0x4d4   :  { %785 = vadd.xlane.f32.xlu1 %v784_v35  ;;  %v787_v6 = vsel %vm582_vm2, %v4510_v27, 0.0 }
 0x4d8   :  { %779 = vadd.xlane.f32.xlu1 %v778_v29 }
 0x4da   :  { %v4514_v9 = vpop.eup %3640 }
 0x4db   :  { %v790_v61 = vsel %vm582_vm2, %v4514_v9, 0.0  ;;  %v4518_v30 = vpop.eup %3642 }
 0x4dc   :  { %788 = vadd.xlane.f32.xlu1 %v787_v6  ;;  %v796_v26 = vsel %vm582_vm2, %v4518_v30, 0.0  ;;  %v4528_v8 = vpop.eup %3644 }
 0x4dd   :  { %v793_v50 = vsel %vm582_vm2, %v4528_v8, 0.0 }
 0x4e0   :  { %791 = vadd.xlane.f32.xlu1 %v790_v61 }
 0x4e2   :  { %869 = vrot.lane.b32.xlu0 %v861_v48, %s3907_s23 }
 0x4e4   :  { %797 = vadd.xlane.f32.xlu1 %v796_v26 }
 0x501   :  { %794 = vadd.xlane.f32.xlu0 %v793_v50 }
 0x521   :  { %v735_v3 = vpop.xlane.xlu0 %734 }
 0x525   :  { %v729_v51 = vpop.xlane.xlu0 %728 }
 0x526   :  { %3646 = vrcp.f32 %v729_v51 }
 0x529   :  { %v738_v14 = vpop.xlane.xlu1 %737 }
 0x52d   :  { %v732_v17 = vpop.xlane.xlu1 %731 }
 0x52e   :  { %3648 = vrcp.f32 %v732_v17 }
 0x52f   :  { %3650 = vrcp.f32 %v738_v14 }
 0x530   :  { %v3647_v34 = vpop.eup %3646 }
 0x531   :  { %v823_v11 = vmul.f32 %v3647_v34, %v4415_v20  ;;  %v747_v19 = vpop.xlane.xlu0 %746 }
 0x535   :  { %v750_v49 = vpop.xlane.xlu1 %749  ;;  %v741_v22 = vpop.xlane.xlu0 %740 }
 0x538   :  { %v3649_v48 = vpop.eup %3648 }
 0x539   :  { %v824_v44 = vmul.f32 %v3649_v48, %v4425_v54  ;;  %v744_v21 = vpop.xlane.xlu1 %743  ;;  %v3651_v54 = vpop.eup %3650 }
 0x53a   :  { %3652 = vrcp.f32 %v744_v21  ;;  %v826_v63 = vmul.f32 %v3651_v54, %v4420_v45 }
 0x53b   :  { %v847_v40 = vpack.c.bf16 %v824_v44, %v823_v11  ;;  %3654 = vrcp.f32 %v735_v3 }
 0x53c   :  { %3656 = vrcp.f32 %v741_v22 }
 0x53d   :  { %3318 = vmatprep.mubr.msk.bf16.mxu0 %vm582_vm2, %v847_v40  ;;  %v759_v25 = vpop.xlane.xlu0 %758  ;;  %3658 = vrcp.f32 %v750_v49 }
 0x541   :  { %v753_v33 = vpop.xlane.xlu0 %752 }
 0x544   :  { %v3653_v52 = vpop.eup %3652 }
 0x545   :  { %v762_v0 = vpop.xlane.xlu1 %761  ;;  %v3655_v28 = vpop.eup %3654  ;;  %v828_v18 = vmul.f32 %v3653_v52, %v4444_v41 }
 0x546   :  { %v3657_v23 = vpop.eup %3656  ;;  %v825_v60 = vmul.f32 %v3655_v28, %v4409_v5 }
 0x547   :  { %v827_v15 = vmul.f32 %v3657_v23, %v4434_v24  ;;  %v3659_v35 = vpop.eup %3658 }
 0x548   :  { %v848_v12 = vpack.c.bf16 %v826_v63, %v825_v60  ;;  %v830_v61 = vmul.f32 %v3659_v35, %v4437_v31 }
 0x549   :  { %v756_v47 = vpop.xlane.xlu1 %755  ;;  %v849_v6 = vpack.c.bf16 %v828_v18, %v827_v15  ;;  %v4582_v18 = vld [vmem:[%s5695_s1] sm:$0xff]  ;;  %v4588_v15 = vld [vmem:[%s5695_s1 + $0x30] sm:$0xff] }
 0x54a   :  { %3660 = vrcp.f32 %v756_v47 }
 0x54b   :  { %3662 = vrcp.f32 %v747_v19 }
 0x54c   :  { %3664 = vrcp.f32 %v753_v33 }
 0x54d   :  { %v771_v37 = vpop.xlane.xlu0 %770  ;;  %3666 = vrcp.f32 %v762_v0 }
 0x551   :  { %v765_v7 = vpop.xlane.xlu1 %764 }
 0x554   :  { %v3661_v45 = vpop.eup %3660 }
 0x555   :  { %v774_v20 = vpop.xlane.xlu1 %773  ;;  %v3663_v41 = vpop.eup %3662  ;;  %v832_v24 = vmul.f32 %v3661_v45, %v4467_v1 }
 0x556   :  { %v3665_v5 = vpop.eup %3664  ;;  %v829_v46 = vmul.f32 %v3663_v41, %v4430_v10 }
 0x557   :  { %v831_v39 = vmul.f32 %v3665_v5, %v4456_v56  ;;  %v3667_v3 = vpop.eup %3666  ;;  %v4600_v5 = vld [vmem:[%s5695_s1 + $0x38] sm:$0xff] }
 0x558   :  { %v850_v50 = vpack.c.bf16 %v830_v61, %v829_v46  ;;  %v834_v1 = vmul.f32 %v3667_v3, %v4461_v62  ;;  %v4612_v3 = vld [vmem:[%s5695_s1 + $0x50] sm:$0xff] }
 0x559   :  { %v768_v38 = vpop.xlane.xlu0 %767  ;;  %v783_v16 = vpop.xlane.xlu1 %782  ;;  %v851_v14 = vpack.c.bf16 %v832_v24, %v831_v39  ;;  %v4606_v39 = vld [vmem:[%s5695_s1 + $0x20] sm:$0xff] }
 0x55a   :  { %3668 = vrcp.f32 %v768_v38 }
 0x55b   :  { %3670 = vrcp.f32 %v759_v25 }
 0x55c   :  { %3672 = vrcp.f32 %v765_v7 }
 0x55d   :  { %v870_v58 = vpop.permute.xlu0 %869  ;;  %v777_v59 = vpop.xlane.xlu1 %776  ;;  %3674 = vrcp.f32 %v774_v20 }
 0x55e   :  { %3316 = vmatprep.subr.bf16.mxu0 %v870_v58 }
 0x55f   :  { %3317 = vmatpush3.bf16.msra.mxu0 %v870_v58 }
 0x560   :  { %3358 = vmatprep.subr.bf16.mxu0 %v3904_v42 }
 0x561   :  { %v786_v29 = vpop.xlane.xlu1 %785 }
 0x562   :  { %3319 = vmatmul.mubr.msk.bf16.vlgmr.msra.gmra.mrb[12].mxu0 %vm582_vm2, %v848_v12 }
 0x563   :  { %3322 = vmatprep.mubr.msk.bf16.mxu0 %vm582_vm2, %v849_v6  ;;  %v4594_v6 = vld [vmem:[%s5695_s1 + $0x8] sm:$0xff] }
 0x564   :  { %v3669_v17 = vpop.eup %3668 }
 0x565   :  { %v780_v26 = vpop.xlane.xlu1 %779  ;;  %v3671_v34 = vpop.eup %3670  ;;  %v836_v48 = vmul.f32 %v3669_v17, %v4490_v55  ;;  %v4618_v17 = vld [vmem:[%s5695_s1 + $0x10] sm:$0xff] }
 0x566   :  { %3676 = vrcp.f32 %v780_v26  ;;  %v3673_v31 = vpop.eup %3672  ;;  %v833_v56 = vmul.f32 %v3671_v34, %v4451_v53 }
 0x567   :  { %3678 = vrcp.f32 %v771_v37  ;;  %v835_v11 = vmul.f32 %v3673_v31, %v4478_v13  ;;  %v3675_v40 = vpop.eup %3674  ;;  %v4624_v31 = vld [vmem:[%s5695_s1 + $0x40] sm:$0xff] }
 0x568   :  { %3680 = vrcp.f32 %v777_v59  ;;  %v852_v44 = vpack.c.bf16 %v834_v1, %v833_v56  ;;  %v838_v55 = vmul.f32 %v3675_v40, %v4483_v36 }
 0x569   :  { %v789_v51 = vpop.xlane.xlu1 %788  ;;  %3682 = vrcp.f32 %v786_v29  ;;  %v853_v49 = vpack.c.bf16 %v836_v48, %v835_v11  ;;  %v4630_v48 = vld [vmem:[%s5695_s1 + $0x28] sm:$0xff] }
 0x56a   :  { %3323 = vmatmul.mubr.msk.bf16.gmra.mrb[16].mxu0 %vm582_vm2, %v850_v50 }
 0x56b   :  { %3326 = vmatprep.mubr.msk.bf16.mxu0 %vm582_vm2, %v851_v14 }
 0x56d   :  { %v792_v10 = vpop.xlane.xlu1 %791 }
 0x56e   :  { %3684 = vrcp.f32 %v792_v10 }
 0x56f   :  { %3686 = vrcp.f32 %v783_v16 }
 0x570   :  { %v3677_v19 = vpop.eup %3676  ;;  %3688 = vrcp.f32 %v789_v51 }
 0x571   :  { %v3679_v21 = vpop.eup %3678  ;;  %v840_v53 = vmul.f32 %v3677_v19, %v4506_v4  ;;  %v798_v38 = vpop.xlane.xlu1 %797  ;;  %v4642_v19 = vld [vmem:[%s5695_s1 + $0x18] sm:$0xff] }
 0x572   :  { %3327 = vmatmul.mubr.msk.bf16.gmra.mrb[20].mxu0 %vm582_vm2, %v852_v44  ;;  %v3681_v62 = vpop.eup %3680  ;;  %v837_v22 = vmul.f32 %v3679_v21, %v4473_v57  ;;  %3690 = vrcp.f32 %v798_v38  ;;  %v4636_v44 = vld [vmem:[%s5695_s1 + $0x58] sm:$0xff]  ;;  %v4672_v38 = vld [vmem:[%s5695_s1 + $0x68] sm:$0xff] }
 0x573   :  { %3330 = vmatprep.mubr.msk.bf16.mxu0 %vm582_vm2, %v853_v49  ;;  %v839_v13 = vmul.f32 %v3681_v62, %v4496_v43  ;;  %v3683_v25 = vpop.eup %3682 }
 0x574   :  { %v854_v0 = vpack.c.bf16 %v838_v55, %v837_v22  ;;  %v842_v20 = vmul.f32 %v3683_v25, %v4502_v2  ;;  %v4648_v55 = vld [vmem:[%s5695_s1 + $0x48] sm:$0xff]  ;;  %v4654_v25 = vld [vmem:[%s5695_s1 + $0x70] sm:$0xff] }
 0x575   :  { %v855_v47 = vpack.c.bf16 %v840_v53, %v839_v13 }
 0x578   :  { %v3685_v33 = vpop.eup %3684 }
 0x579   :  { %v3687_v7 = vpop.eup %3686  ;;  %v844_v36 = vmul.f32 %v3685_v33, %v4514_v9 }
 0x57a   :  { %3331 = vmatmul.mubr.msk.bf16.gmra.mrb[24].mxu0 %vm582_vm2, %v854_v0  ;;  %v3689_v37 = vpop.eup %3688  ;;  %v841_v4 = vmul.f32 %v3687_v7, %v4488_v32  ;;  %v3558_v32 = vld [vmem:[%s5693_s3 + $0x4] ss:$28 sps:$4 sm:$0xff]  }
 0x57b   :  { %3334 = vmatprep.mubr.msk.bf16.mxu0 %vm582_vm2, %v855_v47  ;;  %v843_v57 = vmul.f32 %v3689_v37, %v4510_v27  ;;  %3343 = vmatpush3.bf16.msra.mxu1 %v3558_v32  ;;  %v3559_v27 = vld [vmem:[%s5693_s3 + $0x3c] ss:$28 sps:$4 sm:$0xff]   ;;  %v4660_v7 = vld [vmem:[%s5695_s1 + $0x60] sm:$0xff] }
 0x57c   :  { %v856_v54 = vpack.c.bf16 %v842_v20, %v841_v4  ;;  %v3691_v52 = vpop.eup %3690  ;;  %3344 = vmatprep.subr.bf16.mxu1 %v3904_v42  ;;  %v4666_v4 = vld [vmem:[%s5695_s1 + $0x78] sm:$0xff] }
 0x57d   :  { %v857_v43 = vpack.c.bf16 %v844_v36, %v843_v57  ;;  %v846_v9 = vmul.f32 %v3691_v52, %v4518_v30 }
 0x57f   :  { %3345 = vmatpush3.bf16.msra.mxu1 %v3559_v27  ;;  %v4684_v27 = vld [vmem:[%s5695_s1 + $0x80] sm:$0xff] }
 0x580   :  { %3374 = vmatprep.subr.bf16.mxu1 %v3904_v42 }
 0x582   :  { %3335 = vmatmul.mubr.msk.bf16.gmra.mrb[28].mxu0 %vm582_vm2, %v856_v54 }
 0x583   :  { %3338 = vmatprep.mubr.msk.bf16.mxu0 %vm582_vm2, %v857_v43 }
 0x58e   :  { %v795_v16 = vpop.xlane.xlu0 %794 }
 0x58f   :  { %3692 = vrcp.f32 %v795_v16 }
 0x599   :  { %v3693_v28 = vpop.eup %3692 }
 0x59a   :  { %v845_v2 = vmul.f32 %v3693_v28, %v4528_v8 }
 0x59c   :  { %v858_v23 = vpack.c.bf16 %v846_v9, %v845_v2  ;;  %v4678_v9 = vld [vmem:[%s5695_s1 + $0x90] sm:$0xff] }
 0x59e   :  { %3339 = vmatmul.mubr.msk.bf16.gmra.mrb[32].mxu0 %vm582_vm2, %v858_v23 }
 0x59f   :  { %3362 = vmatprep.mubr.msk.bf16.mxu0 %vm3905_vm1, %v3904_v42 }
 0x635   :  { %v3320_v30 = vpop.f32.mrb[12].mxu0 }
 0x636   :  { %v944_v8 = vpop.f32.mrb[13].mxu0  ;;  %v1041_v34 = vmul.f32 %v4618_v17, %v3320_v30 }
 0x637   :  { %v3321_v63 = vpop.f32.mrb[14].mxu0  ;;  %v1039_v60 = vmul.f32 %v4582_v18, %v944_v8 }
 0x638   :  { %v947_v58 = vpop.f32.mrb[15].mxu0  ;;  %v1042_v21 = vmul.f32 %v4642_v19, %v3321_v63 }
 0x639   :  { %v1040_v45 = vmul.f32 %v4594_v6, %v947_v58  ;;  %v4690_v58 = vld [vmem:[%s5695_s1 + $0x98] sm:$0xff] }
 0x63d   :  { %v3324_v59 = vpop.f32.mrb[16].mxu0 }
 0x63e   :  { %v1045_v12 = vmul.f32 %v4588_v15, %v3324_v59  ;;  %v960_v35 = vpop.f32.mrb[17].mxu0 }
 0x63f   :  { %v3325_v29 = vpop.f32.mrb[18].mxu0  ;;  %v1043_v50 = vmul.f32 %v4606_v39, %v960_v35  ;;  %v4696_v35 = vld [vmem:[%s5695_s1 + $0x88] sm:$0xff] }
 0x640   :  { %v1063_v41 = vadd.f32 %v1045_v12, %v1039_v60  ;;  %v1046_v61 = vmul.f32 %v4600_v5, %v3325_v29  ;;  %v963_v26 = vpop.f32.mrb[19].mxu0 }
 0x641   :  { %v1044_v56 = vmul.f32 %v4630_v48, %v963_v26 }
 0x642   :  { %v1064_v24 = vadd.f32 %v1046_v61, %v1040_v45 }
 0x645   :  { %v3328_v46 = vpop.f32.mrb[20].mxu0 }
 0x646   :  { %v1049_v51 = vmul.f32 %v4612_v3, %v3328_v46  ;;  %v976_v14 = vpop.f32.mrb[21].mxu0 }
 0x647   :  { %v1047_v1 = vmul.f32 %v4624_v31, %v976_v14  ;;  %v3329_v10 = vpop.f32.mrb[22].mxu0 }
 0x648   :  { %v1067_v11 = vadd.f32 %v1049_v51, %v1043_v50  ;;  %v1050_v40 = vmul.f32 %v4636_v44, %v3329_v10  ;;  %v979_v49 = vpop.f32.mrb[23].mxu0  ;;  %v4711_v51 = vld [vmem:[%s5695_s1 + $0xa0] sm:$0xff]  ;;  %v4717_v10 = vld [vmem:[%s5695_s1 + $0xb8] sm:$0xff] }
 0x649   :  { %v1065_v62 = vadd.f32 %v1047_v1, %v1041_v34  ;;  %v1048_v53 = vmul.f32 %v4648_v55, %v979_v49  ;;  %v4723_v49 = vld [vmem:[%s5695_s1 + $0xa8] sm:$0xff] }
 0x64a   :  { %v1068_v22 = vadd.f32 %v1050_v40, %v1044_v56 }
 0x64b   :  { %v1066_v13 = vadd.f32 %v1048_v53, %v1042_v21 }
 0x64d   :  { %v3332_v0 = vpop.f32.mrb[24].mxu0 }
 0x64e   :  { %v1053_v47 = vmul.f32 %v4654_v25, %v3332_v0  ;;  %v992_v33 = vpop.f32.mrb[25].mxu0  ;;  %v3069_v0 = vld [vmem:[%s5694_s5 + $0x3] ss:$0 sm:$0xff] }
 0x64f   :  { %v1051_v37 = vmul.f32 %v4660_v7, %v992_v33  ;;  %v3333_v20 = vpop.f32.mrb[26].mxu0 }
 0x650   :  { %v1071_v36 = vadd.f32 %v1065_v62, %v1053_v47  ;;  %v1054_v57 = vmul.f32 %v4666_v4, %v3333_v20  ;;  %v995_v54 = vpop.f32.mrb[27].mxu0 }
 0x651   :  { %v1069_v43 = vadd.f32 %v1063_v41, %v1051_v37  ;;  %v1052_v16 = vmul.f32 %v4672_v38, %v995_v54 }
 0x652   :  { %v1072_v52 = vadd.f32 %v1066_v13, %v1054_v57 }
 0x653   :  { %v1070_v28 = vadd.f32 %v1064_v24, %v1052_v16  ;;  %v4705_v24 = vld [vmem:[%s5695_s1 + $0xb0] sm:$0xff]  ;;  %v3851_v16 = vld [vmem:[%s5692_s0 + $0x8] sm:$0xff] }
 0x655   :  { %v3336_v2 = vpop.f32.mrb[28].mxu0 }
 0x656   :  { %v1057_v23 = vmul.f32 %v4678_v9, %v3336_v2  ;;  %v1008_v32 = vpop.f32.mrb[29].mxu0 }
 0x657   :  { %v1055_v30 = vmul.f32 %v4684_v27, %v1008_v32  ;;  %v3337_v8 = vpop.f32.mrb[30].mxu0 }
 0x658   :  { %v1075_v63 = vadd.f32 %v1069_v43, %v1057_v23  ;;  %v1058_v59 = vmul.f32 %v4690_v58, %v3337_v8  ;;  %v1011_v60 = vpop.f32.mrb[31].mxu0 }
 0x659   :  { %v1073_v12 = vadd.f32 %v1067_v11, %v1055_v30  ;;  %v1056_v29 = vmul.f32 %v4696_v35, %v1011_v60 }
 0x65a   :  { %v1076_v45 = vadd.f32 %v1070_v28, %v1058_v59 }
 0x65b   :  { %v1074_v41 = vadd.f32 %v1068_v22, %v1056_v29  ;;  %v3853_v29 = vld [vmem:[%s5692_s0 + $0x18] sm:$0xff] }
 0x65c   :  { %v1081_v61 = vpack.c.bf16 %v1076_v45, %v1075_v63  ;;  %v3852_v63 = vld [vmem:[%s5692_s0 + $0x10] sm:$0xff] }
 0x65e   :  { %3347 = vmatmul.mubr.msk.bf16.vlgmr.msra.gmra.mrb[24].mxu1 %vm38_vm0, %v1081_v61 }
 0x65f   :  { %3350 = vmatprep.mubr.msk.bf16.mxu1 %vm3905_vm1, %v3904_v42 }
 0x671   :  { %v3340_v26 = vpop.f32.mrb[32].mxu0 }
 0x672   :  { %v1061_v46 = vmul.f32 %v4705_v24, %v3340_v26  ;;  %v1024_v50 = vpop.f32.mrb[33].mxu0 }
 0x673   :  { %v1059_v14 = vmul.f32 %v4711_v51, %v1024_v50  ;;  %v3341_v34 = vpop.f32.mrb[34].mxu0 }
 0x674   :  { %v1079_v1 = vadd.f32 %v1073_v12, %v1061_v46  ;;  %v1062_v56 = vmul.f32 %v4717_v10, %v3341_v34  ;;  %v1027_v11 = vpop.f32.mrb[35].mxu0  ;;  %v3854_v34 = vld [vmem:[%s5692_s0 + $0x20] sm:$0xff] }
 0x675   :  { %v1077_v40 = vadd.f32 %v1071_v36, %v1059_v14  ;;  %v1060_v21 = vmul.f32 %v4723_v49, %v1027_v11  ;;  %v3850_v36 = vld [vmem:[%s5692_s0] sm:$0xff] }
 0x676   :  { %v1080_v62 = vadd.f32 %v1074_v41, %v1062_v56 }
 0x677   :  { %v1078_v53 = vadd.f32 %v1072_v52, %v1060_v21 }
 0x678   :  { %v1083_v22 = vpack.c.bf16 %v1080_v62, %v1079_v1 }
 0x679   :  { %v1082_v13 = vpack.c.bf16 %v1078_v53, %v1077_v40  ;;  %v3855_v40 = vld [vmem:[%s5692_s0 + $0x28] sm:$0xff] }
 0x67b   :  { %3351 = vmatmul.mubr.msk.bf16.gmra.mrb[28].mxu1 %vm38_vm0, %v1082_v13 }
 0x67c   :  { %3354 = vmatprep.mubr.msk.bf16.mxu1 %vm3905_vm1, %v3904_v42 }
 0x683   :  { %3355 = vmatmul.mubr.msk.bf16.gmra.mrb[32].mxu1 %vm38_vm0, %v1083_v22 }
 0x684   :  { %3390 = vmatprep.mubr.msk.bf16.mxu1 %vm3905_vm1, %v3904_v42 }
 0x731   :  { %v1147_v47 = vpop.f32.mrb[24].mxu1 }
 0x732   :  { %v1148_v33 = vadd.f32 %v3069_v0, %v1147_v47  ;;  %v3348_v37 = vpop.f32.mrb[25].mxu1 }
 0x733   :  { %v1150_v20 = vpop.f32.mrb[26].mxu1 }
 0x734   :  { %v4738_v57 = vadd.f32 %v3850_v36, %v1148_v33  ;;  %v1151_v54 = vadd.f32 %v3069_v0, %v1150_v20  ;;  %v3349_v43 = vpop.f32.mrb[27].mxu1 }
 0x736   :  { %v4743_v52 = vadd.f32 %v3851_v16, %v1151_v54  ;;  %v1176_v28 = vsel %vm38_vm0, %v4738_v57, 0.0 }
 0x737   :  { %1177 = vadd.xlane.f32.xlu1 %v1176_v28 }
 0x738   :  { %v1179_v2 = vsel %vm38_vm0, %v4743_v52, 0.0 }
 0x73b   :  { %1180 = vadd.xlane.f32.xlu1 %v1179_v2 }
 0x74e   :  { %v1155_v23 = vpop.f32.mrb[28].mxu1 }
 0x74f   :  { %v1156_v32 = vadd.f32 %v3069_v0, %v1155_v23  ;;  %v3352_v30 = vpop.f32.mrb[29].mxu1 }
 0x750   :  { %v1158_v8 = vpop.f32.mrb[30].mxu1 }
 0x751   :  { %v4752_v59 = vadd.f32 %v3852_v63, %v1156_v32  ;;  %v1159_v60 = vadd.f32 %v3069_v0, %v1158_v8  ;;  %v3353_v12 = vpop.f32.mrb[31].mxu1 }
 0x753   :  { %v4757_v45 = vadd.f32 %v3853_v29, %v1159_v60  ;;  %v1182_v41 = vsel %vm38_vm0, %v4752_v59, 0.0 }
 0x754   :  { %1183 = vadd.xlane.f32.xlu1 %v1182_v41 }
 0x755   :  { %v1185_v50 = vsel %vm38_vm0, %v4757_v45, 0.0 }
 0x756   :  { %v1163_v61 = vpop.f32.mrb[32].mxu1 }
 0x757   :  { %v1164_v26 = vadd.f32 %v3069_v0, %v1163_v61  ;;  %v3356_v46 = vpop.f32.mrb[33].mxu1 }
 0x758   :  { %1186 = vadd.xlane.f32.xlu1 %v1185_v50  ;;  %v1166_v14 = vpop.f32.mrb[34].mxu1  ;;  %v3560_v46 = vld [vmem:[%s5693_s3 + $0x8] ss:$28 sps:$4 sm:$0xff]  }
 0x759   :  { %v4766_v1 = vadd.f32 %v3854_v34, %v1164_v26  ;;  %v1167_v56 = vadd.f32 %v3069_v0, %v1166_v14  ;;  %v3357_v11 = vpop.f32.mrb[35].mxu1  ;;  %3359 = vmatpush3.bf16.msra.mxu0 %v3560_v46 }
 0x75a   :  { %3360 = vmatprep.subr.bf16.mxu0 %v3904_v42  ;;  %v3561_v11 = vld [vmem:[%s5693_s3 + $0x40] ss:$28 sps:$4 sm:$0xff]  }
 0x75b   :  { %v4771_v21 = vadd.f32 %v3855_v40, %v1167_v56  ;;  %v1188_v62 = vsel %vm38_vm0, %v4766_v1, 0.0 }
 0x75c   :  { %1189 = vadd.xlane.f32.xlu1 %v1188_v62 }
 0x75d   :  { %v1191_v53 = vsel %vm38_vm0, %v4771_v21, 0.0  ;;  %3361 = vmatpush3.bf16.msra.mxu0 %v3561_v11 }
 0x75e   :  { %3402 = vmatprep.subr.bf16.mxu0 %v3904_v42 }
 0x760   :  { %1192 = vadd.xlane.f32.xlu1 %v1191_v53  ;;  %v3562_v53 = vld [vmem:[%s5697_s4] ss:$8 sps:$4 sm:$0xff]  }
 0x761   :  { %3375 = vmatpush3.bf16.msra.mxu1 %v3562_v53 }
 0x762   :  { %3376 = vmatprep.subr.bf16.mxu1 %v3904_v42 }
 0x7c4   :  { %v1178_v22 = vpop.xlane.xlu1 %1177 }
 0x7c5   :  { %v1194_v13 = vmul.f32 0.03125, %v1178_v22  ;;  %v3563_v22 = vld [vmem:[%s5697_s4 + $0x10] ss:$8 sps:$4 sm:$0xff]  }
 0x7c6   :  { %3377 = vmatpush3.bf16.msra.mxu1 %v3563_v22 }
 0x7c7   :  { %v4778_v47 = vsub.f32 %v4738_v57, %v1194_v13  ;;  %v3564_v13 = vld [vmem:[%s5697_s4 + $0x20] ss:$8 sps:$4 sm:$0xff]   ;;  %3378 = vmatprep.subr.bf16.mxu1 %v3904_v42 }
 0x7c8   :  { %v1181_v0 = vpop.xlane.xlu1 %1180 }
 0x7c9   :  { %v1195_v33 = vmul.f32 0.03125, %v1181_v0  ;;  %v1206_v37 = vmul.f32 %v4778_v47, %v4778_v47  ;;  %v3565_v0 = vld [vmem:[%s5697_s4 + $0x30] ss:$8 sps:$4 sm:$0xff]  }
 0x7ca   :  { %3379 = vmatpush3.bf16.msra.mxu1 %v3564_v13 }
 0x7cb   :  { %v4783_v20 = vsub.f32 %v4743_v52, %v1195_v33  ;;  %v1212_v36 = vsel %vm38_vm0, %v1206_v37, 0.0  ;;  %3380 = vmatprep.subr.bf16.mxu1 %v3904_v42  ;;  %v3566_v33 = vld [vmem:[%s5697_s4 + $0x40] ss:$8 sps:$4 sm:$0xff]   ;;  %v3567_v37 = vld [vmem:[%s5697_s4 + $0x50] ss:$8 sps:$4 sm:$0xff]  }
 0x7cc   :  { %1213 = vadd.xlane.f32.xlu1 %v1212_v36 }
 0x7cd   :  { %v1207_v54 = vmul.f32 %v4783_v20, %v4783_v20 }
 0x7ce   :  { %3381 = vmatpush3.bf16.msra.mxu1 %v3565_v0 }
 0x7cf   :  { %v1215_v43 = vsel %vm38_vm0, %v1207_v54, 0.0  ;;  %3382 = vmatprep.subr.bf16.mxu1 %v3904_v42 }
 0x7d0   :  { %1216 = vadd.xlane.f32.xlu0 %v1215_v43 }
 0x7d2   :  { %3383 = vmatpush3.bf16.msra.mxu1 %v3566_v33 }
 0x7d3   :  { %3384 = vmatprep.subr.bf16.mxu1 %v3904_v42 }
 0x7d6   :  { %3385 = vmatpush3.bf16.msra.mxu1 %v3567_v37 }
 0x7d7   :  { %3386 = vmatprep.subr.bf16.mxu1 %v3904_v42 }
 0x7e1   :  { %v1184_v16 = vpop.xlane.xlu1 %1183 }
 0x7e2   :  { %v1196_v28 = vmul.f32 0.03125, %v1184_v16 }
 0x7e4   :  { %v4790_v2 = vsub.f32 %v4752_v59, %v1196_v28 }
 0x7e5   :  { %v1187_v23 = vpop.xlane.xlu1 %1186 }
 0x7e6   :  { %v1197_v32 = vmul.f32 0.03125, %v1187_v23  ;;  %v1208_v30 = vmul.f32 %v4790_v2, %v4790_v2 }
 0x7e8   :  { %v4795_v8 = vsub.f32 %v4757_v45, %v1197_v32  ;;  %v1218_v63 = vsel %vm38_vm0, %v1208_v30, 0.0 }
 0x7e9   :  { %1219 = vadd.xlane.f32.xlu1 %v1218_v63  ;;  %v1190_v60 = vpop.xlane.xlu1 %1189  ;;  %v3075_v63 = vld [vmem:[%s5694_s5 + $0x4] ss:$0 sm:$0xff] }
 0x7ea   :  { %v1198_v12 = vmul.f32 0.03125, %v1190_v60  ;;  %v1209_v29 = vmul.f32 %v4795_v8, %v4795_v8 }
 0x7ec   :  { %v4801_v41 = vsub.f32 %v4766_v1, %v1198_v12  ;;  %v1221_v61 = vsel %vm38_vm0, %v1209_v29, 0.0 }
 0x7ed   :  { %1222 = vadd.xlane.f32.xlu0 %v1221_v61  ;;  %v1193_v26 = vpop.xlane.xlu1 %1192  ;;  %v3076_v61 = vld [vmem:[%s5694_s5 + $0x5] ss:$0 sm:$0xff] }
 0x7ee   :  { %v1199_v50 = vmul.f32 0.03125, %v1193_v26  ;;  %v1210_v14 = vmul.f32 %v4801_v41, %v4801_v41 }
 0x7f0   :  { %v4810_v34 = vsub.f32 %v4771_v21, %v1199_v50  ;;  %v1224_v56 = vsel %vm38_vm0, %v1210_v14, 0.0 }
 0x7f1   :  { %1225 = vadd.xlane.f32.xlu1 %v1224_v56 }
 0x7f2   :  { %v1211_v40 = vmul.f32 %v4810_v34, %v4810_v34 }
 0x7f4   :  { %v1227_v62 = vsel %vm38_vm0, %v1211_v40, 0.0 }
 0x7f5   :  { %1228 = vadd.xlane.f32.xlu0 %v1227_v62 }
 0x859   :  { %v1214_v36 = vpop.xlane.xlu1 %1213 }
 0x85a   :  { %v1230_v54 = vmul.f32 0.03125, %v1214_v36 }
 0x85c   :  { %v1236_v43 = vadd.f32 1e-05, %v1230_v54 }
 0x85d   :  { %v1217_v16 = vpop.xlane.xlu0 %1216 }
 0x85e   :  { %3694 = vrsqrt.f32 %v1236_v43  ;;  %v1231_v28 = vmul.f32 0.03125, %v1217_v16 }
 0x860   :  { %v1237_v23 = vadd.f32 1e-05, %v1231_v28 }
 0x862   :  { %3696 = vrsqrt.f32 %v1237_v23 }
 0x868   :  { %v3695_v32 = vpop.eup %3694 }
 0x869   :  { %v1248_v30 = vmul.f32 %v3695_v32, %v4778_v47 }
 0x86b   :  { %v1258_v12 = vmul.f32 %v3075_v63, %v1248_v30 }
 0x86c   :  { %v3697_v60 = vpop.eup %3696 }
 0x86d   :  { %v1249_v29 = vmul.f32 %v3697_v60, %v4783_v20  ;;  %v1268_v46 = vadd.f32 %v3076_v61, %v1258_v12 }
 0x86f   :  { %v1259_v26 = vmul.f32 %v3075_v63, %v1249_v29 }
 0x871   :  { %v1269_v50 = vadd.f32 %v3076_v61, %v1259_v26 }
 0x873   :  { %v1274_v14 = vpack.c.bf16 %v1269_v50, %v1268_v46 }
 0x875   :  { %3363 = vmatmul.mubr.msk.bf16.vlgmr.msra.gmra.mrb[36].mxu0 %vm38_vm0, %v1274_v14 }
 0x876   :  { %v1220_v56 = vpop.xlane.xlu1 %1219  ;;  %3366 = vmatprep.mubr.msk.bf16.mxu0 %vm3905_vm1, %v3904_v42 }
 0x877   :  { %v1232_v47 = vmul.f32 0.03125, %v1220_v56 }
 0x879   :  { %v1238_v11 = vadd.f32 1e-05, %v1232_v47 }
 0x87a   :  { %v1223_v40 = vpop.xlane.xlu0 %1222 }
 0x87b   :  { %3698 = vrsqrt.f32 %v1238_v11  ;;  %v1233_v62 = vmul.f32 0.03125, %v1223_v40 }
 0x87d   :  { %v1239_v20 = vadd.f32 1e-05, %v1233_v62 }
 0x87e   :  { %v1226_v53 = vpop.xlane.xlu1 %1225 }
 0x87f   :  { %3700 = vrsqrt.f32 %v1239_v20  ;;  %v1234_v22 = vmul.f32 0.03125, %v1226_v53 }
 0x881   :  { %v1240_v13 = vadd.f32 1e-05, %v1234_v22 }
 0x882   :  { %v1229_v0 = vpop.xlane.xlu0 %1228 }
 0x883   :  { %3702 = vrsqrt.f32 %v1240_v13  ;;  %v1235_v33 = vmul.f32 0.03125, %v1229_v0 }
 0x885   :  { %v3699_v37 = vpop.eup %3698  ;;  %v1241_v36 = vadd.f32 1e-05, %v1235_v33 }
 0x886   :  { %v1250_v54 = vmul.f32 %v3699_v37, %v4790_v2 }
 0x887   :  { %3704 = vrsqrt.f32 %v1241_v36 }
 0x888   :  { %v1260_v28 = vmul.f32 %v3075_v63, %v1250_v54 }
 0x889   :  { %v3701_v43 = vpop.eup %3700 }
 0x88a   :  { %v1251_v16 = vmul.f32 %v3701_v43, %v4795_v8  ;;  %v1270_v60 = vadd.f32 %v3076_v61, %v1260_v28 }
 0x88c   :  { %v1261_v23 = vmul.f32 %v3075_v63, %v1251_v16 }
 0x88d   :  { %v3703_v32 = vpop.eup %3702 }
 0x88e   :  { %v1252_v30 = vmul.f32 %v3703_v32, %v4801_v41  ;;  %v1271_v12 = vadd.f32 %v3076_v61, %v1261_v23  ;;  %v3568_v41 = vld [vmem:[%s5697_s4 + $0x60] ss:$8 sps:$4 sm:$0xff]  }
 0x88f   :  { %3387 = vmatpush3.bf16.msra.mxu1 %v3568_v41 }
 0x890   :  { %v1275_v29 = vpack.c.bf16 %v1271_v12, %v1270_v60  ;;  %v1262_v50 = vmul.f32 %v3075_v63, %v1252_v30  ;;  %3388 = vmatprep.subr.bf16.mxu1 %v3904_v42 }
 0x891   :  { %v3705_v26 = vpop.eup %3704 }
 0x892   :  { %v1253_v46 = vmul.f32 %v3705_v26, %v4810_v34  ;;  %3367 = vmatmul.mubr.msk.bf16.gmra.mrb[40].mxu0 %vm38_vm0, %v1275_v29  ;;  %v1272_v14 = vadd.f32 %v3076_v61, %v1262_v50  ;;  %v3569_v34 = vld [vmem:[%s5697_s4 + $0x70] ss:$8 sps:$4 sm:$0xff]  }
 0x893   :  { %3370 = vmatprep.mubr.msk.bf16.mxu0 %vm3905_vm1, %v3904_v42  ;;  %3389 = vmatpush3.bf16.msra.mxu1 %v3569_v34 }
 0x894   :  { %v1263_v2 = vmul.f32 %v3075_v63, %v1253_v46  ;;  %v3077_v63 = vld [vmem:[%s5694_s5 + $0x6] ss:$0 sm:$0xff] }
 0x896   :  { %v1273_v8 = vadd.f32 %v3076_v61, %v1263_v2 }
 0x898   :  { %v1276_v56 = vpack.c.bf16 %v1273_v8, %v1272_v14  ;;  %v3091_v14 = vld [vmem:[%s5694_s5 + $0x7] ss:$0 sm:$0xff] }
 0x89a   :  { %3371 = vmatmul.mubr.msk.bf16.gmra.mrb[44].mxu0 %vm38_vm0, %v1276_v56 }
 0x89b   :  { %3406 = vmatprep.mubr.msk.bf16.mxu0 %vm3905_vm1, %v3904_v42 }
 0x948   :  { %v1340_v61 = vpop.f32.mrb[36].mxu0 }
 0x949   :  { %v1341_v47 = vadd.f32 %v3077_v63, %v1340_v61  ;;  %v3364_v11 = vpop.f32.mrb[37].mxu0 }
 0x94a   :  { %v1343_v40 = vpop.f32.mrb[38].mxu0 }
 0x94b   :  { %v1344_v62 = vadd.f32 %v3077_v63, %v1343_v40  ;;  %v3365_v20 = vpop.f32.mrb[39].mxu0  ;;  %v1363_v53 = vmax.f32 %v1341_v47, 0.0 }
 0x94d   :  { %v1364_v22 = vmax.f32 %v1344_v62, 0.0 }
 0x94f   :  { %v1369_v13 = vpack.c.bf16 %v1364_v22, %v1363_v53 }
 0x951   :  { %3391 = vmatmul.mubr.bf16.vlgmr.msra.gmra.mrb[36].mxu1 %v1369_v13 }
 0x952   :  { %3394 = vmatprep.mubr.msk.bf16.mxu1 %vm3905_vm1, %v3904_v42 }
 0x965   :  { %v1348_v0 = vpop.f32.mrb[40].mxu0 }
 0x966   :  { %v1349_v33 = vadd.f32 %v3077_v63, %v1348_v0  ;;  %v3368_v37 = vpop.f32.mrb[41].mxu0 }
 0x967   :  { %v1351_v36 = vpop.f32.mrb[42].mxu0 }
 0x968   :  { %v1352_v54 = vadd.f32 %v3077_v63, %v1351_v36  ;;  %v3369_v43 = vpop.f32.mrb[43].mxu0  ;;  %v1365_v16 = vmax.f32 %v1349_v33, 0.0 }
 0x96a   :  { %v1366_v28 = vmax.f32 %v1352_v54, 0.0 }
 0x96c   :  { %v1370_v23 = vpack.c.bf16 %v1366_v28, %v1365_v16 }
 0x96d   :  { %v1356_v32 = vpop.f32.mrb[44].mxu0 }
 0x96e   :  { %v1357_v30 = vadd.f32 %v3077_v63, %v1356_v32  ;;  %v3372_v60 = vpop.f32.mrb[45].mxu0  ;;  %3395 = vmatmul.mubr.bf16.gmra.mrb[40].mxu1 %v1370_v23 }
 0x96f   :  { %v1359_v12 = vpop.f32.mrb[46].mxu0  ;;  %3398 = vmatprep.mubr.msk.bf16.mxu1 %vm3905_vm1, %v3904_v42 }
 0x970   :  { %v1360_v29 = vadd.f32 %v3077_v63, %v1359_v12  ;;  %v3373_v26 = vpop.f32.mrb[47].mxu0  ;;  %v1367_v46 = vmax.f32 %v1357_v30, 0.0 }
 0x972   :  { %v1368_v50 = vmax.f32 %v1360_v29, 0.0 }
 0x974   :  { %v1371_v2 = vpack.c.bf16 %v1368_v50, %v1367_v46 }
 0x976   :  { %3399 = vmatmul.mubr.bf16.gmra.mrb[44].mxu1 %v1371_v2 }
 0xa24   :  { %v1470_v8 = vpop.f32.mrb[36].mxu1 }
 0xa25   :  { %v1493_v56 = vadd.f32 %v1470_v8, %v4738_v57  ;;  %v3392_v41 = vpop.f32.mrb[37].mxu1 }
 0xa26   :  { %v1473_v34 = vpop.f32.mrb[38].mxu1 }
 0xa27   :  { %v4884_v61 = vadd.f32 %v3091_v14, %v1493_v56  ;;  %v1494_v47 = vadd.f32 %v1473_v34, %v4743_v52  ;;  %v3393_v11 = vpop.f32.mrb[39].mxu1 }
 0xa29   :  { %v4887_v63 = vadd.f32 %v3091_v14, %v1494_v47  ;;  %v1517_v40 = vsel %vm38_vm0, %v4884_v61, 0.0 }
 0xa2a   :  { %1518 = vadd.xlane.f32.xlu1 %v1517_v40 }
 0xa2b   :  { %v1520_v62 = vsel %vm38_vm0, %v4887_v63, 0.0 }
 0xa2c   :  { %1521 = vadd.xlane.f32.xlu0 %v1520_v62 }
 0xa41   :  { %v1478_v20 = vpop.f32.mrb[40].mxu1 }
 0xa42   :  { %v1495_v57 = vadd.f32 %v1478_v20, %v4752_v59  ;;  %v3396_v53 = vpop.f32.mrb[41].mxu1 }
 0xa43   :  { %v1481_v22 = vpop.f32.mrb[42].mxu1 }
 0xa44   :  { %v4894_v13 = vadd.f32 %v3091_v14, %v1495_v57  ;;  %v1496_v52 = vadd.f32 %v1481_v22, %v4757_v45  ;;  %v3397_v0 = vpop.f32.mrb[43].mxu1 }
 0xa46   :  { %v4897_v33 = vadd.f32 %v3091_v14, %v1496_v52  ;;  %v1523_v37 = vsel %vm38_vm0, %v4894_v13, 0.0 }
 0xa47   :  { %1524 = vadd.xlane.f32.xlu1 %v1523_v37  ;;  %v3570_v37 = vld [vmem:[%s5693_s3 + $0xc] ss:$28 sps:$4 sm:$0xff]  }
 0xa48   :  { %v1526_v36 = vsel %vm38_vm0, %v4897_v33, 0.0  ;;  %3403 = vmatpush3.bf16.msra.mxu0 %v3570_v37 }
 0xa49   :  { %1527 = vadd.xlane.f32.xlu0 %v1526_v36  ;;  %v1486_v54 = vpop.f32.mrb[44].mxu1  ;;  %3404 = vmatprep.subr.bf16.mxu0 %v3904_v42 }
 0xa4a   :  { %v1497_v59 = vadd.f32 %v1486_v54, %v4766_v1  ;;  %v3400_v43 = vpop.f32.mrb[45].mxu1 }
 0xa4b   :  { %v1489_v16 = vpop.f32.mrb[46].mxu1 }
 0xa4c   :  { %v4904_v28 = vadd.f32 %v3091_v14, %v1497_v59  ;;  %v1498_v45 = vadd.f32 %v1489_v16, %v4771_v21  ;;  %v3401_v23 = vpop.f32.mrb[47].mxu1  ;;  %v3571_v16 = vld [vmem:[%s5693_s3 + $0x44] ss:$28 sps:$4 sm:$0xff]  }
 0xa4d   :  { %3405 = vmatpush3.bf16.msra.mxu0 %v3571_v16 }
 0xa4e   :  { %v4907_v32 = vadd.f32 %v3091_v14, %v1498_v45  ;;  %v1529_v30 = vsel %vm38_vm0, %v4904_v28, 0.0 }
 0xa4f   :  { %1530 = vadd.xlane.f32.xlu1 %v1529_v30 }
 0xa50   :  { %v1532_v60 = vsel %vm38_vm0, %v4907_v32, 0.0 }
 0xa51   :  { %1533 = vadd.xlane.f32.xlu0 %v1532_v60 }
 0xab7   :  { %v1519_v12 = vpop.xlane.xlu1 %1518 }
 0xab8   :  { %v1535_v29 = vmul.f32 0.03125, %v1519_v12 }
 0xab9   :  { %v1522_v1 = vpop.xlane.xlu0 %1521 }
 0xaba   :  { %v1541_v26 = vsub.f32 %v4884_v61, %v1535_v29  ;;  %v1536_v46 = vmul.f32 0.03125, %v1522_v1 }
 0xabc   :  { %v1542_v50 = vsub.f32 %v4887_v63, %v1536_v46  ;;  %v1547_v21 = vmul.f32 %v1541_v26, %v1541_v26 }
 0xabe   :  { %v1553_v2 = vsel %vm38_vm0, %v1547_v21, 0.0  ;;  %v1548_v14 = vmul.f32 %v1542_v50, %v1542_v50 }
 0xabf   :  { %1554 = vadd.xlane.f32.xlu1 %v1553_v2 }
 0xac0   :  { %v1556_v8 = vsel %vm38_vm0, %v1548_v14, 0.0  ;;  %v3092_v14 = vld [vmem:[%s5694_s5 + $0x8] ss:$0 sm:$0xff] }
 0xac1   :  { %1557 = vadd.xlane.f32.xlu0 %v1556_v8 }
 0xad4   :  { %v1525_v56 = vpop.xlane.xlu1 %1524 }
 0xad5   :  { %v1537_v41 = vmul.f32 0.03125, %v1525_v56 }
 0xad6   :  { %v1528_v34 = vpop.xlane.xlu0 %1527 }
 0xad7   :  { %v4918_v47 = vsub.f32 %v4894_v13, %v1537_v41  ;;  %v1538_v11 = vmul.f32 0.03125, %v1528_v34 }
 0xad9   :  { %v4921_v40 = vsub.f32 %v4897_v33, %v1538_v11  ;;  %v1549_v62 = vmul.f32 %v4918_v47, %v4918_v47  ;;  %v3093_v11 = vld [vmem:[%s5694_s5 + $0x9] ss:$0 sm:$0xff] }
 0xadb   :  { %v1559_v20 = vsel %vm38_vm0, %v1549_v62, 0.0  ;;  %v1550_v57 = vmul.f32 %v4921_v40, %v4921_v40 }
 0xadc   :  { %1560 = vadd.xlane.f32.xlu1 %v1559_v20  ;;  %v1531_v53 = vpop.xlane.xlu1 %1530 }
 0xadd   :  { %v1539_v22 = vmul.f32 0.03125, %v1531_v53  ;;  %v1562_v52 = vsel %vm38_vm0, %v1550_v57, 0.0 }
 0xade   :  { %1563 = vadd.xlane.f32.xlu0 %v1562_v52  ;;  %v1534_v0 = vpop.xlane.xlu0 %1533 }
 0xadf   :  { %v1545_v36 = vsub.f32 %v4904_v28, %v1539_v22  ;;  %v1540_v54 = vmul.f32 0.03125, %v1534_v0 }
 0xae1   :  { %v1546_v59 = vsub.f32 %v4907_v32, %v1540_v54  ;;  %v1551_v43 = vmul.f32 %v1545_v36, %v1545_v36 }
 0xae3   :  { %v1565_v45 = vsel %vm38_vm0, %v1551_v43, 0.0  ;;  %v1552_v23 = vmul.f32 %v1546_v59, %v1546_v59 }
 0xae4   :  { %1566 = vadd.xlane.f32.xlu1 %v1565_v45 }
 0xae5   :  { %v1568_v30 = vsel %vm38_vm0, %v1552_v23, 0.0 }
 0xae6   :  { %1569 = vadd.xlane.f32.xlu0 %v1568_v30 }
 0xb4c   :  { %v1555_v60 = vpop.xlane.xlu1 %1554 }
 0xb4d   :  { %v1571_v12 = vmul.f32 0.03125, %v1555_v60 }
 0xb4e   :  { %v1558_v29 = vpop.xlane.xlu0 %1557 }
 0xb4f   :  { %v1577_v1 = vadd.f32 1e-05, %v1571_v12  ;;  %v1572_v46 = vmul.f32 0.03125, %v1558_v29 }
 0xb51   :  { %3706 = vrsqrt.f32 %v1577_v1  ;;  %v1578_v21 = vadd.f32 1e-05, %v1572_v46 }
 0xb53   :  { %3708 = vrsqrt.f32 %v1578_v21 }
 0xb5b   :  { %v3707_v2 = vpop.eup %3706 }
 0xb5c   :  { %v1589_v8 = vmul.f32 %v3707_v2, %v1541_v26 }
 0xb5d   :  { %v3709_v56 = vpop.eup %3708 }
 0xb5e   :  { %v1599_v41 = vmul.f32 %v3092_v14, %v1589_v8  ;;  %v1590_v34 = vmul.f32 %v3709_v56, %v1542_v50 }
 0xb60   :  { %v1600_v62 = vmul.f32 %v3092_v14, %v1590_v34  ;;  %v1609_v20 = vadd.f32 %v3093_v11, %v1599_v41 }
 0xb62   :  { %v1610_v57 = vadd.f32 %v3093_v11, %v1600_v62 }
 0xb64   :  { %v1615_v53 = vpack.c.bf16 %v1610_v57, %v1609_v20 }
 0xb66   :  { %3407 = vmatmul.mubr.msk.bf16.vlgmr.msra.gmra.mrb[48].mxu0 %vm38_vm0, %v1615_v53 }
 0xb67   :  { %3410 = vmatprep.mubr.msk.bf16.mxu0 %vm3905_vm1, %v3904_v42 }
 0xb69   :  { %v1561_v22 = vpop.xlane.xlu1 %1560 }
 0xb6a   :  { %v1573_v52 = vmul.f32 0.03125, %v1561_v22 }
 0xb6b   :  { %v1564_v0 = vpop.xlane.xlu0 %1563 }
 0xb6c   :  { %v1579_v26 = vadd.f32 1e-05, %v1573_v52  ;;  %v1574_v37 = vmul.f32 0.03125, %v1564_v0 }
 0xb6e   :  { %3710 = vrsqrt.f32 %v1579_v26  ;;  %v1580_v50 = vadd.f32 1e-05, %v1574_v37 }
 0xb70   :  { %3712 = vrsqrt.f32 %v1580_v50 }
 0xb71   :  { %v1567_v54 = vpop.xlane.xlu1 %1566 }
 0xb72   :  { %v1575_v43 = vmul.f32 0.03125, %v1567_v54 }
 0xb73   :  { %v1570_v16 = vpop.xlane.xlu0 %1569 }
 0xb74   :  { %v1581_v45 = vadd.f32 1e-05, %v1575_v43  ;;  %v1576_v23 = vmul.f32 0.03125, %v1570_v16 }
 0xb76   :  { %3714 = vrsqrt.f32 %v1581_v45  ;;  %v1582_v30 = vadd.f32 1e-05, %v1576_v23 }
 0xb78   :  { %v3711_v60 = vpop.eup %3710  ;;  %3716 = vrsqrt.f32 %v1582_v30 }
 0xb79   :  { %v1591_v12 = vmul.f32 %v3711_v60, %v4918_v47 }
 0xb7a   :  { %v3713_v29 = vpop.eup %3712 }
 0xb7b   :  { %v1592_v1 = vmul.f32 %v3713_v29, %v4921_v40  ;;  %v1601_v46 = vmul.f32 %v3092_v14, %v1591_v12  ;;  %v3094_v40 = vld [vmem:[%s5694_s5 + $0xa] ss:$0 sm:$0xff] }
 0xb7d   :  { %v1602_v21 = vmul.f32 %v3092_v14, %v1592_v1  ;;  %v1611_v2 = vadd.f32 %v3093_v11, %v1601_v46 }
 0xb7f   :  { %v1612_v8 = vadd.f32 %v3093_v11, %v1602_v21 }
 0xb80   :  { %v3715_v56 = vpop.eup %3714 }
 0xb81   :  { %v1593_v41 = vmul.f32 %v3715_v56, %v1545_v36  ;;  %v1616_v34 = vpack.c.bf16 %v1612_v8, %v1611_v2 }
 0xb82   :  { %v3717_v62 = vpop.eup %3716 }
 0xb83   :  { %v1594_v20 = vmul.f32 %v3717_v62, %v1546_v59  ;;  %3411 = vmatmul.mubr.msk.bf16.gmra.mrb[52].mxu0 %vm38_vm0, %v1616_v34  ;;  %v1603_v57 = vmul.f32 %v3092_v14, %v1593_v41 }
 0xb84   :  { %3414 = vmatprep.mubr.msk.bf16.mxu0 %vm3905_vm1, %v3904_v42 }
 0xb85   :  { %v1604_v53 = vmul.f32 %v3092_v14, %v1594_v20  ;;  %v1613_v47 = vadd.f32 %v3093_v11, %v1603_v57 }
 0xb87   :  { %v1614_v22 = vadd.f32 %v3093_v11, %v1604_v53 }
 0xb89   :  { %v1617_v52 = vpack.c.bf16 %v1614_v22, %v1613_v47 }
 0xb8b   :  { %3415 = vmatmul.mubr.msk.bf16.gmra.mrb[56].mxu0 %vm38_vm0, %v1617_v52 }
 0xc39   :  { %v1681_v36 = vpop.f32.mrb[48].mxu0 }
 0xc3a   :  { %v4958_v0 = vadd.f32 %v3094_v40, %v1681_v36  ;;  %v3408_v59 = vpop.f32.mrb[49].mxu0 }
 0xc3b   :  { %v1684_v26 = vpop.f32.mrb[50].mxu0 }
 0xc3c   :  { %v4960_v37 = vadd.f32 %v3094_v40, %v1684_v26  ;;  %1734 = vrot.lane.b32.xlu1 %v4958_v0, %s3906_s11  ;;  %v3409_v14 = vpop.f32.mrb[51].mxu0  ;;  %v1704_v11 = vmul.f32 %v4582_v18, %v4958_v0  ;;  %v4968_v50 = vmul.f32 %v4588_v15, %v4958_v0  ;;  %v4972_v54 = vmul.f32 %v4660_v7, %v4958_v0 }
 0xc3d   :  { %v4976_v43 = vmul.f32 %v4678_v9, %v4958_v0 }
 0xc3e   :  { %1736 = vrot.lane.b32.xlu0 %v4960_v37, %s3906_s11  ;;  %v1705_v16 = vmul.f32 %v4594_v6, %v4960_v37  ;;  %v4984_v18 = vmul.f32 %v4600_v5, %v4960_v37  ;;  %v4988_v15 = vmul.f32 %v4672_v38, %v4960_v37  ;;  %v4992_v7 = vmul.f32 %v4690_v58, %v4960_v37 }
 0xc3f   :  { %v2287_v9 = vpack.c.bf16 %v4960_v37, %v4958_v0 }
 0xc40   :  { %v1786_v45 = vpack.c.bf16 %v1705_v16, %v1704_v11  ;;  %v1789_v23 = vpack.c.bf16 %v4984_v18, %v4968_v50  ;;  %v1792_v6 = vpack.c.bf16 %v4988_v15, %v4972_v54  ;;  %v1795_v5 = vpack.c.bf16 %v4992_v7, %v4976_v43  ;;  %v3857_v7 = vld [vmem:[%s5696_s2] sm:$0xff] }
 0xc42   :  { %3422 = vmatprep.mubr.msk.bf16.mxu1 %vm38_vm0, %v1786_v45 }
 0xc56   :  { %v1689_v38 = vpop.f32.mrb[52].mxu0 }
 0xc57   :  { %v5003_v30 = vadd.f32 %v3094_v40, %v1689_v38  ;;  %v3412_v58 = vpop.f32.mrb[53].mxu0 }
 0xc58   :  { %v1692_v60 = vpop.f32.mrb[54].mxu0 }
 0xc59   :  { %v5005_v12 = vadd.f32 %v3094_v40, %v1692_v60  ;;  %1738 = vrot.lane.b32.xlu1 %v5003_v30, %s3906_s11  ;;  %v3413_v29 = vpop.f32.mrb[55].mxu0  ;;  %v1706_v1 = vmul.f32 %v4618_v17, %v5003_v30  ;;  %v1712_v46 = vmul.f32 %v4624_v31, %v5003_v30  ;;  %v5015_v21 = vmul.f32 %v4654_v25, %v5003_v30 }
 0xc5a   :  { %v5019_v2 = vmul.f32 %v4711_v51, %v5003_v30 }
 0xc5b   :  { %v1707_v8 = vmul.f32 %v4642_v19, %v5005_v12  ;;  %v1713_v56 = vmul.f32 %v4648_v55, %v5005_v12  ;;  %v1719_v17 = vmul.f32 %v4666_v4, %v5005_v12  ;;  %v1725_v31 = vmul.f32 %v4723_v49, %v5005_v12 }
 0xc5c   :  { %v2288_v25 = vpack.c.bf16 %v5005_v12, %v5003_v30 }
 0xc5d   :  { %1740 = vrot.lane.b32.xlu1 %v5005_v12, %s3906_s11  ;;  %v1787_v51 = vpack.c.bf16 %v1707_v8, %v1706_v1  ;;  %v1790_v41 = vpack.c.bf16 %v1713_v56, %v1712_v46  ;;  %v1793_v34 = vpack.c.bf16 %v1719_v17, %v5015_v21  ;;  %v1796_v19 = vpack.c.bf16 %v1725_v31, %v5019_v2  ;;  %v3858_v56 = vld [vmem:[%s5696_s2 + $0x18] sm:$0xff] }
 0xc5e   :  { %v1697_v62 = vpop.f32.mrb[56].mxu0 }
 0xc5f   :  { %v5035_v55 = vadd.f32 %v3094_v40, %v1697_v62  ;;  %v3416_v20 = vpop.f32.mrb[57].mxu0 }
 0xc60   :  { %v1700_v4 = vpop.f32.mrb[58].mxu0  ;;  %v3859_v20 = vld [vmem:[%s5696_s2 + $0x20] sm:$0xff] }
 0xc61   :  { %v5037_v57 = vadd.f32 %v3094_v40, %v1700_v4  ;;  %1742 = vrot.lane.b32.xlu0 %v5035_v55, %s3906_s11  ;;  %v3417_v49 = vpop.f32.mrb[59].mxu0  ;;  %v1708_v53 = vmul.f32 %v4606_v39, %v5035_v55  ;;  %v1714_v47 = vmul.f32 %v4612_v3, %v5035_v55  ;;  %v1720_v22 = vmul.f32 %v4684_v27, %v5035_v55 }
 0xc62   :  { %v1726_v52 = vmul.f32 %v4705_v24, %v5035_v55  ;;  %v3860_v49 = vld [vmem:[%s5696_s2 + $0x8] sm:$0xff] }
 0xc63   :  { %1744 = vrot.lane.b32.xlu1 %v5037_v57, %s3906_s11  ;;  %v1709_v40 = vmul.f32 %v4630_v48, %v5037_v57  ;;  %v1715_v36 = vmul.f32 %v4636_v44, %v5037_v57  ;;  %v1721_v39 = vmul.f32 %v4696_v35, %v5037_v57  ;;  %v1727_v3 = vmul.f32 %v4717_v10, %v5037_v57 }
 0xc64   :  { %v2289_v27 = vpack.c.bf16 %v5037_v57, %v5035_v55 }
 0xc65   :  { %v1788_v59 = vpack.c.bf16 %v1709_v40, %v1708_v53  ;;  %v1791_v24 = vpack.c.bf16 %v1715_v36, %v1714_v47  ;;  %v1794_v26 = vpack.c.bf16 %v1721_v39, %v1720_v22  ;;  %v1797_v14 = vpack.c.bf16 %v1727_v3, %v1726_v52  ;;  %v3861_v36 = vld [vmem:[%s5696_s2 + $0x30] sm:$0xff] }
 0xcae   :  { %v1735_v11 = vpop.permute.xlu1 %1734 }
 0xcaf   :  { %1752 = vxpose.xlu0.b32.start [1/6] (short) (narrow) %v1735_v11, 32  ;;  %v3862_v11 = vld [vmem:[%s5696_s2 + $0x38] sm:$0xff] }
 0xcb0   :  { %v1737_v16 = vpop.permute.xlu0 %1736 }
 0xcb3   :  { %1753 = vxpose.xlu0.b32.cont [2/6] (short) (narrow) %v1737_v16, 32 }
 0xccb   :  { %v1739_v48 = vpop.permute.xlu1 %1738 }
 0xccc   :  { %1754 = vxpose.xlu0.b32.cont [3/6] (short) (narrow) %v1739_v48, 32 }
 0xccf   :  { %v1741_v44 = vpop.permute.xlu1 %1740 }
 0xcd0   :  { %1755 = vxpose.xlu0.b32.cont [4/6] (short) (narrow) %v1741_v44, 32 }
 0xcd3   :  { %v1743_v45 = vpop.permute.xlu0 %1742 }
 0xcd4   :  { %1756 = vxpose.xlu0.b32.cont [5/6] (short) (narrow) %v1743_v45, 32 }
 0xcd5   :  { %v1745_v35 = vpop.permute.xlu1 %1744 }
 0xcd8   :  { %1757 = vxpose.xlu0.b32.end [6/6] (short) (narrow) %v1745_v35, 32  ;;  %v3863_v35 = vld [vmem:[%s5696_s2 + $0x28] sm:$0xff] }
 0xd44   :  { %v1768_v10 = vpop.trf.xlu0 }
 0xd48   :  { %v1769_v38 = vpop.trf.xlu0 }
 0xd49   :  { %v1784_v58 = vpack.c.bf16 %v1769_v38, %v1768_v10 }
 0xd4b   :  { %3418 = vmatprep.subr.bf16.mxu1 %v1784_v58 }
 0xd4c   :  { %3419 = vmatpush3.bf16.msra.mxu1 %v1784_v58  ;;  %v1770_v60 = vpop.trf.xlu0 }
 0xd50   :  { %v1771_v29 = vpop.trf.xlu0 }
 0xd51   :  { %v1785_v1 = vpack.c.bf16 %v1771_v29, %v1770_v60 }
 0xd53   :  { %3420 = vmatprep.subr.bf16.mxu1 %v1785_v1 }
 0xd54   :  { %3421 = vmatpush3.bf16.msra.mxu1 %v1785_v1 }
 0xd55   :  { %3476 = vmatprep.subr.bf16.mxu1 %v3904_v42 }
 0xd57   :  { %3423 = vmatmul.mubr.msk.bf16.vlgmr.msra.gmra.mrb[48].mxu1 %vm38_vm0, %v1787_v51 }
 0xd58   :  { %3426 = vmatprep.mubr.msk.bf16.mxu1 %vm38_vm0, %v1788_v59 }
 0xd5f   :  { %3427 = vmatmul.mubr.msk.bf16.gmra.mrb[52].mxu1 %vm38_vm0, %v1789_v23 }
 0xd60   :  { %3430 = vmatprep.mubr.msk.bf16.mxu1 %vm38_vm0, %v1790_v41 }
 0xd67   :  { %3431 = vmatmul.mubr.msk.bf16.gmra.mrb[56].mxu1 %vm38_vm0, %v1791_v24 }
 0xd68   :  { %3434 = vmatprep.mubr.msk.bf16.mxu1 %vm38_vm0, %v1792_v6  ;;  %v3856_v6 = vld [vmem:[%s5696_s2 + $0x10] sm:$0xff] }
 0xd6f   :  { %3435 = vmatmul.mubr.msk.bf16.gmra.mrb[60].mxu1 %vm38_vm0, %v1793_v34 }
 0xd70   :  { %3438 = vmatprep.mubr.msk.bf16.mxu1 %vm38_vm0, %v1794_v26 }
 0xd77   :  { %3439 = vmatmul.mubr.msk.bf16.gmra.mrb[64].mxu1 %vm38_vm0, %v1795_v5 }
 0xd78   :  { %3442 = vmatprep.mubr.msk.bf16.mxu1 %vm38_vm0, %v1796_v19 }
 0xd7f   :  { %3443 = vmatmul.mubr.msk.bf16.gmra.mrb[68].mxu1 %vm38_vm0, %v1797_v14 }
 0xd80   :  { %3480 = vmatprep.mubr.msk.bf16.mxu1 %vm3905_vm1, %v3904_v42 }
 0xe2a   :  { %v3424_v50 = vpop.f32.mrb[48].mxu1 }
 0xe2b   :  { %v1965_v54 = vmul.f32 0.35355338, %v3424_v50  ;;  %v1868_v18 = vpop.f32.mrb[49].mxu1  ;;  %v3864_v50 = vld [vmem:[%s5696_s2 + $0x50] sm:$0xff] }
 0xe2c   :  { %v1963_v15 = vmul.f32 0.35355338, %v1868_v18  ;;  %v3425_v23 = vpop.f32.mrb[50].mxu1 }
 0xe2d   :  { %v5087_v46 = vadd.f32 %v3856_v6, %v1965_v54  ;;  %v1871_v43 = vpop.f32.mrb[51].mxu1  ;;  %v1966_v21 = vmul.f32 0.35355338, %v3425_v23  ;;  %v3865_v6 = vld [vmem:[%s5696_s2 + $0x40] sm:$0xff] }
 0xe2e   :  { %v5092_v5 = vadd.f32 %v3857_v7, %v1963_v15  ;;  %v1964_v31 = vmul.f32 0.35355338, %v1871_v43 }
 0xe2f   :  { %v2017_v2 = vsel %vm582_vm2, %v5087_v46, -inf  ;;  %v5099_v17 = vadd.f32 %v3858_v56, %v1966_v21 }
 0xe30   :  { %2018 = vmax.xlane.f32.xlu1 %v2017_v2  ;;  %v2011_v41 = vsel %vm582_vm2, %v5092_v5, -inf  ;;  %v5111_v53 = vadd.f32 %v3860_v49, %v1964_v31 }
 0xe31   :  { %v2020_v22 = vsel %vm582_vm2, %v5099_v17, -inf }
 0xe32   :  { %v3428_v8 = vpop.f32.mrb[52].mxu1  ;;  %v2014_v24 = vsel %vm582_vm2, %v5111_v53, -inf }
 0xe33   :  { %v1884_v51 = vpop.f32.mrb[53].mxu1  ;;  %v1969_v47 = vmul.f32 0.35355338, %v3428_v8 }
 0xe34   :  { %v1967_v34 = vmul.f32 0.35355338, %v1884_v51  ;;  %2012 = vmax.xlane.f32.xlu1 %v2011_v41  ;;  %v3429_v19 = vpop.f32.mrb[54].mxu1  ;;  %v3866_v41 = vld [vmem:[%s5696_s2 + $0x58] sm:$0xff] }
 0xe35   :  { %v1887_v62 = vpop.f32.mrb[55].mxu1  ;;  %v5120_v39 = vadd.f32 %v3861_v36, %v1969_v47  ;;  %v1970_v3 = vmul.f32 0.35355338, %v3429_v19  ;;  %v3869_v36 = vld [vmem:[%s5696_s2 + $0x48] sm:$0xff] }
 0xe36   :  { %v5106_v4 = vadd.f32 %v3859_v20, %v1967_v34  ;;  %v1968_v48 = vmul.f32 0.35355338, %v1887_v62  ;;  %v3867_v20 = vld [vmem:[%s5696_s2 + $0x98] sm:$0xff] }
 0xe37   :  { %v5127_v16 = vadd.f32 %v3862_v11, %v1970_v3  ;;  %v2029_v44 = vsel %vm582_vm2, %v5120_v39, -inf }
 0xe38   :  { %2021 = vmax.xlane.f32.xlu1 %v2020_v22  ;;  %v2023_v52 = vsel %vm582_vm2, %v5106_v4, -inf  ;;  %v5134_v10 = vadd.f32 %v3863_v35, %v1968_v48  ;;  %v3868_v22 = vld [vmem:[%s5696_s2 + $0x88] sm:$0xff] }
 0xe39   :  { %2024 = vmax.xlane.f32.xlu0 %v2023_v52  ;;  %v2032_v60 = vsel %vm582_vm2, %v5127_v16, -inf }
 0xe3a   :  { %v3432_v40 = vpop.f32.mrb[56].mxu1  ;;  %v2026_v15 = vsel %vm582_vm2, %v5134_v10, -inf }
 0xe3b   :  { %v1900_v59 = vpop.f32.mrb[57].mxu1  ;;  %v1973_v38 = vmul.f32 0.35355338, %v3432_v40 }
 0xe3c   :  { %2015 = vmax.xlane.f32.xlu1 %v2014_v24  ;;  %v3433_v26 = vpop.f32.mrb[58].mxu1  ;;  %v1971_v18 = vmul.f32 0.35355338, %v1900_v59 }
 0xe3d   :  { %v1903_v14 = vpop.f32.mrb[59].mxu1  ;;  %v5141_v54 = vadd.f32 %v3864_v50, %v1973_v38  ;;  %v1974_v7 = vmul.f32 0.35355338, %v3433_v26  ;;  %v3870_v38 = vld [vmem:[%s5696_s2 + $0x70] sm:$0xff] }
 0xe3e   :  { %v5148_v43 = vadd.f32 %v3865_v6, %v1971_v18  ;;  %v1972_v19 = vmul.f32 0.35355338, %v1903_v14  ;;  %v3871_v18 = vld [vmem:[%s5696_s2 + $0xb8] sm:$0xff] }
 0xe3f   :  { %v2041_v2 = vsel %vm582_vm2, %v5141_v54, -inf  ;;  %v5155_v34 = vadd.f32 %v3866_v41, %v1974_v7  ;;  %v3872_v7 = vld [vmem:[%s5696_s2 + $0xa8] sm:$0xff]  ;;  %v3874_v41 = vld [vmem:[%s5696_s2 + $0x78] sm:$0xff] }
 0xe40   :  { %2030 = vmax.xlane.f32.xlu1 %v2029_v44  ;;  %v2035_v62 = vsel %vm582_vm2, %v5148_v43, -inf  ;;  %v5174_v3 = vadd.f32 %v3869_v36, %v1972_v19 }
 0xe41   :  { %v2044_v26 = vsel %vm582_vm2, %v5155_v34, -inf }
 0xe42   :  { %v3436_v45 = vpop.f32.mrb[60].mxu1  ;;  %v2038_v50 = vsel %vm582_vm2, %v5174_v3, -inf }
 0xe43   :  { %v1916_v58 = vpop.f32.mrb[61].mxu1  ;;  %v1977_v59 = vmul.f32 0.35355338, %v3436_v45 }
 0xe44   :  { %2033 = vmax.xlane.f32.xlu1 %v2032_v60  ;;  %v3437_v29 = vpop.f32.mrb[62].mxu1  ;;  %v1975_v45 = vmul.f32 0.35355338, %v1916_v58  ;;  %v3873_v58 = vld [vmem:[%s5696_s2 + $0x60] sm:$0xff] }
 0xe45   :  { %v1919_v1 = vpop.f32.mrb[63].mxu1  ;;  %v5183_v60 = vadd.f32 %v3870_v38, %v1977_v59  ;;  %v3876_v59 = vld [vmem:[%s5696_s2 + $0x90] sm:$0xff] }
 0xe48   :  { %2027 = vmax.xlane.f32.xlu1 %v2026_v15 }
 0xe4a   :  { %v3440_v23 = vpop.f32.mrb[64].mxu1 }
 0xe4b   :  { %v1932_v21 = vpop.f32.mrb[65].mxu1 }
 0xe4c   :  { %2042 = vmax.xlane.f32.xlu1 %v2041_v2  ;;  %v3441_v8 = vpop.f32.mrb[66].mxu1 }
 0xe4d   :  { %v1982_v56 = vmul.f32 0.35355338, %v3441_v8  ;;  %v1935_v31 = vpop.f32.mrb[67].mxu1  ;;  %v5202_v8 = vadd.f32 %v3873_v58, %v1975_v45 }
 0xe4e   :  { %v1980_v51 = vmul.f32 0.35355338, %v1935_v31  ;;  %v2053_v31 = vsel %vm582_vm2, %v5183_v60, -inf }
 0xe4f   :  { %v5162_v49 = vadd.f32 %v3867_v20, %v1982_v56  ;;  %v1978_v56 = vmul.f32 0.35355338, %v3437_v29  ;;  %v2047_v20 = vsel %vm582_vm2, %v5202_v8, -inf  ;;  %v3875_v29 = vld [vmem:[%s5696_s2 + $0x68] sm:$0xff] }
 0xe50   :  { %2036 = vmax.xlane.f32.xlu1 %v2035_v62  ;;  %v5169_v52 = vadd.f32 %v3868_v22, %v1980_v51  ;;  %v1976_v62 = vmul.f32 0.35355338, %v1919_v1  ;;  %v1981_v22 = vmul.f32 0.35355338, %v3440_v23 }
 0xe51   :  { %v2068_v47 = vsel %vm582_vm2, %v5162_v49, -inf  ;;  %v5211_v19 = vadd.f32 %v3874_v41, %v1978_v56 }
 0xe52   :  { %2069 = vmax.xlane.f32.xlu0 %v2068_v47  ;;  %v3444_v40 = vpop.f32.mrb[68].mxu1  ;;  %v2062_v44 = vsel %vm582_vm2, %v5169_v52, -inf  ;;  %v5218_v47 = vadd.f32 %v3875_v29, %v1976_v62  ;;  %v5225_v1 = vadd.f32 %v3876_v59, %v1981_v22 }
 0xe53   :  { %v1948_v24 = vpop.f32.mrb[69].mxu1  ;;  %v2056_v36 = vsel %vm582_vm2, %v5211_v19, -inf }
 0xe54   :  { %2045 = vmax.xlane.f32.xlu1 %v2044_v26  ;;  %v3445_v14 = vpop.f32.mrb[70].mxu1  ;;  %v1979_v26 = vmul.f32 0.35355338, %v1932_v21  ;;  %v1983_v38 = vmul.f32 0.35355338, %v1948_v24 }
 0xe55   :  { %v1986_v11 = vmul.f32 0.35355338, %v3445_v14  ;;  %v1951_v48 = vpop.f32.mrb[71].mxu1  ;;  %v2050_v14 = vsel %vm582_vm2, %v5218_v47, -inf }
 0xe56   :  { %v1984_v35 = vmul.f32 0.35355338, %v1951_v48  ;;  %2063 = vmax.xlane.f32.xlu0 %v2062_v44  ;;  %v1985_v48 = vmul.f32 0.35355338, %v3444_v40  ;;  %v2065_v44 = vsel %vm582_vm2, %v5225_v1, -inf }
 0xe57   :  { %v5190_v15 = vadd.f32 %v3871_v18, %v1986_v11  ;;  %v3877_v11 = vld [vmem:[%s5696_s2 + $0x80] sm:$0xff] }
 0xe58   :  { %2039 = vmax.xlane.f32.xlu1 %v2038_v50  ;;  %v5197_v2 = vadd.f32 %v3872_v7, %v1984_v35  ;;  %v5232_v23 = vadd.f32 %v3877_v11, %v1979_v26  ;;  %v3878_v35 = vld [vmem:[%s5696_s2 + $0xb0] sm:$0xff]  ;;  %v3879_v50 = vld [vmem:[%s5696_s2 + $0xa0] sm:$0xff] }
 0xe59   :  { %v2080_v6 = vsel %vm582_vm2, %v5190_v15, -inf  ;;  %v5239_v21 = vadd.f32 %v3878_v35, %v1985_v48  ;;  %v5246_v40 = vadd.f32 %v3879_v50, %v1983_v38 }
 0xe5a   :  { %2081 = vmax.xlane.f32.xlu0 %v2080_v6  ;;  %v2074_v51 = vsel %vm582_vm2, %v5197_v2, -inf  ;;  %v2059_v45 = vsel %vm582_vm2, %v5232_v23, -inf }
 0xe5b   :  { %v2077_v18 = vsel %vm582_vm2, %v5239_v21, -inf  ;;  %v2071_v24 = vsel %vm582_vm2, %v5246_v40, -inf }
 0xe5c   :  { %2054 = vmax.xlane.f32.xlu1 %v2053_v31 }
 0xe5e   :  { %2075 = vmax.xlane.f32.xlu0 %v2074_v51 }
 0xe60   :  { %2048 = vmax.xlane.f32.xlu1 %v2047_v20 }
 0xe64   :  { %2057 = vmax.xlane.f32.xlu1 %v2056_v36 }
 0xe68   :  { %2051 = vmax.xlane.f32.xlu1 %v2050_v14 }
 0xe6c   :  { %2066 = vmax.xlane.f32.xlu1 %v2065_v44 }
 0xe70   :  { %2060 = vmax.xlane.f32.xlu1 %v2059_v45 }
 0xe74   :  { %2078 = vmax.xlane.f32.xlu1 %v2077_v18  ;;  %2295 = vrot.lane.b32.xlu0 %v2288_v25, %s3907_s23 }
 0xe78   :  { %2072 = vmax.xlane.f32.xlu1 %v2071_v24 }
 0xe89   :  { %2293 = vrot.lane.b32.xlu1 %v2287_v9, %s3907_s23 }
 0xebd   :  { %v2019_v6 = vpop.xlane.xlu1 %2018 }
 0xebe   :  { %v2085_v7 = vsub.f32 %v5087_v46, %v2019_v6 }
 0xec0   :  { %v2111_v58 = vmul.f32 1.442695, %v2085_v7 }
 0xec1   :  { %v2013_v56 = vpop.xlane.xlu1 %2012 }
 0xec2   :  { %3718 = vpow2.f32 %v2111_v58  ;;  %v2083_v31 = vsub.f32 %v5092_v5, %v2013_v56 }
 0xec4   :  { %v2107_v51 = vmul.f32 1.442695, %v2083_v31 }
 0xec5   :  { %v2022_v30 = vpop.xlane.xlu1 %2021 }
 0xec6   :  { %3720 = vpow2.f32 %v2107_v51  ;;  %v2086_v12 = vsub.f32 %v5099_v17, %v2022_v30  ;;  %v2025_v41 = vpop.xlane.xlu0 %2024 }
 0xec7   :  { %v2087_v9 = vsub.f32 %v5106_v4, %v2025_v41 }
 0xec8   :  { %v2113_v25 = vmul.f32 1.442695, %v2086_v12 }
 0xec9   :  { %v2016_v62 = vpop.xlane.xlu1 %2015  ;;  %v2115_v22 = vmul.f32 1.442695, %v2087_v9 }
 0xeca   :  { %3722 = vpow2.f32 %v2113_v25  ;;  %v2084_v0 = vsub.f32 %v5111_v53, %v2016_v62 }
 0xecc   :  { %v5264_v37 = vpop.eup %3718  ;;  %v2109_v46 = vmul.f32 1.442695, %v2084_v0 }
 0xecd   :  { %v2031_v20 = vpop.xlane.xlu1 %2030  ;;  %v2161_v5 = vsel %vm582_vm2, %v5264_v37, 0.0 }
 0xece   :  { %3724 = vpow2.f32 %v2109_v46  ;;  %v2089_v29 = vsub.f32 %v5120_v39, %v2031_v20  ;;  %2162 = vadd.xlane.f32.xlu1 %v2161_v5 }
 0xed0   :  { %v5270_v17 = vpop.eup %3720  ;;  %v2119_v36 = vmul.f32 1.442695, %v2089_v29 }
 0xed1   :  { %v2034_v59 = vpop.xlane.xlu1 %2033  ;;  %v2155_v53 = vsel %vm582_vm2, %v5270_v17, 0.0 }
 0xed2   :  { %3726 = vpow2.f32 %v2119_v36  ;;  %v2090_v4 = vsub.f32 %v5127_v16, %v2034_v59  ;;  %2156 = vadd.xlane.f32.xlu1 %v2155_v53 }
 0xed3   :  { %3728 = vpow2.f32 %v2115_v22 }
 0xed4   :  { %v5275_v26 = vpop.eup %3722  ;;  %v2121_v14 = vmul.f32 1.442695, %v2090_v4 }
 0xed5   :  { %v2028_v11 = vpop.xlane.xlu1 %2027  ;;  %v2164_v39 = vsel %vm582_vm2, %v5275_v26, 0.0 }
 0xed6   :  { %3730 = vpow2.f32 %v2121_v14  ;;  %v2088_v48 = vsub.f32 %v5134_v10, %v2028_v11  ;;  %2165 = vadd.xlane.f32.xlu0 %v2164_v39 }
 0xed8   :  { %v5280_v44 = vpop.eup %3724  ;;  %v2117_v35 = vmul.f32 1.442695, %v2088_v48 }
 0xed9   :  { %v2043_v38 = vpop.xlane.xlu1 %2042  ;;  %v2158_v16 = vsel %vm582_vm2, %v5280_v44, 0.0 }
 0xeda   :  { %3732 = vpow2.f32 %v2117_v35  ;;  %v2093_v45 = vsub.f32 %v5141_v54, %v2043_v38  ;;  %2159 = vadd.xlane.f32.xlu0 %v2158_v16 }
 0xedc   :  { %v5285_v50 = vpop.eup %3726  ;;  %v2127_v18 = vmul.f32 1.442695, %v2093_v45 }
 0xedd   :  { %v2037_v24 = vpop.xlane.xlu1 %2036  ;;  %v2173_v6 = vsel %vm582_vm2, %v5285_v50, 0.0  ;;  %v5289_v10 = vpop.eup %3728 }
 0xede   :  { %3734 = vpow2.f32 %v2127_v18  ;;  %v2091_v7 = vsub.f32 %v5148_v43, %v2037_v24  ;;  %2174 = vadd.xlane.f32.xlu1 %v2173_v6  ;;  %v2167_v54 = vsel %vm582_vm2, %v5289_v10, 0.0 }
 0xedf   :  { %v2070_v11 = vpop.xlane.xlu0 %2069 }
 0xee0   :  { %v5292_v58 = vpop.eup %3730  ;;  %v2123_v56 = vmul.f32 1.442695, %v2091_v7 }
 0xee1   :  { %v2046_v31 = vpop.xlane.xlu1 %2045  ;;  %v2176_v51 = vsel %vm582_vm2, %v5292_v58, 0.0 }
 0xee2   :  { %3736 = vpow2.f32 %v2123_v56  ;;  %v2094_v30 = vsub.f32 %v5155_v34, %v2046_v31  ;;  %2168 = vadd.xlane.f32.xlu1 %v2167_v54  ;;  %2177 = vadd.xlane.f32.xlu0 %v2176_v51  ;;  %v2102_v56 = vsub.f32 %v5162_v49, %v2070_v11 }
 0xee3   :  { %v2064_v18 = vpop.xlane.xlu0 %2063 }
 0xee4   :  { %v5299_v12 = vpop.eup %3732  ;;  %v2129_v25 = vmul.f32 1.442695, %v2094_v30 }
 0xee5   :  { %v2040_v43 = vpop.xlane.xlu1 %2039  ;;  %v2170_v41 = vsel %vm582_vm2, %v5299_v12, 0.0 }
 0xee6   :  { %3738 = vpow2.f32 %v2129_v25  ;;  %v2092_v62 = vsub.f32 %v5174_v3, %v2040_v43  ;;  %2171 = vadd.xlane.f32.xlu0 %v2170_v41  ;;  %v2145_v43 = vmul.f32 1.442695, %v2102_v56 }
 0xee7   :  { %v2082_v30 = vpop.xlane.xlu0 %2081 }
 0xee8   :  { %v5304_v0 = vpop.eup %3734  ;;  %v2125_v9 = vmul.f32 1.442695, %v2092_v62 }
 0xee9   :  { %v2055_v46 = vpop.xlane.xlu1 %2054  ;;  %v2185_v34 = vsel %vm582_vm2, %v5304_v0, 0.0 }
 0xeea   :  { %3740 = vpow2.f32 %v2125_v9  ;;  %v2097_v20 = vsub.f32 %v5183_v60, %v2055_v46  ;;  %2186 = vadd.xlane.f32.xlu1 %v2185_v34 }
 0xeeb   :  { %v2076_v34 = vpop.xlane.xlu0 %2075 }
 0xeec   :  { %v5309_v5 = vpop.eup %3736  ;;  %v2135_v29 = vmul.f32 1.442695, %v2097_v20 }
 0xeed   :  { %v2049_v22 = vpop.xlane.xlu1 %2048  ;;  %v2179_v36 = vsel %vm582_vm2, %v5309_v5, 0.0 }
 0xeee   :  { %3742 = vpow2.f32 %v2135_v29  ;;  %v2095_v3 = vsub.f32 %v5202_v8, %v2049_v22  ;;  %2180 = vadd.xlane.f32.xlu1 %v2179_v36 }
 0xef0   :  { %v5314_v59 = vpop.eup %3738  ;;  %v2131_v53 = vmul.f32 1.442695, %v2095_v3 }
 0xef1   :  { %v2058_v4 = vpop.xlane.xlu1 %2057  ;;  %v2188_v14 = vsel %vm582_vm2, %v5314_v59, 0.0 }
 0xef2   :  { %3744 = vpow2.f32 %v2131_v53  ;;  %v2098_v60 = vsub.f32 %v5211_v19, %v2058_v4  ;;  %2189 = vadd.xlane.f32.xlu0 %v2188_v14  ;;  %v2296_v4 = vpop.permute.xlu0 %2295 }
 0xef4   :  { %v5319_v39 = vpop.eup %3740  ;;  %v2137_v48 = vmul.f32 1.442695, %v2098_v60  ;;  %v2106_v60 = vsub.f32 %v5190_v15, %v2082_v30 }
 0xef5   :  { %v2052_v35 = vpop.xlane.xlu1 %2051  ;;  %v2182_v8 = vsel %vm582_vm2, %v5319_v39, 0.0 }
 0xef6   :  { %3746 = vpow2.f32 %v2137_v48  ;;  %v2096_v38 = vsub.f32 %v5218_v47, %v2052_v35  ;;  %2183 = vadd.xlane.f32.xlu0 %v2182_v8  ;;  %v2153_v48 = vmul.f32 1.442695, %v2106_v60 }
 0xef8   :  { %v5324_v16 = vpop.eup %3742  ;;  %v2133_v45 = vmul.f32 1.442695, %v2096_v38 }
 0xef9   :  { %v2067_v24 = vpop.xlane.xlu1 %2066  ;;  %v2197_v19 = vsel %vm582_vm2, %v5324_v16, 0.0 }
 0xefa   :  { %3748 = vpow2.f32 %v2133_v45  ;;  %v2101_v6 = vsub.f32 %v5225_v1, %v2067_v24  ;;  %2198 = vadd.xlane.f32.xlu1 %v2197_v19  ;;  %v2100_v1 = vsub.f32 %v5169_v52, %v2064_v18 }
 0xefc   :  { %v5329_v7 = vpop.eup %3744  ;;  %v2143_v31 = vmul.f32 1.442695, %v2101_v6  ;;  %v2141_v46 = vmul.f32 1.442695, %v2100_v1 }
 0xefd   :  { %v2061_v54 = vpop.xlane.xlu1 %2060  ;;  %v2191_v47 = vsel %vm582_vm2, %v5329_v7, 0.0 }
 0xefe   :  { %3750 = vpow2.f32 %v2143_v31  ;;  %v2099_v51 = vsub.f32 %v5232_v23, %v2061_v54  ;;  %2192 = vadd.xlane.f32.xlu1 %v2191_v47 }
 0xf00   :  { %v5335_v25 = vpop.eup %3746  ;;  %v2139_v41 = vmul.f32 1.442695, %v2099_v51 }
 0xf01   :  { %v2079_v62 = vpop.xlane.xlu1 %2078  ;;  %v2200_v49 = vsel %vm582_vm2, %v5335_v25, 0.0 }
 0xf02   :  { %3752 = vpow2.f32 %v2139_v41  ;;  %2201 = vadd.xlane.f32.xlu0 %v2200_v49  ;;  %v2105_v22 = vsub.f32 %v5239_v21, %v2079_v62 }
 0xf03   :  { %3754 = vpow2.f32 %v2145_v43 }
 0xf04   :  { %v5340_v9 = vpop.eup %3748  ;;  %3756 = vpow2.f32 %v2141_v46 }
 0xf05   :  { %v2073_v23 = vpop.xlane.xlu1 %2072  ;;  %v2194_v20 = vsel %vm582_vm2, %v5340_v9, 0.0 }
 0xf06   :  { %v2103_v29 = vsub.f32 %v5246_v40, %v2073_v23  ;;  %2195 = vadd.xlane.f32.xlu0 %v2194_v20  ;;  %v2151_v40 = vmul.f32 1.442695, %v2105_v22 }
 0xf08   :  { %v5345_v52 = vpop.eup %3750  ;;  %v2147_v36 = vmul.f32 1.442695, %v2103_v29 }
 0xf09   :  { %v2294_v3 = vpop.permute.xlu1 %2293  ;;  %v2209_v53 = vsel %vm582_vm2, %v5345_v52, 0.0 }
 0xf0a   :  { %3446 = vmatprep.subr.bf16.mxu0 %v2294_v3  ;;  %2210 = vadd.xlane.f32.xlu0 %v2209_v53  ;;  %3758 = vpow2.f32 %v2147_v36 }
 0xf0b   :  { %3447 = vmatpush3.bf16.msra.mxu0 %v2294_v3  ;;  %3760 = vpow2.f32 %v2151_v40 }
 0xf0c   :  { %v5350_v14 = vpop.eup %3752  ;;  %3448 = vmatprep.subr.bf16.mxu0 %v2296_v4  ;;  %3762 = vpow2.f32 %v2153_v48 }
 0xf0d   :  { %v2203_v11 = vsel %vm582_vm2, %v5350_v14, 0.0  ;;  %v5355_v21 = vpop.eup %3754 }
 0xf0e   :  { %2204 = vadd.xlane.f32.xlu0 %v2203_v11  ;;  %v2212_v15 = vsel %vm582_vm2, %v5355_v21, 0.0  ;;  %v5363_v35 = vpop.eup %3756 }
 0xf0f   :  { %2297 = vrot.lane.b32.xlu1 %v2289_v27, %s3907_s23  ;;  %3449 = vmatpush3.bf16.msra.mxu0 %v2296_v4  ;;  %v2206_v8 = vsel %vm582_vm2, %v5363_v35, 0.0  ;;  %v2104_v27 = vsub.f32 %v5197_v2, %v2076_v34 }
 0xf11   :  { %v2149_v24 = vmul.f32 1.442695, %v2104_v27 }
 0xf12   :  { %2213 = vadd.xlane.f32.xlu0 %v2212_v15 }
 0xf13   :  { %3764 = vpow2.f32 %v2149_v24 }
 0xf14   :  { %v5367_v38 = vpop.eup %3758 }
 0xf15   :  { %v2215_v55 = vsel %vm582_vm2, %v5367_v38, 0.0  ;;  %v5371_v57 = vpop.eup %3760 }
 0xf16   :  { %2207 = vadd.xlane.f32.xlu0 %v2206_v8  ;;  %v2221_v45 = vsel %vm582_vm2, %v5371_v57, 0.0  ;;  %v5376_v18 = vpop.eup %3762 }
 0xf17   :  { %v2224_v19 = vsel %vm582_vm2, %v5376_v18, 0.0 }
 0xf1a   :  { %2216 = vadd.xlane.f32.xlu0 %v2215_v55 }
 0xf1d   :  { %v5380_v6 = vpop.eup %3764 }
 0xf1e   :  { %2222 = vadd.xlane.f32.xlu0 %v2221_v45  ;;  %v2218_v56 = vsel %vm582_vm2, %v5380_v6, 0.0 }
 0xf22   :  { %2225 = vadd.xlane.f32.xlu0 %v2224_v19 }
 0xf33   :  { %2219 = vadd.xlane.f32.xlu1 %v2218_v56 }
 0xf5b   :  { %v2163_v31 = vpop.xlane.xlu1 %2162 }
 0xf5f   :  { %v2157_v2 = vpop.xlane.xlu1 %2156 }
 0xf60   :  { %3766 = vrcp.f32 %v2157_v2 }
 0xf63   :  { %v2166_v54 = vpop.xlane.xlu0 %2165 }
 0xf67   :  { %v2160_v47 = vpop.xlane.xlu0 %2159 }
 0xf68   :  { %3768 = vrcp.f32 %v2160_v47 }
 0xf69   :  { %3770 = vrcp.f32 %v2166_v54 }
 0xf6a   :  { %v3767_v51 = vpop.eup %3766 }
 0xf6b   :  { %v2175_v43 = vpop.xlane.xlu1 %2174  ;;  %v2251_v1 = vmul.f32 %v3767_v51, %v5270_v17 }
 0xf6f   :  { %v2178_v49 = vpop.xlane.xlu0 %2177  ;;  %v2169_v46 = vpop.xlane.xlu1 %2168 }
 0xf72   :  { %v3769_v30 = vpop.eup %3768 }
 0xf73   :  { %v2252_v41 = vmul.f32 %v3769_v30, %v5280_v44  ;;  %v2172_v34 = vpop.xlane.xlu0 %2171  ;;  %v3771_v17 = vpop.eup %3770 }
 0xf74   :  { %3772 = vrcp.f32 %v2172_v34  ;;  %v2254_v60 = vmul.f32 %v3771_v17, %v5275_v26 }
 0xf75   :  { %v2275_v62 = vpack.c.bf16 %v2252_v41, %v2251_v1  ;;  %3774 = vrcp.f32 %v2163_v31 }
 0xf76   :  { %3776 = vrcp.f32 %v2169_v46 }
 0xf77   :  { %3452 = vmatprep.mubr.msk.bf16.mxu0 %vm582_vm2, %v2275_v62  ;;  %v2187_v23 = vpop.xlane.xlu1 %2186  ;;  %3778 = vrcp.f32 %v2178_v49 }
 0xf7b   :  { %v2181_v29 = vpop.xlane.xlu1 %2180 }
 0xf7e   :  { %v3773_v3 = vpop.eup %3772 }
 0xf7f   :  { %v2190_v20 = vpop.xlane.xlu0 %2189  ;;  %v3775_v53 = vpop.eup %3774  ;;  %v2256_v48 = vmul.f32 %v3773_v3, %v5299_v12 }
 0xf80   :  { %v3777_v4 = vpop.eup %3776  ;;  %v2253_v15 = vmul.f32 %v3775_v53, %v5264_v37 }
 0xf81   :  { %v2255_v8 = vmul.f32 %v3777_v4, %v5289_v10  ;;  %v3779_v27 = vpop.eup %3778 }
 0xf82   :  { %v2276_v55 = vpack.c.bf16 %v2254_v60, %v2253_v15  ;;  %v2258_v19 = vmul.f32 %v3779_v27, %v5292_v58 }
 0xf83   :  { %v2184_v22 = vpop.xlane.xlu0 %2183  ;;  %v2277_v24 = vpack.c.bf16 %v2256_v48, %v2255_v8 }
 0xf84   :  { %3780 = vrcp.f32 %v2184_v22 }
 0xf85   :  { %3782 = vrcp.f32 %v2175_v43 }
 0xf86   :  { %3784 = vrcp.f32 %v2181_v29 }
 0xf87   :  { %v2199_v36 = vpop.xlane.xlu1 %2198  ;;  %3786 = vrcp.f32 %v2190_v20 }
 0xf88   :  { %3788 = vrcp.f32 %v2187_v23 }
 0xf8b   :  { %v2193_v44 = vpop.xlane.xlu1 %2192 }
 0xf8c   :  { %3790 = vrcp.f32 %v2193_v44 }
 0xf8e   :  { %v3781_v26 = vpop.eup %3780 }
 0xf8f   :  { %v2298_v40 = vpop.permute.xlu1 %2297  ;;  %v2202_v11 = vpop.xlane.xlu0 %2201  ;;  %v2260_v10 = vmul.f32 %v3781_v26, %v5319_v39 }
 0xf90   :  { %3450 = vmatprep.subr.bf16.mxu0 %v2298_v40  ;;  %v3783_v12 = vpop.eup %3782 }
 0xf91   :  { %3451 = vmatpush3.bf16.msra.mxu0 %v2298_v40  ;;  %v3785_v37 = vpop.eup %3784  ;;  %v2257_v31 = vmul.f32 %v3783_v12, %v5285_v50 }
 0xf92   :  { %3492 = vmatprep.subr.bf16.mxu0 %v3904_v42  ;;  %v2259_v2 = vmul.f32 %v3785_v37, %v5309_v5  ;;  %v3787_v47 = vpop.eup %3786  ;;  %v3880_v37 = vld [vmem:[%s5695_s1] sm:$0xff] }
 0xf93   :  { %v2196_v45 = vpop.xlane.xlu0 %2195  ;;  %v2278_v54 = vpack.c.bf16 %v2258_v19, %v2257_v31  ;;  %v3789_v43 = vpop.eup %3788  ;;  %v2262_v41 = vmul.f32 %v3787_v47, %v5314_v59 }
 0xf94   :  { %3792 = vrcp.f32 %v2196_v45  ;;  %3453 = vmatmul.mubr.msk.bf16.vlgmr.msra.gmra.mrb[60].mxu0 %vm582_vm2, %v2276_v55  ;;  %v2279_v30 = vpack.c.bf16 %v2260_v10, %v2259_v2  ;;  %v2261_v62 = vmul.f32 %v3789_v43, %v5304_v0 }
 0xf95   :  { %3456 = vmatprep.mubr.msk.bf16.mxu0 %vm582_vm2, %v2277_v24  ;;  %3794 = vrcp.f32 %v2202_v11  ;;  %v3572_v24 = vld [vmem:[%s5693_s3 + $0x10] ss:$28 sps:$4 sm:$0xff]  }
 0xf96   :  { %3796 = vrcp.f32 %v2199_v36  ;;  %v3791_v1 = vpop.eup %3790  ;;  %v2280_v49 = vpack.c.bf16 %v2262_v41, %v2261_v62  ;;  %3477 = vmatpush3.bf16.msra.mxu1 %v3572_v24  ;;  %v3885_v62 = vld [vmem:[%s5695_s1 + $0x50] sm:$0xff] }
 0xf97   :  { %v2211_v56 = vpop.xlane.xlu0 %2210  ;;  %v2263_v5 = vmul.f32 %v3791_v1, %v5329_v7  ;;  %3478 = vmatprep.subr.bf16.mxu1 %v3904_v42 }
 0xf9b   :  { %v2205_v51 = vpop.xlane.xlu0 %2204 }
 0xf9c   :  { %3457 = vmatmul.mubr.msk.bf16.gmra.mrb[64].mxu0 %vm582_vm2, %v2278_v54  ;;  %v3882_v54 = vld [vmem:[%s5695_s1 + $0x8] sm:$0xff] }
 0xf9d   :  { %3460 = vmatprep.mubr.msk.bf16.mxu0 %vm582_vm2, %v2279_v30  ;;  %v3883_v30 = vld [vmem:[%s5695_s1 + $0x38] sm:$0xff] }
 0xf9e   :  { %v3793_v58 = vpop.eup %3792 }
 0xf9f   :  { %v2214_v39 = vpop.xlane.xlu0 %2213  ;;  %v2264_v50 = vmul.f32 %v3793_v58, %v5340_v9  ;;  %v3795_v46 = vpop.eup %3794 }
 0xfa0   :  { %3798 = vrcp.f32 %v2214_v39  ;;  %v3797_v20 = vpop.eup %3796  ;;  %v2266_v59 = vmul.f32 %v3795_v46, %v5335_v25  ;;  %v3884_v39 = vld [vmem:[%s5695_s1 + $0x20] sm:$0xff]  ;;  %v3886_v46 = vld [vmem:[%s5695_s1 + $0x10] sm:$0xff] }
 0xfa1   :  { %3800 = vrcp.f32 %v2205_v51  ;;  %v2281_v23 = vpack.c.bf16 %v2264_v50, %v2263_v5  ;;  %v2265_v9 = vmul.f32 %v3797_v20, %v5324_v16 }
 0xfa2   :  { %3802 = vrcp.f32 %v2211_v56  ;;  %v3881_v56 = vld [vmem:[%s5695_s1 + $0x30] sm:$0xff] }
 0xfa3   :  { %v2208_v34 = vpop.xlane.xlu0 %2207  ;;  %v2282_v0 = vpack.c.bf16 %v2266_v59, %v2265_v9  ;;  %v3888_v9 = vld [vmem:[%s5695_s1 + $0x28] sm:$0xff] }
 0xfa4   :  { %3804 = vrcp.f32 %v2208_v34  ;;  %3461 = vmatmul.mubr.msk.bf16.gmra.mrb[68].mxu0 %vm582_vm2, %v2280_v49 }
 0xfa5   :  { %3464 = vmatprep.mubr.msk.bf16.mxu0 %vm582_vm2, %v2281_v23  ;;  %v3887_v23 = vld [vmem:[%s5695_s1 + $0x40] sm:$0xff] }
 0xfa7   :  { %v2217_v44 = vpop.xlane.xlu0 %2216 }
 0xfaa   :  { %v3799_v29 = vpop.eup %3798 }
 0xfab   :  { %v3801_v22 = vpop.eup %3800  ;;  %v2270_v17 = vmul.f32 %v3799_v29, %v5355_v21  ;;  %v2223_v16 = vpop.xlane.xlu0 %2222 }
 0xfac   :  { %3465 = vmatmul.mubr.msk.bf16.gmra.mrb[72].mxu0 %vm582_vm2, %v2282_v0  ;;  %v3803_v7 = vpop.eup %3802  ;;  %v2267_v3 = vmul.f32 %v3801_v22, %v5350_v14  ;;  %v3889_v22 = vld [vmem:[%s5695_s1 + $0x58] sm:$0xff] }
 0xfad   :  { %v2269_v4 = vmul.f32 %v3803_v7, %v5345_v52 }
 0xfae   :  { %v3805_v36 = vpop.eup %3804 }
 0xfaf   :  { %v2268_v53 = vmul.f32 %v3805_v36, %v5363_v35  ;;  %v2284_v25 = vpack.c.bf16 %v2270_v17, %v2269_v4  ;;  %v2226_v40 = vpop.xlane.xlu0 %2225  ;;  %v3890_v17 = vld [vmem:[%s5695_s1 + $0x18] sm:$0xff] }
 0xfb0   :  { %3806 = vrcp.f32 %v2226_v40  ;;  %v3892_v40 = vld [vmem:[%s5695_s1 + $0x70] sm:$0xff] }
 0xfb1   :  { %v2283_v60 = vpack.c.bf16 %v2268_v53, %v2267_v3  ;;  %3808 = vrcp.f32 %v2217_v44  ;;  %v3891_v53 = vld [vmem:[%s5695_s1 + $0x48] sm:$0xff] }
 0xfb2   :  { %3810 = vrcp.f32 %v2223_v16 }
 0xfb3   :  { %3468 = vmatprep.mubr.msk.bf16.mxu0 %vm582_vm2, %v2283_v60 }
 0xfb4   :  { %3469 = vmatmul.mubr.msk.bf16.gmra.mrb[76].mxu0 %vm582_vm2, %v2284_v25 }
 0xfba   :  { %v3807_v21 = vpop.eup %3806 }
 0xfbb   :  { %v3809_v48 = vpop.eup %3808  ;;  %v2274_v35 = vmul.f32 %v3807_v21, %v5376_v18 }
 0xfbc   :  { %v3811_v14 = vpop.eup %3810  ;;  %v2271_v52 = vmul.f32 %v3809_v48, %v5367_v38  ;;  %v3573_v38 = vld [vmem:[%s5693_s3 + $0x48] ss:$28 sps:$4 sm:$0xff]  }
 0xfbd   :  { %v2273_v55 = vmul.f32 %v3811_v14, %v5371_v57  ;;  %3479 = vmatpush3.bf16.msra.mxu1 %v3573_v38  ;;  %v3893_v48 = vld [vmem:[%s5695_s1 + $0x60] sm:$0xff] }
 0xfbe   :  { %3508 = vmatprep.subr.bf16.mxu1 %v3904_v42 }
 0xfbf   :  { %v2286_v45 = vpack.c.bf16 %v2274_v35, %v2273_v55 }
 0xfc0   :  { %v2220_v11 = vpop.xlane.xlu1 %2219 }
 0xfc1   :  { %3812 = vrcp.f32 %v2220_v11 }
 0xfcb   :  { %v3813_v15 = vpop.eup %3812 }
 0xfcc   :  { %v2272_v8 = vmul.f32 %v3813_v15, %v5380_v6 }
 0xfce   :  { %v2285_v27 = vpack.c.bf16 %v2272_v8, %v2271_v52  ;;  %v3894_v52 = vld [vmem:[%s5695_s1 + $0x78] sm:$0xff] }
 0xfd0   :  { %3472 = vmatprep.mubr.msk.bf16.mxu0 %vm582_vm2, %v2285_v27 }
 0xfd1   :  { %3473 = vmatmul.mubr.msk.bf16.gmra.mrb[80].mxu0 %vm582_vm2, %v2286_v45  ;;  %v3895_v45 = vld [vmem:[%s5695_s1 + $0x68] sm:$0xff] }
 0xfd2   :  { %3496 = vmatprep.mubr.msk.bf16.mxu0 %vm3905_vm1, %v3904_v42 }
0x1067   :  { %v3454_v57 = vpop.f32.mrb[60].mxu0 }
0x1068   :  { %v2372_v18 = vpop.f32.mrb[61].mxu0  ;;  %v2469_v34 = vmul.f32 %v3886_v46, %v3454_v57 }
0x1069   :  { %v3455_v6 = vpop.f32.mrb[62].mxu0  ;;  %v2467_v19 = vmul.f32 %v3880_v37, %v2372_v18  ;;  %v3897_v37 = vld [vmem:[%s5695_s1 + $0x80] sm:$0xff] }
0x106a   :  { %v2375_v26 = vpop.f32.mrb[63].mxu0  ;;  %v2470_v44 = vmul.f32 %v3890_v17, %v3455_v6  ;;  %v3896_v6 = vld [vmem:[%s5695_s1 + $0x90] sm:$0xff] }
0x106b   :  { %v2468_v47 = vmul.f32 %v3882_v54, %v2375_v26 }
0x106f   :  { %v3458_v12 = vpop.f32.mrb[64].mxu0 }
0x1070   :  { %v2473_v10 = vmul.f32 %v3881_v56, %v3458_v12  ;;  %v2388_v31 = vpop.f32.mrb[65].mxu0 }
0x1071   :  { %v3459_v2 = vpop.f32.mrb[66].mxu0  ;;  %v2471_v50 = vmul.f32 %v3884_v39, %v2388_v31  ;;  %v3898_v31 = vld [vmem:[%s5695_s1 + $0x98] sm:$0xff]  ;;  %v3900_v39 = vld [vmem:[%s5695_s1 + $0xb0] sm:$0xff] }
0x1072   :  { %v2491_v51 = vadd.f32 %v2473_v10, %v2467_v19  ;;  %v2474_v43 = vmul.f32 %v3883_v30, %v3459_v2  ;;  %v2391_v1 = vpop.f32.mrb[67].mxu0 }
0x1073   :  { %v2472_v0 = vmul.f32 %v3888_v9, %v2391_v1 }
0x1074   :  { %v2492_v58 = vadd.f32 %v2474_v43, %v2468_v47 }
0x1077   :  { %v3462_v41 = vpop.f32.mrb[68].mxu0 }
0x1078   :  { %v2477_v5 = vmul.f32 %v3885_v62, %v3462_v41  ;;  %v2404_v49 = vpop.f32.mrb[69].mxu0 }
0x1079   :  { %v2475_v20 = vmul.f32 %v3887_v23, %v2404_v49  ;;  %v3463_v59 = vpop.f32.mrb[70].mxu0  ;;  %v3902_v23 = vld [vmem:[%s5695_s1 + $0xb8] sm:$0xff] }
0x107a   :  { %v2495_v29 = vadd.f32 %v2477_v5, %v2471_v50  ;;  %v2478_v7 = vmul.f32 %v3889_v22, %v3463_v59  ;;  %v2407_v36 = vpop.f32.mrb[71].mxu0  ;;  %v3901_v5 = vld [vmem:[%s5695_s1 + $0xa0] sm:$0xff] }
0x107b   :  { %v2493_v3 = vadd.f32 %v2475_v20, %v2469_v34  ;;  %v2476_v4 = vmul.f32 %v3891_v53, %v2407_v36 }
0x107c   :  { %v2496_v60 = vadd.f32 %v2478_v7, %v2472_v0  ;;  %v3903_v0 = vld [vmem:[%s5695_s1 + $0xa8] sm:$0xff] }
0x107d   :  { %v2494_v25 = vadd.f32 %v2476_v4, %v2470_v44  ;;  %v3124_v44 = vld [vmem:[%s5694_s5 + $0xb] ss:$0 sm:$0xff] }
0x107f   :  { %v3466_v16 = vpop.f32.mrb[72].mxu0 }
0x1080   :  { %v2481_v11 = vmul.f32 %v3892_v40, %v3466_v16  ;;  %v2420_v21 = vpop.f32.mrb[73].mxu0 }
0x1081   :  { %v2479_v14 = vmul.f32 %v3893_v48, %v2420_v21  ;;  %v3467_v15 = vpop.f32.mrb[74].mxu0 }
0x1082   :  { %v2499_v35 = vadd.f32 %v2493_v3, %v2481_v11  ;;  %v2482_v8 = vmul.f32 %v3894_v52, %v3467_v15  ;;  %v2423_v55 = vpop.f32.mrb[75].mxu0 }
0x1083   :  { %v2497_v27 = vadd.f32 %v2491_v51, %v2479_v14  ;;  %v2480_v24 = vmul.f32 %v3895_v45, %v2423_v55  ;;  %v3899_v51 = vld [vmem:[%s5695_s1 + $0x88] sm:$0xff] }
0x1084   :  { %v2500_v38 = vadd.f32 %v2494_v25, %v2482_v8 }
0x1085   :  { %v2498_v57 = vadd.f32 %v2492_v58, %v2480_v24 }
0x1087   :  { %v3470_v18 = vpop.f32.mrb[76].mxu0 }
0x1088   :  { %v2485_v26 = vmul.f32 %v3896_v6, %v3470_v18  ;;  %v2436_v12 = vpop.f32.mrb[77].mxu0 }
0x1089   :  { %v2483_v19 = vmul.f32 %v3897_v37, %v2436_v12  ;;  %v3471_v56 = vpop.f32.mrb[78].mxu0 }
0x108a   :  { %v2503_v10 = vadd.f32 %v2497_v27, %v2485_v26  ;;  %v2486_v2 = vmul.f32 %v3898_v31, %v3471_v56  ;;  %v2439_v54 = vpop.f32.mrb[79].mxu0 }
0x108b   :  { %v2501_v47 = vadd.f32 %v2495_v29, %v2483_v19  ;;  %v2484_v30 = vmul.f32 %v3899_v51, %v2439_v54 }
0x108c   :  { %v2504_v43 = vadd.f32 %v2498_v57, %v2486_v2 }
0x108d   :  { %v2502_v1 = vadd.f32 %v2496_v60, %v2484_v30 }
0x108e   :  { %v2509_v58 = vpack.c.bf16 %v2504_v43, %v2503_v10 }
0x1090   :  { %3481 = vmatmul.mubr.msk.bf16.vlgmr.msra.gmra.mrb[72].mxu1 %vm38_vm0, %v2509_v58 }
0x1091   :  { %3484 = vmatprep.mubr.msk.bf16.mxu1 %vm3905_vm1, %v3904_v42 }
0x10a4   :  { %v3474_v41 = vpop.f32.mrb[80].mxu0 }
0x10a5   :  { %v2489_v50 = vmul.f32 %v3900_v39, %v3474_v41  ;;  %v2452_v62 = vpop.f32.mrb[81].mxu0 }
0x10a6   :  { %v2487_v49 = vmul.f32 %v3901_v5, %v2452_v62  ;;  %v3475_v46 = vpop.f32.mrb[82].mxu0 }
0x10a7   :  { %v2507_v34 = vadd.f32 %v2501_v47, %v2489_v50  ;;  %v2490_v20 = vmul.f32 %v3902_v23, %v3475_v46  ;;  %v2455_v59 = vpop.f32.mrb[83].mxu0 }
0x10a8   :  { %v2505_v9 = vadd.f32 %v2499_v35, %v2487_v49  ;;  %v2488_v29 = vmul.f32 %v3903_v0, %v2455_v59 }
0x10a9   :  { %v2508_v22 = vadd.f32 %v2502_v1, %v2490_v20  ;;  %v3574_v20 = vld [vmem:[%s5693_s3 + $0x14] ss:$28 sps:$4 sm:$0xff]  }
0x10aa   :  { %v2506_v7 = vadd.f32 %v2500_v38, %v2488_v29  ;;  %3493 = vmatpush3.bf16.msra.mxu0 %v3574_v20 }
0x10ab   :  { %v2511_v36 = vpack.c.bf16 %v2508_v22, %v2507_v34  ;;  %3494 = vmatprep.subr.bf16.mxu0 %v3904_v42 }
0x10ac   :  { %v2510_v17 = vpack.c.bf16 %v2506_v7, %v2505_v9  ;;  %v3575_v7 = vld [vmem:[%s5693_s3 + $0x4c] ss:$28 sps:$4 sm:$0xff]  }
0x10ae   :  { %3485 = vmatmul.mubr.msk.bf16.gmra.mrb[76].mxu1 %vm38_vm0, %v2510_v17  ;;  %3495 = vmatpush3.bf16.msra.mxu0 %v3575_v7 }
0x10af   :  { %3488 = vmatprep.mubr.msk.bf16.mxu1 %vm3905_vm1, %v3904_v42  ;;  %3536 = vmatprep.subr.bf16.mxu0 %v3904_v42 }
0x10b6   :  { %3489 = vmatmul.mubr.msk.bf16.gmra.mrb[80].mxu1 %vm38_vm0, %v2511_v36 }
0x10b7   :  { %3524 = vmatprep.mubr.msk.bf16.mxu1 %vm3905_vm1, %v3904_v42 }
0x1163   :  { %v2575_v3 = vpop.f32.mrb[72].mxu1 }
0x1164   :  { %v2576_v53 = vadd.f32 %v3124_v44, %v2575_v3  ;;  %v3482_v4 = vpop.f32.mrb[73].mxu1  ;;  %v3577_v3 = vld [vmem:[%s5697_s4 + $0x14] ss:$8 sps:$4 sm:$0xff]  }
0x1165   :  { %v2578_v60 = vpop.f32.mrb[74].mxu1  ;;  %v3579_v4 = vld [vmem:[%s5697_s4 + $0x34] ss:$8 sps:$4 sm:$0xff]  }
0x1166   :  { %v5516_v25 = vadd.f32 %v2576_v53, %v4884_v61  ;;  %v2579_v16 = vadd.f32 %v3124_v44, %v2578_v60  ;;  %v3483_v40 = vpop.f32.mrb[75].mxu1  ;;  %v3578_v53 = vld [vmem:[%s5697_s4 + $0x24] ss:$8 sps:$4 sm:$0xff]  }
0x1167   :  { %v3580_v60 = vld [vmem:[%s5697_s4 + $0x44] ss:$8 sps:$4 sm:$0xff]  }
0x1168   :  { %v5519_v11 = vadd.f32 %v2579_v16, %v4887_v63  ;;  %v2604_v21 = vsel %vm38_vm0, %v5516_v25, 0.0  ;;  %v3581_v16 = vld [vmem:[%s5697_s4 + $0x54] ss:$8 sps:$4 sm:$0xff]  }
0x1169   :  { %2605 = vadd.xlane.f32.xlu0 %v2604_v21 }
0x116a   :  { %v2607_v48 = vsel %vm38_vm0, %v5519_v11, 0.0 }
0x116d   :  { %2608 = vadd.xlane.f32.xlu0 %v2607_v48 }
0x1181   :  { %v2583_v14 = vpop.f32.mrb[76].mxu1 }
0x1182   :  { %v2584_v15 = vadd.f32 %v3124_v44, %v2583_v14  ;;  %v3486_v35 = vpop.f32.mrb[77].mxu1 }
0x1183   :  { %v2586_v52 = vpop.f32.mrb[78].mxu1 }
0x1184   :  { %v5526_v61 = vadd.f32 %v2584_v15, %v4894_v13  ;;  %v2587_v8 = vadd.f32 %v3124_v44, %v2586_v52  ;;  %v3487_v55 = vpop.f32.mrb[79].mxu1 }
0x1185   :  { %v3130_v55 = vld [vmem:[%s5694_s5 + $0xc] ss:$0 sm:$0xff] }
0x1186   :  { %v5529_v63 = vadd.f32 %v2587_v8, %v4897_v33  ;;  %v2610_v27 = vsel %vm38_vm0, %v5526_v61, 0.0 }
0x1187   :  { %2611 = vadd.xlane.f32.xlu0 %v2610_v27 }
0x1188   :  { %v2613_v57 = vsel %vm38_vm0, %v5529_v63, 0.0 }
0x1189   :  { %v2591_v45 = vpop.f32.mrb[80].mxu1 }
0x118a   :  { %v2592_v24 = vadd.f32 %v3124_v44, %v2591_v45  ;;  %v3490_v38 = vpop.f32.mrb[81].mxu1 }
0x118b   :  { %2614 = vadd.xlane.f32.xlu0 %v2613_v57  ;;  %v2594_v18 = vpop.f32.mrb[82].mxu1  ;;  %v3131_v38 = vld [vmem:[%s5694_s5 + $0xd] ss:$0 sm:$0xff] }
0x118c   :  { %v5536_v13 = vadd.f32 %v2592_v24, %v4904_v28  ;;  %v2595_v6 = vadd.f32 %v3124_v44, %v2594_v18  ;;  %v3491_v26 = vpop.f32.mrb[83].mxu1  ;;  %v3576_v44 = vld [vmem:[%s5697_s4 + $0x4] ss:$8 sps:$4 sm:$0xff]  }
0x118d   :  { %3509 = vmatpush3.bf16.msra.mxu1 %v3576_v44 }
0x118e   :  { %v5539_v33 = vadd.f32 %v2595_v6, %v4907_v32  ;;  %v2616_v12 = vsel %vm38_vm0, %v5536_v13, 0.0  ;;  %3510 = vmatprep.subr.bf16.mxu1 %v3904_v42 }
0x118f   :  { %2617 = vadd.xlane.f32.xlu0 %v2616_v12 }
0x1190   :  { %v2619_v37 = vsel %vm38_vm0, %v5539_v33, 0.0 }
0x1191   :  { %3511 = vmatpush3.bf16.msra.mxu1 %v3577_v3 }
0x1192   :  { %3512 = vmatprep.subr.bf16.mxu1 %v3904_v42 }
0x1193   :  { %2620 = vadd.xlane.f32.xlu0 %v2619_v37 }
0x1195   :  { %3513 = vmatpush3.bf16.msra.mxu1 %v3578_v53 }
0x1196   :  { %3514 = vmatprep.subr.bf16.mxu1 %v3904_v42 }
0x1199   :  { %3515 = vmatpush3.bf16.msra.mxu1 %v3579_v4 }
0x119a   :  { %3516 = vmatprep.subr.bf16.mxu1 %v3904_v42 }
0x119d   :  { %3517 = vmatpush3.bf16.msra.mxu1 %v3580_v60 }
0x119e   :  { %3518 = vmatprep.subr.bf16.mxu1 %v3904_v42 }
0x11a1   :  { %3519 = vmatpush3.bf16.msra.mxu1 %v3581_v16 }
0x11a2   :  { %3520 = vmatprep.subr.bf16.mxu1 %v3904_v42 }
0x11f6   :  { %v2606_v19 = vpop.xlane.xlu0 %2605 }
0x11f7   :  { %v2622_v56 = vmul.f32 0.03125, %v2606_v19 }
0x11f9   :  { %v5546_v10 = vsub.f32 %v5516_v25, %v2622_v56 }
0x11fa   :  { %v2609_v28 = vpop.xlane.xlu0 %2608 }
0x11fb   :  { %v2623_v31 = vmul.f32 0.03125, %v2609_v28  ;;  %v2634_v2 = vmul.f32 %v5546_v10, %v5546_v10 }
0x11fd   :  { %v5551_v32 = vsub.f32 %v5519_v11, %v2623_v31  ;;  %v2640_v54 = vsel %vm38_vm0, %v2634_v2, 0.0 }
0x11fe   :  { %2641 = vadd.xlane.f32.xlu0 %v2640_v54 }
0x11ff   :  { %v2635_v47 = vmul.f32 %v5551_v32, %v5551_v32 }
0x1201   :  { %v2643_v51 = vsel %vm38_vm0, %v2635_v47, 0.0 }
0x1202   :  { %2644 = vadd.xlane.f32.xlu1 %v2643_v51 }
0x1214   :  { %v2612_v30 = vpop.xlane.xlu0 %2611 }
0x1215   :  { %v2624_v43 = vmul.f32 0.03125, %v2612_v30 }
0x1217   :  { %v5558_v1 = vsub.f32 %v5526_v61, %v2624_v43 }
0x1218   :  { %v2615_v58 = vpop.xlane.xlu0 %2614 }
0x1219   :  { %v2625_v41 = vmul.f32 0.03125, %v2615_v58  ;;  %v2636_v39 = vmul.f32 %v5558_v1, %v5558_v1 }
0x121b   :  { %v5563_v50 = vsub.f32 %v5529_v63, %v2625_v41  ;;  %v2646_v62 = vsel %vm38_vm0, %v2636_v39, 0.0 }
0x121c   :  { %2647 = vadd.xlane.f32.xlu0 %v2646_v62  ;;  %v2618_v5 = vpop.xlane.xlu0 %2617 }
0x121d   :  { %v2626_v49 = vmul.f32 0.03125, %v2618_v5  ;;  %v2637_v46 = vmul.f32 %v5563_v50, %v5563_v50 }
0x121f   :  { %v5569_v34 = vsub.f32 %v5536_v13, %v2626_v49  ;;  %v2649_v23 = vsel %vm38_vm0, %v2637_v46, 0.0 }
0x1220   :  { %2650 = vadd.xlane.f32.xlu1 %v2649_v23  ;;  %v2621_v59 = vpop.xlane.xlu0 %2620 }
0x1221   :  { %v2627_v9 = vmul.f32 0.03125, %v2621_v59  ;;  %v2638_v0 = vmul.f32 %v5569_v34, %v5569_v34 }
0x1223   :  { %v5579_v29 = vsub.f32 %v5539_v33, %v2627_v9  ;;  %v2652_v22 = vsel %vm38_vm0, %v2638_v0, 0.0 }
0x1224   :  { %2653 = vadd.xlane.f32.xlu0 %v2652_v22 }
0x1225   :  { %v2639_v36 = vmul.f32 %v5579_v29, %v5579_v29 }
0x1227   :  { %v2655_v17 = vsel %vm38_vm0, %v2639_v36, 0.0  ;;  %v3132_v36 = vld [vmem:[%s5694_s5 + $0xe] ss:$0 sm:$0xff] }
0x1228   :  { %2656 = vadd.xlane.f32.xlu1 %v2655_v17 }
0x128b   :  { %v2642_v40 = vpop.xlane.xlu0 %2641 }
0x128c   :  { %v2658_v21 = vmul.f32 0.03125, %v2642_v40 }
0x128e   :  { %v2664_v48 = vadd.f32 1e-05, %v2658_v21 }
0x128f   :  { %v2645_v14 = vpop.xlane.xlu1 %2644 }
0x1290   :  { %3814 = vrsqrt.f32 %v2664_v48  ;;  %v2659_v15 = vmul.f32 0.03125, %v2645_v14 }
0x1292   :  { %v2665_v35 = vadd.f32 1e-05, %v2659_v15 }
0x1294   :  { %3816 = vrsqrt.f32 %v2665_v35 }
0x129a   :  { %v3815_v52 = vpop.eup %3814 }
0x129b   :  { %v2676_v8 = vmul.f32 %v3815_v52, %v5546_v10 }
0x129d   :  { %v2686_v45 = vmul.f32 %v3130_v55, %v2676_v8 }
0x129e   :  { %v3817_v27 = vpop.eup %3816 }
0x129f   :  { %v2677_v24 = vmul.f32 %v3817_v27, %v5551_v32  ;;  %v2696_v18 = vadd.f32 %v3131_v38, %v2686_v45 }
0x12a1   :  { %v2687_v57 = vmul.f32 %v3130_v55, %v2677_v24 }
0x12a3   :  { %v2697_v6 = vadd.f32 %v3131_v38, %v2687_v57 }
0x12a5   :  { %v2702_v26 = vpack.c.bf16 %v2697_v6, %v2696_v18 }
0x12a7   :  { %3497 = vmatmul.mubr.msk.bf16.vlgmr.msra.gmra.mrb[84].mxu0 %vm38_vm0, %v2702_v26 }
0x12a8   :  { %3500 = vmatprep.mubr.msk.bf16.mxu0 %vm3905_vm1, %v3904_v42 }
0x12a9   :  { %v2648_v12 = vpop.xlane.xlu0 %2647 }
0x12aa   :  { %v2660_v37 = vmul.f32 0.03125, %v2648_v12 }
0x12ac   :  { %v2666_v19 = vadd.f32 1e-05, %v2660_v37 }
0x12ad   :  { %v2651_v56 = vpop.xlane.xlu1 %2650 }
0x12ae   :  { %3818 = vrsqrt.f32 %v2666_v19  ;;  %v2661_v10 = vmul.f32 0.03125, %v2651_v56  ;;  %v3584_v56 = vld [vmem:[%s5693_s3 + $0x18] ss:$28 sps:$4 sm:$0xff]  }
0x12af   :  { %3537 = vmatpush3.bf16.msra.mxu0 %v3584_v56 }
0x12b0   :  { %v2667_v28 = vadd.f32 1e-05, %v2661_v10  ;;  %3538 = vmatprep.subr.bf16.mxu0 %v3904_v42  ;;  %v3585_v10 = vld [vmem:[%s5693_s3 + $0x50] ss:$28 sps:$4 sm:$0xff]  }
0x12b1   :  { %v2654_v31 = vpop.xlane.xlu0 %2653 }
0x12b2   :  { %3820 = vrsqrt.f32 %v2667_v28  ;;  %v2662_v2 = vmul.f32 0.03125, %v2654_v31 }
0x12b3   :  { %3539 = vmatpush3.bf16.msra.mxu0 %v3585_v10 }
0x12b4   :  { %v2668_v32 = vadd.f32 1e-05, %v2662_v2 }
0x12b5   :  { %v2657_v54 = vpop.xlane.xlu1 %2656 }
0x12b6   :  { %3822 = vrsqrt.f32 %v2668_v32  ;;  %v2663_v47 = vmul.f32 0.03125, %v2657_v54  ;;  %v3146_v32 = vld [vmem:[%s5694_s5 + $0xf] ss:$0 sm:$0xff] }
0x12b8   :  { %v3819_v51 = vpop.eup %3818  ;;  %v2669_v30 = vadd.f32 1e-05, %v2663_v47 }
0x12b9   :  { %v2678_v43 = vmul.f32 %v3819_v51, %v5558_v1 }
0x12ba   :  { %3824 = vrsqrt.f32 %v2669_v30 }
0x12bb   :  { %v2688_v39 = vmul.f32 %v3130_v55, %v2678_v43 }
0x12bc   :  { %v3821_v58 = vpop.eup %3820 }
0x12bd   :  { %v2679_v41 = vmul.f32 %v3821_v58, %v5563_v50  ;;  %v2698_v46 = vadd.f32 %v3131_v38, %v2688_v39 }
0x12bf   :  { %v2689_v62 = vmul.f32 %v3130_v55, %v2679_v41 }
0x12c0   :  { %v3823_v5 = vpop.eup %3822 }
0x12c1   :  { %v2680_v49 = vmul.f32 %v3823_v5, %v5569_v34  ;;  %v2699_v23 = vadd.f32 %v3131_v38, %v2689_v62  ;;  %v3582_v34 = vld [vmem:[%s5697_s4 + $0x64] ss:$8 sps:$4 sm:$0xff]  }
0x12c2   :  { %3521 = vmatpush3.bf16.msra.mxu1 %v3582_v34 }
0x12c3   :  { %v2703_v20 = vpack.c.bf16 %v2699_v23, %v2698_v46  ;;  %v2690_v0 = vmul.f32 %v3130_v55, %v2680_v49  ;;  %3522 = vmatprep.subr.bf16.mxu1 %v3904_v42 }
0x12c4   :  { %v3825_v59 = vpop.eup %3824 }
0x12c5   :  { %v2681_v9 = vmul.f32 %v3825_v59, %v5579_v29  ;;  %3501 = vmatmul.mubr.msk.bf16.gmra.mrb[88].mxu0 %vm38_vm0, %v2703_v20  ;;  %v2700_v22 = vadd.f32 %v3131_v38, %v2690_v0  ;;  %v3583_v29 = vld [vmem:[%s5697_s4 + $0x74] ss:$8 sps:$4 sm:$0xff]  }
0x12c6   :  { %3504 = vmatprep.mubr.msk.bf16.mxu0 %vm3905_vm1, %v3904_v42  ;;  %3523 = vmatpush3.bf16.msra.mxu1 %v3583_v29 }
0x12c7   :  { %v2691_v1 = vmul.f32 %v3130_v55, %v2681_v9 }
0x12c9   :  { %v2701_v50 = vadd.f32 %v3131_v38, %v2691_v1 }
0x12cb   :  { %v2704_v7 = vpack.c.bf16 %v2701_v50, %v2700_v22 }
0x12cd   :  { %3505 = vmatmul.mubr.msk.bf16.gmra.mrb[92].mxu0 %vm38_vm0, %v2704_v7  ;;  %v3147_v7 = vld [vmem:[%s5694_s5 + $0x10] ss:$0 sm:$0xff] }
0x12ce   :  { %3540 = vmatprep.mubr.msk.bf16.mxu0 %vm3905_vm1, %v3904_v42 }
0x137a   :  { %v2768_v17 = vpop.f32.mrb[84].mxu0 }
0x137b   :  { %v2769_v44 = vadd.f32 %v3132_v36, %v2768_v17  ;;  %v3498_v3 = vpop.f32.mrb[85].mxu0 }
0x137c   :  { %v2771_v53 = vpop.f32.mrb[86].mxu0 }
0x137d   :  { %v2772_v4 = vadd.f32 %v3132_v36, %v2771_v53  ;;  %v3499_v60 = vpop.f32.mrb[87].mxu0  ;;  %v2791_v16 = vmax.f32 %v2769_v44, 0.0 }
0x137f   :  { %v2792_v40 = vmax.f32 %v2772_v4, 0.0 }
0x1381   :  { %v2797_v21 = vpack.c.bf16 %v2792_v40, %v2791_v16 }
0x1383   :  { %3525 = vmatmul.mubr.bf16.vlgmr.msra.gmra.mrb[84].mxu1 %v2797_v21 }
0x1384   :  { %3528 = vmatprep.mubr.msk.bf16.mxu1 %vm3905_vm1, %v3904_v42 }
0x1398   :  { %v2776_v48 = vpop.f32.mrb[88].mxu0 }
0x1399   :  { %v2777_v14 = vadd.f32 %v3132_v36, %v2776_v48  ;;  %v3502_v15 = vpop.f32.mrb[89].mxu0 }
0x139a   :  { %v2779_v35 = vpop.f32.mrb[90].mxu0 }
0x139b   :  { %v2780_v52 = vadd.f32 %v3132_v36, %v2779_v35  ;;  %v3503_v8 = vpop.f32.mrb[91].mxu0  ;;  %v2793_v55 = vmax.f32 %v2777_v14, 0.0 }
0x139d   :  { %v2794_v27 = vmax.f32 %v2780_v52, 0.0 }
0x139f   :  { %v2798_v45 = vpack.c.bf16 %v2794_v27, %v2793_v55 }
0x13a0   :  { %v2784_v24 = vpop.f32.mrb[92].mxu0 }
0x13a1   :  { %v2785_v38 = vadd.f32 %v3132_v36, %v2784_v24  ;;  %v3506_v57 = vpop.f32.mrb[93].mxu0  ;;  %3529 = vmatmul.mubr.bf16.gmra.mrb[88].mxu1 %v2798_v45 }
0x13a2   :  { %v2787_v18 = vpop.f32.mrb[94].mxu0  ;;  %3532 = vmatprep.mubr.msk.bf16.mxu1 %vm3905_vm1, %v3904_v42 }
0x13a3   :  { %v2788_v6 = vadd.f32 %v3132_v36, %v2787_v18  ;;  %v3507_v26 = vpop.f32.mrb[95].mxu0  ;;  %v2795_v12 = vmax.f32 %v2785_v38, 0.0 }
0x13a5   :  { %v2796_v37 = vmax.f32 %v2788_v6, 0.0 }
0x13a7   :  { %v2799_v19 = vpack.c.bf16 %v2796_v37, %v2795_v12 }
0x13a9   :  { %3533 = vmatmul.mubr.bf16.gmra.mrb[92].mxu1 %v2799_v19 }
0x1456   :  { %v2898_v28 = vpop.f32.mrb[84].mxu1 }
0x1457   :  { %v2921_v31 = vadd.f32 %v2898_v28, %v5516_v25  ;;  %v3526_v2 = vpop.f32.mrb[85].mxu1 }
0x1458   :  { %v2901_v54 = vpop.f32.mrb[86].mxu1 }
0x1459   :  { %v2922_v47 = vadd.f32 %v2901_v54, %v5519_v11  ;;  %v3527_v51 = vpop.f32.mrb[87].mxu1  ;;  %v2931_v30 = vadd.f32 %v3146_v32, %v2921_v31 }
0x145b   :  { %v2932_v43 = vadd.f32 %v3146_v32, %v2922_v47 }
0x145d   :  { %v2938_v58 = vpack.c.bf16 %v2932_v43, %v2931_v30 }
0x145f   :  { %3541 = vmatmul.mubr.msk.bf16.vlgmr.msra.gmra.mrb[96].mxu0 %vm38_vm0, %v2938_v58 }
0x1460   :  { %3544 = vmatprep.mubr.msk.bf16.mxu0 %vm3905_vm1, %v3904_v42 }
0x1474   :  { %v2906_v41 = vpop.f32.mrb[88].mxu1 }
0x1475   :  { %v2923_v25 = vadd.f32 %v2906_v41, %v5526_v61  ;;  %v3530_v39 = vpop.f32.mrb[89].mxu1 }
0x1476   :  { %v2909_v62 = vpop.f32.mrb[90].mxu1 }
0x1477   :  { %v2924_v5 = vadd.f32 %v2909_v62, %v5529_v63  ;;  %v3531_v49 = vpop.f32.mrb[91].mxu1  ;;  %v2933_v46 = vadd.f32 %v3146_v32, %v2923_v25 }
0x1479   :  { %v2934_v23 = vadd.f32 %v3146_v32, %v2924_v5 }
0x147b   :  { %v2939_v11 = vpack.c.bf16 %v2934_v23, %v2933_v46 }
0x147c   :  { %v2914_v20 = vpop.f32.mrb[92].mxu1 }
0x147d   :  { %v2925_v59 = vadd.f32 %v2914_v20, %v5536_v13  ;;  %v3534_v9 = vpop.f32.mrb[93].mxu1  ;;  %3545 = vmatmul.mubr.msk.bf16.gmra.mrb[100].mxu0 %vm38_vm0, %v2939_v11 }
0x147e   :  { %v2917_v0 = vpop.f32.mrb[94].mxu1  ;;  %3548 = vmatprep.mubr.msk.bf16.mxu0 %vm3905_vm1, %v3904_v42 }
0x147f   :  { %v2926_v61 = vadd.f32 %v2917_v0, %v5539_v33  ;;  %v3535_v1 = vpop.f32.mrb[95].mxu1  ;;  %v2935_v22 = vadd.f32 %v3146_v32, %v2925_v59 }
0x1481   :  { %v2936_v50 = vadd.f32 %v3146_v32, %v2926_v61 }
0x1483   :  { %v2940_v63 = vpack.c.bf16 %v2936_v50, %v2935_v22 }
0x1485   :  { %3549 = vmatmul.mubr.msk.bf16.gmra.mrb[104].mxu0 %vm38_vm0, %v2940_v63 }
0x1532   :  { %v3004_v13 = vpop.f32.mrb[96].mxu0 }
0x1533   :  { %v3005_v34 = vadd.f32 %v3147_v7, %v3004_v13  ;;  %v3542_v29 = vpop.f32.mrb[97].mxu0 }
0x1534   :  { %v3007_v36 = vpop.f32.mrb[98].mxu0 }
0x1535   :  { %3027 = vst [vmem:[%s5698_s6] sm:$0xff] %v3005_v34  ;;  %v3008_v42 = vadd.f32 %v3147_v7, %v3007_v36  ;;  %v3543_v33 = vpop.f32.mrb[99].mxu0 }
0x1537   :  { %3028 = vst [vmem:[%s5698_s6 + $0x8] sm:$0xff] %v3008_v42 }
0x1550   :  { %v3012_v17 = vpop.f32.mrb[100].mxu0 }
0x1551   :  { %v3013_v44 = vadd.f32 %v3147_v7, %v3012_v17  ;;  %v3546_v3 = vpop.f32.mrb[101].mxu0 }
0x1552   :  { %v3015_v53 = vpop.f32.mrb[102].mxu0 }
0x1553   :  { %3029 = vst [vmem:[%s5698_s6 + $0x10] sm:$0xff] %v3013_v44  ;;  %v3016_v4 = vadd.f32 %v3147_v7, %v3015_v53  ;;  %v3547_v60 = vpop.f32.mrb[103].mxu0 }
0x1555   :  { %3030 = vst [vmem:[%s5698_s6 + $0x18] sm:$0xff] %v3016_v4 }
0x1558   :  { %v3020_v16 = vpop.f32.mrb[104].mxu0 }
0x1559   :  { %v3021_v40 = vadd.f32 %v3147_v7, %v3020_v16  ;;  %v3550_v21 = vpop.f32.mrb[105].mxu0 }
0x155a   :  { %v3023_v48 = vpop.f32.mrb[106].mxu0 }
0x155b   :  { %3031 = vst [vmem:[%s5698_s6 + $0x20] sm:$0xff] %v3021_v40  ;;  %v3024_v14 = vadd.f32 %v3147_v7, %v3023_v48  ;;  %v3551_v15 = vpop.f32.mrb[107].mxu0 }
0x155d   :  { %3032 = vst [vmem:[%s5698_s6 + $0x28] sm:$0xff] %v3024_v14 }

</bundles_post_ra>
